<compile_context>
chip_gen: v7x
topology: tpu7x:2x2x1
jax: 0.10.0
libtpu: 0.0.40
codegen_flags: <defaults>
</compile_context>

<pallas_src>
import jax
import jax.numpy as jnp
from jax.experimental import pallas as pl
from jax.experimental.pallas import tpu as pltpu

EPS_BN = 1e-5
EPS_NORM = 1e-12

C1, C2, C3, C4 = 32, 64, 128, 256


# ---------------------------------------------------------------------------
# Small helpers
# ---------------------------------------------------------------------------
def _round_up(v, m):
    return -(-v // m) * m


def _tile_bytes(shape, dtype):
    """Bytes of one VMEM buffer including (sublane, lane) layout padding."""
    d = list(shape)
    d[-1] = _round_up(d[-1], 128)
    if len(d) >= 2:
        d[-2] = _round_up(d[-2], 8 if jnp.dtype(dtype).itemsize == 4 else 16)
    n = 1
    for v in d:
        n *= v
    return n * jnp.dtype(dtype).itemsize


# ---------------------------------------------------------------------------
# Fused encoder kernel (whole forward pass for one sample per grid step)
# ---------------------------------------------------------------------------
def _make_kernel(H0, W0):
    H1, W1 = H0 // 2, W0 // 2          # layer-2 conv spatial size
    H2, W2 = H1 // 2, W1 // 2          # layer-3
    H3, W3 = H2 // 2, W2 // 2          # layer-4 (no pool afterwards)

    # Padded row-major-flat activation layout for layer >= 2 inputs:
    #   value A(r, s) lives at flat index (r + 2) * WP + s, everything else 0.
    # WP is a multiple of 8 (so pooled-row stores are sublane-aligned) and
    # >= W + 2 so the zero slots between rows provide the 1-pixel conv halo.
    WP1 = _round_up(W1 + 2, 8)
    WP2 = _round_up(W2 + 2, 8)
    WP3 = _round_up(W3 + 2, 8)
    L1, L2, L3 = (H1 + 3) * WP1, (H2 + 3) * WP2, (H3 + 3) * WP3
    # "Shifted flat" conv output lengths: output row y of a layer occupies
    # flat rows [y * WP_in, y * WP_in + W) of its output scratch.
    M2 = (H1 - 1) * WP1 + W1
    M3 = (H2 - 1) * WP2 + W2
    M4 = (H3 - 1) * WP3 + W3

    def conv_flat(a_ref, w_ref, s_ref, b_ref, wp_in, m):
        """3x3 conv + folded BN + ReLU over a padded flat activation ref."""
        cout = w_ref.shape[-1]
        acc = jnp.zeros((m, cout), jnp.float32)
        for dy in range(3):
            for dx in range(3):
                start = (dy + 1) * wp_in + dx - 1          # shifted tap window
                seg = a_ref[start:start + m, :].astype(jnp.bfloat16)
                acc = acc + jnp.dot(seg, w_ref[dy * 3 + dx],
                                    preferred_element_type=jnp.float32)
        return jnp.maximum(acc * s_ref[...] + b_ref[...], 0.0)

    def pool_into(y_ref, h, w, row_stride, a_next, wp_next):
        """Fused MaxPool2d(2,2): stride-2 reads of the conv-output scratch,
        pooled rows stored into the next layer's padded flat scratch."""
        wo = w // 2
        for py in range(h // 2):
            r0 = (2 * py) * row_stride
            r1 = r0 + row_stride
            p = jnp.maximum(
                jnp.maximum(y_ref[pl.ds(r0, wo, 2), :],
                            y_ref[pl.ds(r0 + 1, wo, 2), :]),
                jnp.maximum(y_ref[pl.ds(r1, wo, 2), :],
                            y_ref[pl.ds(r1 + 1, wo, 2), :]))
            dst = (py + 2) * wp_next                       # 8-aligned store
            a_next[dst:dst + wo, :] = p

    def kernel(p_ref, w1_ref, s1_ref, b1_ref, w2_ref, s2_ref, b2_ref,
               w3_ref, s3_ref, b3_ref, w4_ref, s4_ref, b4_ref,
               fw1_ref, fb1_ref, fw2_ref, fb2_ref, o_ref,
               a1, a2, a3, y1, y2, y3, y4):
        # Padded activation scratch: halo slots must be zero for every sample.
        a1[...] = jnp.zeros_like(a1)
        a2[...] = jnp.zeros_like(a2)
        a3[...] = jnp.zeros_like(a3)

        # Block 1: Conv(1->32) via wrapper im2col + BN + ReLU + MaxPool.
        z1 = jnp.dot(p_ref[0], w1_ref[...], preferred_element_type=jnp.float32)
        y1[...] = jnp.maximum(z1 * s1_ref[...] + b1_ref[...], 0.0)
        pool_into(y1, H0, W0, W0, a1, WP1)

        # Block 2: Conv(32->64) + BN + ReLU + MaxPool.
        y2[...] = conv_flat(a1, w2_ref, s2_ref, b2_ref, WP1, M2)
        pool_into(y2, H1, W1, WP1, a2, WP2)

        # Block 3: Conv(64->128) + BN + ReLU + MaxPool.
        y3[...] = conv_flat(a2, w3_ref, s3_ref, b3_ref, WP2, M3)
        pool_into(y3, H2, W2, WP2, a3, WP3)

        # Block 4: Conv(128->256) + BN + ReLU (no pool).
        y4[...] = conv_flat(a3, w4_ref, s4_ref, b4_ref, WP3, M4)

        # AdaptiveAvgPool2d((1, 1)) over the H3 x W3 valid positions.
        pooled = jnp.zeros((1, C4), jnp.float32)
        for yy in range(H3):
            for xx in range(W3):
                i = yy * WP3 + xx
                pooled = pooled + y4[i:i + 1, :]
        pooled = pooled * (1.0 / (H3 * W3))

        # Head: Linear(256,256) + ReLU + (Dropout == identity in eval)
        #       + Linear(256,E) + F.normalize(p=2, dim=1).
        h = jnp.dot(pooled.astype(jnp.bfloat16), fw1_ref[...],
                    preferred_element_type=jnp.float32) + fb1_ref[...]
        h = jnp.maximum(h, 0.0)
        e = jnp.dot(h.astype(jnp.bfloat16), fw2_ref[...],
                    preferred_element_type=jnp.float32) + fb2_ref[...]
        ss = jnp.sum(e * e, axis=1, keepdims=True)
        o_ref[0] = e * jax.lax.rsqrt(jnp.maximum(ss, EPS_NORM * EPS_NORM))

    scratch_defs = [
        ((L1, C1), jnp.float32),          # a1: padded flat layer-2 input
        ((L2, C2), jnp.float32),          # a2: padded flat layer-3 input
        ((L3, C3), jnp.float32),          # a3: padded flat layer-4 input
        ((H0 * W0, C1), jnp.float32),     # y1: conv-1 output (pre-pool)
        ((M2, C2), jnp.float32),          # y2
        ((M3, C3), jnp.float32),          # y3
        ((M4, C4), jnp.float32),          # y4
    ]
    scratch = [pltpu.VMEM(s, d) for s, d in scratch_defs]
    scratch_bytes = sum(_tile_bytes(s, d) for s, d in scratch_defs)
    return kernel, scratch, scratch_bytes


# ---------------------------------------------------------------------------
# Full forward pass (== SpectrogramEncoder.forward, inference mode)
# ---------------------------------------------------------------------------
@jax.jit
def spectrogram_encoder(x_nchw, params):
    N, C, H, W = x_nchw.shape
    assert C == 1, "SpectrogramEncoder expects single-channel spectrograms"
    assert H % 8 == 0 and W % 8 == 0, (H, W)
    # TODO(synk): odd spatial sizes (floor-mode MaxPool) need a tail path.

    E = params["fc2_w"].shape[1]
    kernel, scratch, scratch_bytes = _make_kernel(H, W)

    # Layer-1 im2col (Cin=1), built once wrapper-side on the tiny raw input so
    # the kernel sees a contiguous lane-friendly (H*W, 9) operand instead of
    # one-lane (W, 1) tiles / element-strided DMA.
    x = x_nchw[:, 0].astype(jnp.float32)
    xp = jnp.pad(x, ((0, 0), (1, 1), (1, 1)))
    patches = jnp.stack(
        [xp[:, dy:dy + H, dx:dx + W].reshape(N, H * W)
         for dy in range(3) for dx in range(3)],
        axis=-1).astype(jnp.bfloat16)                       # (N, H*W, 9)

    c = params["convs"]
    inputs = (patches,
              c[0]["w"], c[0]["scale"], c[0]["bias"],
              c[1]["w"], c[1]["scale"], c[1]["bias"],
              c[2]["w"], c[2]["scale"], c[2]["bias"],
              c[3]["w"], c[3]["scale"], c[3]["bias"],
              params["fc1_w"], params["fc1_b"],
              params["fc2_w"], params["fc2_b"])

    def _full(arr):
        nd = arr.ndim
        return pl.BlockSpec(arr.shape, lambda n, _nd=nd: (0,) * _nd)

    in_specs = [pl.BlockSpec((1, H * W, 9), lambda n: (n, 0, 0))]
    in_specs += [_full(a) for a in inputs[1:]]

    est = (2 * _tile_bytes((1, H * W, 9), jnp.bfloat16)
           + sum(2 * _tile_bytes(a.shape, a.dtype) for a in inputs[1:])
           + scratch_bytes
           + 2 * _tile_bytes((1, 1, E), jnp.float32))
    vmem_limit = int(min(max(4 * est, 8 << 20), 40 << 20))   # safe on v7x 64MiB

    out = pl.pallas_call(
        kernel,
        out_shape=jax.ShapeDtypeStruct((N, 1, E), jnp.float32),
        grid=(N,),
        in_specs=in_specs,
        out_specs=pl.BlockSpec((1, 1, E), lambda n: (n, 0, 0)),
        scratch_shapes=scratch,
        compiler_params=pltpu.CompilerParams(
            dimension_semantics=("parallel",),   # batch across v7x TensorCores
            vmem_limit_bytes=vmem_limit,
        ),
    )(*inputs)
    return out[:, 0, :]


# ---------------------------------------------------------------------------
# Deterministic parameter construction (synthetic, no checkpoint)
# ---------------------------------------------------------------------------
def init_params(key, embed_dim=128):
    channels = [(1, C1), (C1, C2), (C2, C3), (C3, C4)]
    keys = jax.random.split(key, 4 * 6 + 4)
    ki = 0
    convs = []
    for cin, cout in channels:
        w = 0.1 * jax.random.normal(keys[ki], (3, 3, cin, cout), jnp.float32); ki += 1
        b_conv = 0.05 * jax.random.normal(keys[ki], (cout,), jnp.float32); ki += 1
        gamma = 1.0 + 0.1 * jax.random.normal(keys[ki], (cout,), jnp.float32); ki += 1
        beta = 0.1 * jax.random.normal(keys[ki], (cout,), jnp.float32); ki += 1
        rmean = 0.1 * jax.random.normal(keys[ki], (cout,), jnp.float32); ki += 1
        rvar = 1.0 + 0.1 * jnp.abs(jax.random.normal(keys[ki], (cout,), jnp.float32)); ki += 1
        # Fold eval-mode BatchNorm (running stats) + conv bias into scale/bias.
        scale = gamma / jnp.sqrt(rvar + EPS_BN)
        bias = beta + scale * (b_conv - rmean)
        wk = w.reshape(9, cin, cout)                 # (dy, dx) major tap order
        if cin == 1:
            wk = wk.reshape(9, cout)                 # layer 1 uses im2col dot
        convs.append(dict(w=wk.astype(jnp.bfloat16),
                          scale=scale.reshape(1, cout),
                          bias=bias.reshape(1, cout)))
    fc1_w = 0.05 * jax.random.normal(keys[ki], (256, 256), jnp.float32); ki += 1
    fc1_b = 0.05 * jax.random.normal(keys[ki], (1, 256), jnp.float32); ki += 1
    fc2_w = 0.05 * jax.random.normal(keys[ki], (256, embed_dim), jnp.float32); ki += 1
    fc2_b = 0.05 * jax.random.normal(keys[ki], (1, embed_dim), jnp.float32); ki += 1
    return dict(convs=convs,
                fc1_w=fc1_w.astype(jnp.bfloat16), fc1_b=fc1_b,
                fc2_w=fc2_w.astype(jnp.bfloat16), fc2_b=fc2_b)


if __name__ == "__main__":
    key = jax.random.PRNGKey(0)
    pkey, xkey = jax.random.split(key)
    params = init_params(pkey, embed_dim=128)
    # Small mel-spectrogram batch, NCHW like the PyTorch module.
    x = jax.random.normal(xkey, (2, 1, 16, 16), jnp.float32)
    emb = jax.block_until_ready(spectrogram_encoder(x, params))
    assert emb.shape == (2, 128), emb.shape
    assert bool(jnp.all(jnp.isfinite(emb)))
    norms = jnp.linalg.norm(emb, axis=1)
    assert bool(jnp.allclose(norms, 1.0, atol=1e-3)), norms
    print("KERNEL_OK")
</pallas_src>

<mosaic_0001>
module attributes {stable_mosaic.version = 11 : i64} {
  func.func @kernel(%arg0: i32, %arg1: memref<1x256x9xbf16, #tpu.memory_space<vmem>>, %arg2: memref<9x32xbf16, #tpu.memory_space<vmem>>, %arg3: memref<1x32xf32, #tpu.memory_space<vmem>>, %arg4: memref<1x32xf32, #tpu.memory_space<vmem>>, %arg5: memref<9x32x64xbf16, #tpu.memory_space<vmem>>, %arg6: memref<1x64xf32, #tpu.memory_space<vmem>>, %arg7: memref<1x64xf32, #tpu.memory_space<vmem>>, %arg8: memref<9x64x128xbf16, #tpu.memory_space<vmem>>, %arg9: memref<1x128xf32, #tpu.memory_space<vmem>>, %arg10: memref<1x128xf32, #tpu.memory_space<vmem>>, %arg11: memref<9x128x256xbf16, #tpu.memory_space<vmem>>, %arg12: memref<1x256xf32, #tpu.memory_space<vmem>>, %arg13: memref<1x256xf32, #tpu.memory_space<vmem>>, %arg14: memref<256x256xbf16, #tpu.memory_space<vmem>>, %arg15: memref<1x256xf32, #tpu.memory_space<vmem>>, %arg16: memref<256x128xbf16, #tpu.memory_space<vmem>>, %arg17: memref<1x128xf32, #tpu.memory_space<vmem>>, %arg18: memref<1x1x128xf32, #tpu.memory_space<vmem>>, %arg19: memref<176x32xf32, #tpu.memory_space<vmem>>, %arg20: memref<56x64xf32, #tpu.memory_space<vmem>>, %arg21: memref<40x128xf32, #tpu.memory_space<vmem>>, %arg22: memref<256x32xf32, #tpu.memory_space<vmem>>, %arg23: memref<120x64xf32, #tpu.memory_space<vmem>>, %arg24: memref<28x128xf32, #tpu.memory_space<vmem>>, %arg25: memref<10x256xf32, #tpu.memory_space<vmem>>) attributes {dimension_semantics = [#tpu.dimension_semantics<parallel>], iteration_bounds = array<i64: 2>, scalar_prefetch = 0 : i64, scratch_operands = 7 : i64, tpu.core_type = #tpu.core_type<tc>, window_params = [{transform_indices = @transform_0, window_bounds = array<i64: 1, 256, 9>}, {pipeline_mode = #tpu.pipeline_mode<synchronous>, transform_indices = @transform_1, window_bounds = array<i64: 9, 32>}, {pipeline_mode = #tpu.pipeline_mode<synchronous>, transform_indices = @transform_2, window_bounds = array<i64: 1, 32>}, {pipeline_mode = #tpu.pipeline_mode<synchronous>, transform_indices = @transform_3, window_bounds = array<i64: 1, 32>}, {pipeline_mode = #tpu.pipeline_mode<synchronous>, transform_indices = @transform_4, window_bounds = array<i64: 9, 32, 64>}, {pipeline_mode = #tpu.pipeline_mode<synchronous>, transform_indices = @transform_5, window_bounds = array<i64: 1, 64>}, {pipeline_mode = #tpu.pipeline_mode<synchronous>, transform_indices = @transform_6, window_bounds = array<i64: 1, 64>}, {pipeline_mode = #tpu.pipeline_mode<synchronous>, transform_indices = @transform_7, window_bounds = array<i64: 9, 64, 128>}, {pipeline_mode = #tpu.pipeline_mode<synchronous>, transform_indices = @transform_8, window_bounds = array<i64: 1, 128>}, {pipeline_mode = #tpu.pipeline_mode<synchronous>, transform_indices = @transform_9, window_bounds = array<i64: 1, 128>}, {pipeline_mode = #tpu.pipeline_mode<synchronous>, transform_indices = @transform_10, window_bounds = array<i64: 9, 128, 256>}, {pipeline_mode = #tpu.pipeline_mode<synchronous>, transform_indices = @transform_11, window_bounds = array<i64: 1, 256>}, {pipeline_mode = #tpu.pipeline_mode<synchronous>, transform_indices = @transform_12, window_bounds = array<i64: 1, 256>}, {pipeline_mode = #tpu.pipeline_mode<synchronous>, transform_indices = @transform_13, window_bounds = array<i64: 256, 256>}, {pipeline_mode = #tpu.pipeline_mode<synchronous>, transform_indices = @transform_14, window_bounds = array<i64: 1, 256>}, {pipeline_mode = #tpu.pipeline_mode<synchronous>, transform_indices = @transform_15, window_bounds = array<i64: 256, 128>}, {pipeline_mode = #tpu.pipeline_mode<synchronous>, transform_indices = @transform_16, window_bounds = array<i64: 1, 128>}, {transform_indices = @transform_17, window_bounds = array<i64: 1, 1, 128>}]} {
    %cst = arith.constant 0.000000e+00 : f32
    %0 = vector.broadcast %cst : f32 to vector<176x32xf32>
    %c0 = arith.constant 0 : index
    %c0_0 = arith.constant 0 : index
    %1 = vector.load %arg19[%c0, %c0_0] : memref<176x32xf32, #tpu.memory_space<vmem>>, vector<176x32xf32>
    tpu.vector_store %arg19[%c0, %c0_0], %0 {strides = array<i32>} : memref<176x32xf32, #tpu.memory_space<vmem>>, vector<176x32xf32>,
    %cst_1 = arith.constant 0.000000e+00 : f32
    %2 = vector.broadcast %cst_1 : f32 to vector<56x64xf32>
    %c0_2 = arith.constant 0 : index
    %c0_3 = arith.constant 0 : index
    %3 = vector.load %arg20[%c0_2, %c0_3] : memref<56x64xf32, #tpu.memory_space<vmem>>, vector<56x64xf32>
    tpu.vector_store %arg20[%c0_2, %c0_3], %2 {strides = array<i32>} : memref<56x64xf32, #tpu.memory_space<vmem>>, vector<56x64xf32>,
    %cst_4 = arith.constant 0.000000e+00 : f32
    %4 = vector.broadcast %cst_4 : f32 to vector<40x128xf32>
    %c0_5 = arith.constant 0 : index
    %c0_6 = arith.constant 0 : index
    %5 = vector.load %arg21[%c0_5, %c0_6] : memref<40x128xf32, #tpu.memory_space<vmem>>, vector<40x128xf32>
    tpu.vector_store %arg21[%c0_5, %c0_6], %4 {strides = array<i32>} : memref<40x128xf32, #tpu.memory_space<vmem>>, vector<40x128xf32>,
    %c0_7 = arith.constant 0 : index
    %c0_8 = arith.constant 0 : index
    %c0_9 = arith.constant 0 : index
    %6 = vector.load %arg1[%c0_7, %c0_8, %c0_9] : memref<1x256x9xbf16, #tpu.memory_space<vmem>>, vector<1x256x9xbf16>
    %7 = vector.shape_cast %6 : vector<1x256x9xbf16> to vector<256x9xbf16>
    %c0_10 = arith.constant 0 : index
    %c0_11 = arith.constant 0 : index
    %8 = vector.load %arg2[%c0_10, %c0_11] : memref<9x32xbf16, #tpu.memory_space<vmem>>, vector<9x32xbf16>
    %cst_12 = arith.constant dense<0.000000e+00> : vector<256x32xf32>
    %9 = tpu.matmul %7, %8, %cst_12 {dimension_numbers = #tpu.dot_dimension_numbers<[1], [0], [0], [1], [0, 0, 1, 1], [], []>} : vector<256x9xbf16>, vector<9x32xbf16>, vector<256x32xf32> -> vector<256x32xf32>
    %c0_13 = arith.constant 0 : index
    %c0_14 = arith.constant 0 : index
    %10 = vector.load %arg3[%c0_13, %c0_14] : memref<1x32xf32, #tpu.memory_space<vmem>>, vector<1x32xf32>
    %11 = vector.broadcast %10 : vector<1x32xf32> to vector<256x32xf32>
    %12 = arith.mulf %9, %11 : vector<256x32xf32>
    %c0_15 = arith.constant 0 : index
    %c0_16 = arith.constant 0 : index
    %13 = vector.load %arg4[%c0_15, %c0_16] : memref<1x32xf32, #tpu.memory_space<vmem>>, vector<1x32xf32>
    %14 = vector.broadcast %13 : vector<1x32xf32> to vector<256x32xf32>
    %15 = arith.addf %12, %14 : vector<256x32xf32>
    %cst_17 = arith.constant 0.000000e+00 : f32
    %16 = vector.broadcast %cst_17 : f32 to vector<256x32xf32>
    %17 = arith.maximumf %15, %16 : vector<256x32xf32>
    %c0_18 = arith.constant 0 : index
    %c0_19 = arith.constant 0 : index
    %18 = vector.load %arg22[%c0_18, %c0_19] : memref<256x32xf32, #tpu.memory_space<vmem>>, vector<256x32xf32>
    tpu.vector_store %arg22[%c0_18, %c0_19], %17 {strides = array<i32>} : memref<256x32xf32, #tpu.memory_space<vmem>>, vector<256x32xf32>,
    %c0_20 = arith.constant 0 : index
    %c0_21 = arith.constant 0 : index
    %19 = tpu.strided_load %arg22[%c0_20, %c0_21] {strides = array<i32: 2, 1>} : memref<256x32xf32, #tpu.memory_space<vmem>>, vector<8x32xf32>
    %c1 = arith.constant 1 : index
    %c0_22 = arith.constant 0 : index
    %20 = tpu.strided_load %arg22[%c1, %c0_22] {strides = array<i32: 2, 1>} : memref<256x32xf32, #tpu.memory_space<vmem>>, vector<8x32xf32>
    %21 = arith.maximumf %19, %20 : vector<8x32xf32>
    %c16 = arith.constant 16 : index
    %c0_23 = arith.constant 0 : index
    %22 = tpu.strided_load %arg22[%c16, %c0_23] {strides = array<i32: 2, 1>} : memref<256x32xf32, #tpu.memory_space<vmem>>, vector<8x32xf32>
    %c17 = arith.constant 17 : index
    %c0_24 = arith.constant 0 : index
    %23 = tpu.strided_load %arg22[%c17, %c0_24] {strides = array<i32: 2, 1>} : memref<256x32xf32, #tpu.memory_space<vmem>>, vector<8x32xf32>
    %24 = arith.maximumf %22, %23 : vector<8x32xf32>
    %25 = arith.maximumf %21, %24 : vector<8x32xf32>
    %c32 = arith.constant 32 : index
    %c0_25 = arith.constant 0 : index
    %26 = vector.load %arg19[%c32, %c0_25] : memref<176x32xf32, #tpu.memory_space<vmem>>, vector<8x32xf32>
    tpu.vector_store %arg19[%c32, %c0_25], %25 {strides = array<i32>} : memref<176x32xf32, #tpu.memory_space<vmem>>, vector<8x32xf32>,
    %c32_26 = arith.constant 32 : index
    %c0_27 = arith.constant 0 : index
    %27 = tpu.strided_load %arg22[%c32_26, %c0_27] {strides = array<i32: 2, 1>} : memref<256x32xf32, #tpu.memory_space<vmem>>, vector<8x32xf32>
    %c33 = arith.constant 33 : index
    %c0_28 = arith.constant 0 : index
    %28 = tpu.strided_load %arg22[%c33, %c0_28] {strides = array<i32: 2, 1>} : memref<256x32xf32, #tpu.memory_space<vmem>>, vector<8x32xf32>
    %29 = arith.maximumf %27, %28 : vector<8x32xf32>
    %c48 = arith.constant 48 : index
    %c0_29 = arith.constant 0 : index
    %30 = tpu.strided_load %arg22[%c48, %c0_29] {strides = array<i32: 2, 1>} : memref<256x32xf32, #tpu.memory_space<vmem>>, vector<8x32xf32>
    %c49 = arith.constant 49 : index
    %c0_30 = arith.constant 0 : index
    %31 = tpu.strided_load %arg22[%c49, %c0_30] {strides = array<i32: 2, 1>} : memref<256x32xf32, #tpu.memory_space<vmem>>, vector<8x32xf32>
    %32 = arith.maximumf %30, %31 : vector<8x32xf32>
    %33 = arith.maximumf %29, %32 : vector<8x32xf32>
    %c48_31 = arith.constant 48 : index
    %c0_32 = arith.constant 0 : index
    %34 = vector.load %arg19[%c48_31, %c0_32] : memref<176x32xf32, #tpu.memory_space<vmem>>, vector<8x32xf32>
    tpu.vector_store %arg19[%c48_31, %c0_32], %33 {strides = array<i32>} : memref<176x32xf32, #tpu.memory_space<vmem>>, vector<8x32xf32>,
    %c64 = arith.constant 64 : index
    %c0_33 = arith.constant 0 : index
    %35 = tpu.strided_load %arg22[%c64, %c0_33] {strides = array<i32: 2, 1>} : memref<256x32xf32, #tpu.memory_space<vmem>>, vector<8x32xf32>
    %c65 = arith.constant 65 : index
    %c0_34 = arith.constant 0 : index
    %36 = tpu.strided_load %arg22[%c65, %c0_34] {strides = array<i32: 2, 1>} : memref<256x32xf32, #tpu.memory_space<vmem>>, vector<8x32xf32>
    %37 = arith.maximumf %35, %36 : vector<8x32xf32>
    %c80 = arith.constant 80 : index
    %c0_35 = arith.constant 0 : index
    %38 = tpu.strided_load %arg22[%c80, %c0_35] {strides = array<i32: 2, 1>} : memref<256x32xf32, #tpu.memory_space<vmem>>, vector<8x32xf32>
    %c81 = arith.constant 81 : index
    %c0_36 = arith.constant 0 : index
    %39 = tpu.strided_load %arg22[%c81, %c0_36] {strides = array<i32: 2, 1>} : memref<256x32xf32, #tpu.memory_space<vmem>>, vector<8x32xf32>
    %40 = arith.maximumf %38, %39 : vector<8x32xf32>
    %41 = arith.maximumf %37, %40 : vector<8x32xf32>
    %c64_37 = arith.constant 64 : index
    %c0_38 = arith.constant 0 : index
    %42 = vector.load %arg19[%c64_37, %c0_38] : memref<176x32xf32, #tpu.memory_space<vmem>>, vector<8x32xf32>
    tpu.vector_store %arg19[%c64_37, %c0_38], %41 {strides = array<i32>} : memref<176x32xf32, #tpu.memory_space<vmem>>, vector<8x32xf32>,
    %c96 = arith.constant 96 : index
    %c0_39 = arith.constant 0 : index
    %43 = tpu.strided_load %arg22[%c96, %c0_39] {strides = array<i32: 2, 1>} : memref<256x32xf32, #tpu.memory_space<vmem>>, vector<8x32xf32>
    %c97 = arith.constant 97 : index
    %c0_40 = arith.constant 0 : index
    %44 = tpu.strided_load %arg22[%c97, %c0_40] {strides = array<i32: 2, 1>} : memref<256x32xf32, #tpu.memory_space<vmem>>, vector<8x32xf32>
    %45 = arith.maximumf %43, %44 : vector<8x32xf32>
    %c112 = arith.constant 112 : index
    %c0_41 = arith.constant 0 : index
    %46 = tpu.strided_load %arg22[%c112, %c0_41] {strides = array<i32: 2, 1>} : memref<256x32xf32, #tpu.memory_space<vmem>>, vector<8x32xf32>
    %c113 = arith.constant 113 : index
    %c0_42 = arith.constant 0 : index
    %47 = tpu.strided_load %arg22[%c113, %c0_42] {strides = array<i32: 2, 1>} : memref<256x32xf32, #tpu.memory_space<vmem>>, vector<8x32xf32>
    %48 = arith.maximumf %46, %47 : vector<8x32xf32>
    %49 = arith.maximumf %45, %48 : vector<8x32xf32>
    %c80_43 = arith.constant 80 : index
    %c0_44 = arith.constant 0 : index
    %50 = vector.load %arg19[%c80_43, %c0_44] : memref<176x32xf32, #tpu.memory_space<vmem>>, vector<8x32xf32>
    tpu.vector_store %arg19[%c80_43, %c0_44], %49 {strides = array<i32>} : memref<176x32xf32, #tpu.memory_space<vmem>>, vector<8x32xf32>,
    %c128 = arith.constant 128 : index
    %c0_45 = arith.constant 0 : index
    %51 = tpu.strided_load %arg22[%c128, %c0_45] {strides = array<i32: 2, 1>} : memref<256x32xf32, #tpu.memory_space<vmem>>, vector<8x32xf32>
    %c129 = arith.constant 129 : index
    %c0_46 = arith.constant 0 : index
    %52 = tpu.strided_load %arg22[%c129, %c0_46] {strides = array<i32: 2, 1>} : memref<256x32xf32, #tpu.memory_space<vmem>>, vector<8x32xf32>
    %53 = arith.maximumf %51, %52 : vector<8x32xf32>
    %c144 = arith.constant 144 : index
    %c0_47 = arith.constant 0 : index
    %54 = tpu.strided_load %arg22[%c144, %c0_47] {strides = array<i32: 2, 1>} : memref<256x32xf32, #tpu.memory_space<vmem>>, vector<8x32xf32>
    %c145 = arith.constant 145 : index
    %c0_48 = arith.constant 0 : index
    %55 = tpu.strided_load %arg22[%c145, %c0_48] {strides = array<i32: 2, 1>} : memref<256x32xf32, #tpu.memory_space<vmem>>, vector<8x32xf32>
    %56 = arith.maximumf %54, %55 : vector<8x32xf32>
    %57 = arith.maximumf %53, %56 : vector<8x32xf32>
    %c96_49 = arith.constant 96 : index
    %c0_50 = arith.constant 0 : index
    %58 = vector.load %arg19[%c96_49, %c0_50] : memref<176x32xf32, #tpu.memory_space<vmem>>, vector<8x32xf32>
    tpu.vector_store %arg19[%c96_49, %c0_50], %57 {strides = array<i32>} : memref<176x32xf32, #tpu.memory_space<vmem>>, vector<8x32xf32>,
    %c160 = arith.constant 160 : index
    %c0_51 = arith.constant 0 : index
    %59 = tpu.strided_load %arg22[%c160, %c0_51] {strides = array<i32: 2, 1>} : memref<256x32xf32, #tpu.memory_space<vmem>>, vector<8x32xf32>
    %c161 = arith.constant 161 : index
    %c0_52 = arith.constant 0 : index
    %60 = tpu.strided_load %arg22[%c161, %c0_52] {strides = array<i32: 2, 1>} : memref<256x32xf32, #tpu.memory_space<vmem>>, vector<8x32xf32>
    %61 = arith.maximumf %59, %60 : vector<8x32xf32>
    %c176 = arith.constant 176 : index
    %c0_53 = arith.constant 0 : index
    %62 = tpu.strided_load %arg22[%c176, %c0_53] {strides = array<i32: 2, 1>} : memref<256x32xf32, #tpu.memory_space<vmem>>, vector<8x32xf32>
    %c177 = arith.constant 177 : index
    %c0_54 = arith.constant 0 : index
    %63 = tpu.strided_load %arg22[%c177, %c0_54] {strides = array<i32: 2, 1>} : memref<256x32xf32, #tpu.memory_space<vmem>>, vector<8x32xf32>
    %64 = arith.maximumf %62, %63 : vector<8x32xf32>
    %65 = arith.maximumf %61, %64 : vector<8x32xf32>
    %c112_55 = arith.constant 112 : index
    %c0_56 = arith.constant 0 : index
    %66 = vector.load %arg19[%c112_55, %c0_56] : memref<176x32xf32, #tpu.memory_space<vmem>>, vector<8x32xf32>
    tpu.vector_store %arg19[%c112_55, %c0_56], %65 {strides = array<i32>} : memref<176x32xf32, #tpu.memory_space<vmem>>, vector<8x32xf32>,
    %c192 = arith.constant 192 : index
    %c0_57 = arith.constant 0 : index
    %67 = tpu.strided_load %arg22[%c192, %c0_57] {strides = array<i32: 2, 1>} : memref<256x32xf32, #tpu.memory_space<vmem>>, vector<8x32xf32>
    %c193 = arith.constant 193 : index
    %c0_58 = arith.constant 0 : index
    %68 = tpu.strided_load %arg22[%c193, %c0_58] {strides = array<i32: 2, 1>} : memref<256x32xf32, #tpu.memory_space<vmem>>, vector<8x32xf32>
    %69 = arith.maximumf %67, %68 : vector<8x32xf32>
    %c208 = arith.constant 208 : index
    %c0_59 = arith.constant 0 : index
    %70 = tpu.strided_load %arg22[%c208, %c0_59] {strides = array<i32: 2, 1>} : memref<256x32xf32, #tpu.memory_space<vmem>>, vector<8x32xf32>
    %c209 = arith.constant 209 : index
    %c0_60 = arith.constant 0 : index
    %71 = tpu.strided_load %arg22[%c209, %c0_60] {strides = array<i32: 2, 1>} : memref<256x32xf32, #tpu.memory_space<vmem>>, vector<8x32xf32>
    %72 = arith.maximumf %70, %71 : vector<8x32xf32>
    %73 = arith.maximumf %69, %72 : vector<8x32xf32>
    %c128_61 = arith.constant 128 : index
    %c0_62 = arith.constant 0 : index
    %74 = vector.load %arg19[%c128_61, %c0_62] : memref<176x32xf32, #tpu.memory_space<vmem>>, vector<8x32xf32>
    tpu.vector_store %arg19[%c128_61, %c0_62], %73 {strides = array<i32>} : memref<176x32xf32, #tpu.memory_space<vmem>>, vector<8x32xf32>,
    %c224 = arith.constant 224 : index
    %c0_63 = arith.constant 0 : index
    %75 = tpu.strided_load %arg22[%c224, %c0_63] {strides = array<i32: 2, 1>} : memref<256x32xf32, #tpu.memory_space<vmem>>, vector<8x32xf32>
    %c225 = arith.constant 225 : index
    %c0_64 = arith.constant 0 : index
    %76 = tpu.strided_load %arg22[%c225, %c0_64] {strides = array<i32: 2, 1>} : memref<256x32xf32, #tpu.memory_space<vmem>>, vector<8x32xf32>
    %77 = arith.maximumf %75, %76 : vector<8x32xf32>
    %c240 = arith.constant 240 : index
    %c0_65 = arith.constant 0 : index
    %78 = tpu.strided_load %arg22[%c240, %c0_65] {strides = array<i32: 2, 1>} : memref<256x32xf32, #tpu.memory_space<vmem>>, vector<8x32xf32>
    %c241 = arith.constant 241 : index
    %c0_66 = arith.constant 0 : index
    %79 = tpu.strided_load %arg22[%c241, %c0_66] {strides = array<i32: 2, 1>} : memref<256x32xf32, #tpu.memory_space<vmem>>, vector<8x32xf32>
    %80 = arith.maximumf %78, %79 : vector<8x32xf32>
    %81 = arith.maximumf %77, %80 : vector<8x32xf32>
    %c144_67 = arith.constant 144 : index
    %c0_68 = arith.constant 0 : index
    %82 = vector.load %arg19[%c144_67, %c0_68] : memref<176x32xf32, #tpu.memory_space<vmem>>, vector<8x32xf32>
    tpu.vector_store %arg19[%c144_67, %c0_68], %81 {strides = array<i32>} : memref<176x32xf32, #tpu.memory_space<vmem>>, vector<8x32xf32>,
    %cst_69 = arith.constant 0.000000e+00 : f32
    %83 = vector.broadcast %cst_69 : f32 to vector<120x64xf32>
    %c15 = arith.constant 15 : index
    %c0_70 = arith.constant 0 : index
    %84 = vector.load %arg19[%c15, %c0_70] : memref<176x32xf32, #tpu.memory_space<vmem>>, vector<120x32xf32>
    %85 = arith.truncf %84 : vector<120x32xf32> to vector<120x32xbf16>
    %c0_71 = arith.constant 0 : index
    %c0_72 = arith.constant 0 : index
    %c0_73 = arith.constant 0 : index
    %86 = vector.load %arg5[%c0_71, %c0_72, %c0_73] : memref<9x32x64xbf16, #tpu.memory_space<vmem>>, vector<1x32x64xbf16>
    %87 = vector.shape_cast %86 : vector<1x32x64xbf16> to vector<32x64xbf16>
    %cst_74 = arith.constant dense<0.000000e+00> : vector<120x64xf32>
    %88 = tpu.matmul %85, %87, %cst_74 {dimension_numbers = #tpu.dot_dimension_numbers<[1], [0], [0], [1], [0, 0, 1, 1], [], []>} : vector<120x32xbf16>, vector<32x64xbf16>, vector<120x64xf32> -> vector<120x64xf32>
    %89 = arith.addf %83, %88 : vector<120x64xf32>
    %c16_75 = arith.constant 16 : index
    %c0_76 = arith.constant 0 : index
    %90 = vector.load %arg19[%c16_75, %c0_76] : memref<176x32xf32, #tpu.memory_space<vmem>>, vector<120x32xf32>
    %91 = arith.truncf %90 : vector<120x32xf32> to vector<120x32xbf16>
    %c1_77 = arith.constant 1 : index
    %c0_78 = arith.constant 0 : index
    %c0_79 = arith.constant 0 : index
    %92 = vector.load %arg5[%c1_77, %c0_78, %c0_79] : memref<9x32x64xbf16, #tpu.memory_space<vmem>>, vector<1x32x64xbf16>
    %93 = vector.shape_cast %92 : vector<1x32x64xbf16> to vector<32x64xbf16>
    %cst_80 = arith.constant dense<0.000000e+00> : vector<120x64xf32>
    %94 = tpu.matmul %91, %93, %cst_80 {dimension_numbers = #tpu.dot_dimension_numbers<[1], [0], [0], [1], [0, 0, 1, 1], [], []>} : vector<120x32xbf16>, vector<32x64xbf16>, vector<120x64xf32> -> vector<120x64xf32>
    %95 = arith.addf %89, %94 : vector<120x64xf32>
    %c17_81 = arith.constant 17 : index
    %c0_82 = arith.constant 0 : index
    %96 = vector.load %arg19[%c17_81, %c0_82] : memref<176x32xf32, #tpu.memory_space<vmem>>, vector<120x32xf32>
    %97 = arith.truncf %96 : vector<120x32xf32> to vector<120x32xbf16>
    %c2 = arith.constant 2 : index
    %c0_83 = arith.constant 0 : index
    %c0_84 = arith.constant 0 : index
    %98 = vector.load %arg5[%c2, %c0_83, %c0_84] : memref<9x32x64xbf16, #tpu.memory_space<vmem>>, vector<1x32x64xbf16>
    %99 = vector.shape_cast %98 : vector<1x32x64xbf16> to vector<32x64xbf16>
    %cst_85 = arith.constant dense<0.000000e+00> : vector<120x64xf32>
    %100 = tpu.matmul %97, %99, %cst_85 {dimension_numbers = #tpu.dot_dimension_numbers<[1], [0], [0], [1], [0, 0, 1, 1], [], []>} : vector<120x32xbf16>, vector<32x64xbf16>, vector<120x64xf32> -> vector<120x64xf32>
    %101 = arith.addf %95, %100 : vector<120x64xf32>
    %c31 = arith.constant 31 : index
    %c0_86 = arith.constant 0 : index
    %102 = vector.load %arg19[%c31, %c0_86] : memref<176x32xf32, #tpu.memory_space<vmem>>, vector<120x32xf32>
    %103 = arith.truncf %102 : vector<120x32xf32> to vector<120x32xbf16>
    %c3 = arith.constant 3 : index
    %c0_87 = arith.constant 0 : index
    %c0_88 = arith.constant 0 : index
    %104 = vector.load %arg5[%c3, %c0_87, %c0_88] : memref<9x32x64xbf16, #tpu.memory_space<vmem>>, vector<1x32x64xbf16>
    %105 = vector.shape_cast %104 : vector<1x32x64xbf16> to vector<32x64xbf16>
    %cst_89 = arith.constant dense<0.000000e+00> : vector<120x64xf32>
    %106 = tpu.matmul %103, %105, %cst_89 {dimension_numbers = #tpu.dot_dimension_numbers<[1], [0], [0], [1], [0, 0, 1, 1], [], []>} : vector<120x32xbf16>, vector<32x64xbf16>, vector<120x64xf32> -> vector<120x64xf32>
    %107 = arith.addf %101, %106 : vector<120x64xf32>
    %c32_90 = arith.constant 32 : index
    %c0_91 = arith.constant 0 : index
    %108 = vector.load %arg19[%c32_90, %c0_91] : memref<176x32xf32, #tpu.memory_space<vmem>>, vector<120x32xf32>
    %109 = arith.truncf %108 : vector<120x32xf32> to vector<120x32xbf16>
    %c4 = arith.constant 4 : index
    %c0_92 = arith.constant 0 : index
    %c0_93 = arith.constant 0 : index
    %110 = vector.load %arg5[%c4, %c0_92, %c0_93] : memref<9x32x64xbf16, #tpu.memory_space<vmem>>, vector<1x32x64xbf16>
    %111 = vector.shape_cast %110 : vector<1x32x64xbf16> to vector<32x64xbf16>
    %cst_94 = arith.constant dense<0.000000e+00> : vector<120x64xf32>
    %112 = tpu.matmul %109, %111, %cst_94 {dimension_numbers = #tpu.dot_dimension_numbers<[1], [0], [0], [1], [0, 0, 1, 1], [], []>} : vector<120x32xbf16>, vector<32x64xbf16>, vector<120x64xf32> -> vector<120x64xf32>
    %113 = arith.addf %107, %112 : vector<120x64xf32>
    %c33_95 = arith.constant 33 : index
    %c0_96 = arith.constant 0 : index
    %114 = vector.load %arg19[%c33_95, %c0_96] : memref<176x32xf32, #tpu.memory_space<vmem>>, vector<120x32xf32>
    %115 = arith.truncf %114 : vector<120x32xf32> to vector<120x32xbf16>
    %c5 = arith.constant 5 : index
    %c0_97 = arith.constant 0 : index
    %c0_98 = arith.constant 0 : index
    %116 = vector.load %arg5[%c5, %c0_97, %c0_98] : memref<9x32x64xbf16, #tpu.memory_space<vmem>>, vector<1x32x64xbf16>
    %117 = vector.shape_cast %116 : vector<1x32x64xbf16> to vector<32x64xbf16>
    %cst_99 = arith.constant dense<0.000000e+00> : vector<120x64xf32>
    %118 = tpu.matmul %115, %117, %cst_99 {dimension_numbers = #tpu.dot_dimension_numbers<[1], [0], [0], [1], [0, 0, 1, 1], [], []>} : vector<120x32xbf16>, vector<32x64xbf16>, vector<120x64xf32> -> vector<120x64xf32>
    %119 = arith.addf %113, %118 : vector<120x64xf32>
    %c47 = arith.constant 47 : index
    %c0_100 = arith.constant 0 : index
    %120 = vector.load %arg19[%c47, %c0_100] : memref<176x32xf32, #tpu.memory_space<vmem>>, vector<120x32xf32>
    %121 = arith.truncf %120 : vector<120x32xf32> to vector<120x32xbf16>
    %c6 = arith.constant 6 : index
    %c0_101 = arith.constant 0 : index
    %c0_102 = arith.constant 0 : index
    %122 = vector.load %arg5[%c6, %c0_101, %c0_102] : memref<9x32x64xbf16, #tpu.memory_space<vmem>>, vector<1x32x64xbf16>
    %123 = vector.shape_cast %122 : vector<1x32x64xbf16> to vector<32x64xbf16>
    %cst_103 = arith.constant dense<0.000000e+00> : vector<120x64xf32>
    %124 = tpu.matmul %121, %123, %cst_103 {dimension_numbers = #tpu.dot_dimension_numbers<[1], [0], [0], [1], [0, 0, 1, 1], [], []>} : vector<120x32xbf16>, vector<32x64xbf16>, vector<120x64xf32> -> vector<120x64xf32>
    %125 = arith.addf %119, %124 : vector<120x64xf32>
    %c48_104 = arith.constant 48 : index
    %c0_105 = arith.constant 0 : index
    %126 = vector.load %arg19[%c48_104, %c0_105] : memref<176x32xf32, #tpu.memory_space<vmem>>, vector<120x32xf32>
    %127 = arith.truncf %126 : vector<120x32xf32> to vector<120x32xbf16>
    %c7 = arith.constant 7 : index
    %c0_106 = arith.constant 0 : index
    %c0_107 = arith.constant 0 : index
    %128 = vector.load %arg5[%c7, %c0_106, %c0_107] : memref<9x32x64xbf16, #tpu.memory_space<vmem>>, vector<1x32x64xbf16>
    %129 = vector.shape_cast %128 : vector<1x32x64xbf16> to vector<32x64xbf16>
    %cst_108 = arith.constant dense<0.000000e+00> : vector<120x64xf32>
    %130 = tpu.matmul %127, %129, %cst_108 {dimension_numbers = #tpu.dot_dimension_numbers<[1], [0], [0], [1], [0, 0, 1, 1], [], []>} : vector<120x32xbf16>, vector<32x64xbf16>, vector<120x64xf32> -> vector<120x64xf32>
    %131 = arith.addf %125, %130 : vector<120x64xf32>
    %c49_109 = arith.constant 49 : index
    %c0_110 = arith.constant 0 : index
    %132 = vector.load %arg19[%c49_109, %c0_110] : memref<176x32xf32, #tpu.memory_space<vmem>>, vector<120x32xf32>
    %133 = arith.truncf %132 : vector<120x32xf32> to vector<120x32xbf16>
    %c8 = arith.constant 8 : index
    %c0_111 = arith.constant 0 : index
    %c0_112 = arith.constant 0 : index
    %134 = vector.load %arg5[%c8, %c0_111, %c0_112] : memref<9x32x64xbf16, #tpu.memory_space<vmem>>, vector<1x32x64xbf16>
    %135 = vector.shape_cast %134 : vector<1x32x64xbf16> to vector<32x64xbf16>
    %cst_113 = arith.constant dense<0.000000e+00> : vector<120x64xf32>
    %136 = tpu.matmul %133, %135, %cst_113 {dimension_numbers = #tpu.dot_dimension_numbers<[1], [0], [0], [1], [0, 0, 1, 1], [], []>} : vector<120x32xbf16>, vector<32x64xbf16>, vector<120x64xf32> -> vector<120x64xf32>
    %137 = arith.addf %131, %136 : vector<120x64xf32>
    %c0_114 = arith.constant 0 : index
    %c0_115 = arith.constant 0 : index
    %138 = vector.load %arg6[%c0_114, %c0_115] : memref<1x64xf32, #tpu.memory_space<vmem>>, vector<1x64xf32>
    %139 = vector.broadcast %138 : vector<1x64xf32> to vector<120x64xf32>
    %140 = arith.mulf %137, %139 : vector<120x64xf32>
    %c0_116 = arith.constant 0 : index
    %c0_117 = arith.constant 0 : index
    %141 = vector.load %arg7[%c0_116, %c0_117] : memref<1x64xf32, #tpu.memory_space<vmem>>, vector<1x64xf32>
    %142 = vector.broadcast %141 : vector<1x64xf32> to vector<120x64xf32>
    %143 = arith.addf %140, %142 : vector<120x64xf32>
    %cst_118 = arith.constant 0.000000e+00 : f32
    %144 = vector.broadcast %cst_118 : f32 to vector<120x64xf32>
    %145 = arith.maximumf %143, %144 : vector<120x64xf32>
    %c0_119 = arith.constant 0 : index
    %c0_120 = arith.constant 0 : index
    %146 = vector.load %arg23[%c0_119, %c0_120] : memref<120x64xf32, #tpu.memory_space<vmem>>, vector<120x64xf32>
    tpu.vector_store %arg23[%c0_119, %c0_120], %145 {strides = array<i32>} : memref<120x64xf32, #tpu.memory_space<vmem>>, vector<120x64xf32>,
    %c0_121 = arith.constant 0 : index
    %c0_122 = arith.constant 0 : index
    %147 = tpu.strided_load %arg23[%c0_121, %c0_122] {strides = array<i32: 2, 1>} : memref<120x64xf32, #tpu.memory_space<vmem>>, vector<4x64xf32>
    %c1_123 = arith.constant 1 : index
    %c0_124 = arith.constant 0 : index
    %148 = tpu.strided_load %arg23[%c1_123, %c0_124] {strides = array<i32: 2, 1>} : memref<120x64xf32, #tpu.memory_space<vmem>>, vector<4x64xf32>
    %149 = arith.maximumf %147, %148 : vector<4x64xf32>
    %c16_125 = arith.constant 16 : index
    %c0_126 = arith.constant 0 : index
    %150 = tpu.strided_load %arg23[%c16_125, %c0_126] {strides = array<i32: 2, 1>} : memref<120x64xf32, #tpu.memory_space<vmem>>, vector<4x64xf32>
    %c17_127 = arith.constant 17 : index
    %c0_128 = arith.constant 0 : index
    %151 = tpu.strided_load %arg23[%c17_127, %c0_128] {strides = array<i32: 2, 1>} : memref<120x64xf32, #tpu.memory_space<vmem>>, vector<4x64xf32>
    %152 = arith.maximumf %150, %151 : vector<4x64xf32>
    %153 = arith.maximumf %149, %152 : vector<4x64xf32>
    %c16_129 = arith.constant 16 : index
    %c0_130 = arith.constant 0 : index
    %154 = vector.load %arg20[%c16_129, %c0_130] : memref<56x64xf32, #tpu.memory_space<vmem>>, vector<4x64xf32>
    tpu.vector_store %arg20[%c16_129, %c0_130], %153 {strides = array<i32>} : memref<56x64xf32, #tpu.memory_space<vmem>>, vector<4x64xf32>,
    %c32_131 = arith.constant 32 : index
    %c0_132 = arith.constant 0 : index
    %155 = tpu.strided_load %arg23[%c32_131, %c0_132] {strides = array<i32: 2, 1>} : memref<120x64xf32, #tpu.memory_space<vmem>>, vector<4x64xf32>
    %c33_133 = arith.constant 33 : index
    %c0_134 = arith.constant 0 : index
    %156 = tpu.strided_load %arg23[%c33_133, %c0_134] {strides = array<i32: 2, 1>} : memref<120x64xf32, #tpu.memory_space<vmem>>, vector<4x64xf32>
    %157 = arith.maximumf %155, %156 : vector<4x64xf32>
    %c48_135 = arith.constant 48 : index
    %c0_136 = arith.constant 0 : index
    %158 = tpu.strided_load %arg23[%c48_135, %c0_136] {strides = array<i32: 2, 1>} : memref<120x64xf32, #tpu.memory_space<vmem>>, vector<4x64xf32>
    %c49_137 = arith.constant 49 : index
    %c0_138 = arith.constant 0 : index
    %159 = tpu.strided_load %arg23[%c49_137, %c0_138] {strides = array<i32: 2, 1>} : memref<120x64xf32, #tpu.memory_space<vmem>>, vector<4x64xf32>
    %160 = arith.maximumf %158, %159 : vector<4x64xf32>
    %161 = arith.maximumf %157, %160 : vector<4x64xf32>
    %c24 = arith.constant 24 : index
    %c0_139 = arith.constant 0 : index
    %162 = vector.load %arg20[%c24, %c0_139] : memref<56x64xf32, #tpu.memory_space<vmem>>, vector<4x64xf32>
    tpu.vector_store %arg20[%c24, %c0_139], %161 {strides = array<i32>} : memref<56x64xf32, #tpu.memory_space<vmem>>, vector<4x64xf32>,
    %c64_140 = arith.constant 64 : index
    %c0_141 = arith.constant 0 : index
    %163 = tpu.strided_load %arg23[%c64_140, %c0_141] {strides = array<i32: 2, 1>} : memref<120x64xf32, #tpu.memory_space<vmem>>, vector<4x64xf32>
    %c65_142 = arith.constant 65 : index
    %c0_143 = arith.constant 0 : index
    %164 = tpu.strided_load %arg23[%c65_142, %c0_143] {strides = array<i32: 2, 1>} : memref<120x64xf32, #tpu.memory_space<vmem>>, vector<4x64xf32>
    %165 = arith.maximumf %163, %164 : vector<4x64xf32>
    %c80_144 = arith.constant 80 : index
    %c0_145 = arith.constant 0 : index
    %166 = tpu.strided_load %arg23[%c80_144, %c0_145] {strides = array<i32: 2, 1>} : memref<120x64xf32, #tpu.memory_space<vmem>>, vector<4x64xf32>
    %c81_146 = arith.constant 81 : index
    %c0_147 = arith.constant 0 : index
    %167 = tpu.strided_load %arg23[%c81_146, %c0_147] {strides = array<i32: 2, 1>} : memref<120x64xf32, #tpu.memory_space<vmem>>, vector<4x64xf32>
    %168 = arith.maximumf %166, %167 : vector<4x64xf32>
    %169 = arith.maximumf %165, %168 : vector<4x64xf32>
    %c32_148 = arith.constant 32 : index
    %c0_149 = arith.constant 0 : index
    %170 = vector.load %arg20[%c32_148, %c0_149] : memref<56x64xf32, #tpu.memory_space<vmem>>, vector<4x64xf32>
    tpu.vector_store %arg20[%c32_148, %c0_149], %169 {strides = array<i32>} : memref<56x64xf32, #tpu.memory_space<vmem>>, vector<4x64xf32>,
    %c96_150 = arith.constant 96 : index
    %c0_151 = arith.constant 0 : index
    %171 = tpu.strided_load %arg23[%c96_150, %c0_151] {strides = array<i32: 2, 1>} : memref<120x64xf32, #tpu.memory_space<vmem>>, vector<4x64xf32>
    %c97_152 = arith.constant 97 : index
    %c0_153 = arith.constant 0 : index
    %172 = tpu.strided_load %arg23[%c97_152, %c0_153] {strides = array<i32: 2, 1>} : memref<120x64xf32, #tpu.memory_space<vmem>>, vector<4x64xf32>
    %173 = arith.maximumf %171, %172 : vector<4x64xf32>
    %c112_154 = arith.constant 112 : index
    %c0_155 = arith.constant 0 : index
    %174 = tpu.strided_load %arg23[%c112_154, %c0_155] {strides = array<i32: 2, 1>} : memref<120x64xf32, #tpu.memory_space<vmem>>, vector<4x64xf32>
    %c113_156 = arith.constant 113 : index
    %c0_157 = arith.constant 0 : index
    %175 = tpu.strided_load %arg23[%c113_156, %c0_157] {strides = array<i32: 2, 1>} : memref<120x64xf32, #tpu.memory_space<vmem>>, vector<4x64xf32>
    %176 = arith.maximumf %174, %175 : vector<4x64xf32>
    %177 = arith.maximumf %173, %176 : vector<4x64xf32>
    %c40 = arith.constant 40 : index
    %c0_158 = arith.constant 0 : index
    %178 = vector.load %arg20[%c40, %c0_158] : memref<56x64xf32, #tpu.memory_space<vmem>>, vector<4x64xf32>
    tpu.vector_store %arg20[%c40, %c0_158], %177 {strides = array<i32>} : memref<56x64xf32, #tpu.memory_space<vmem>>, vector<4x64xf32>,
    %cst_159 = arith.constant 0.000000e+00 : f32
    %179 = vector.broadcast %cst_159 : f32 to vector<28x128xf32>
    %c7_160 = arith.constant 7 : index
    %c0_161 = arith.constant 0 : index
    %180 = vector.load %arg20[%c7_160, %c0_161] : memref<56x64xf32, #tpu.memory_space<vmem>>, vector<28x64xf32>
    %181 = arith.truncf %180 : vector<28x64xf32> to vector<28x64xbf16>
    %c0_162 = arith.constant 0 : index
    %c0_163 = arith.constant 0 : index
    %c0_164 = arith.constant 0 : index
    %182 = vector.load %arg8[%c0_162, %c0_163, %c0_164] : memref<9x64x128xbf16, #tpu.memory_space<vmem>>, vector<1x64x128xbf16>
    %183 = vector.shape_cast %182 : vector<1x64x128xbf16> to vector<64x128xbf16>
    %cst_165 = arith.constant dense<0.000000e+00> : vector<28x128xf32>
    %184 = tpu.matmul %181, %183, %cst_165 {dimension_numbers = #tpu.dot_dimension_numbers<[1], [0], [0], [1], [0, 0, 1, 1], [], []>} : vector<28x64xbf16>, vector<64x128xbf16>, vector<28x128xf32> -> vector<28x128xf32>
    %185 = arith.addf %179, %184 : vector<28x128xf32>
    %c8_166 = arith.constant 8 : index
    %c0_167 = arith.constant 0 : index
    %186 = vector.load %arg20[%c8_166, %c0_167] : memref<56x64xf32, #tpu.memory_space<vmem>>, vector<28x64xf32>
    %187 = arith.truncf %186 : vector<28x64xf32> to vector<28x64xbf16>
    %c1_168 = arith.constant 1 : index
    %c0_169 = arith.constant 0 : index
    %c0_170 = arith.constant 0 : index
    %188 = vector.load %arg8[%c1_168, %c0_169, %c0_170] : memref<9x64x128xbf16, #tpu.memory_space<vmem>>, vector<1x64x128xbf16>
    %189 = vector.shape_cast %188 : vector<1x64x128xbf16> to vector<64x128xbf16>
    %cst_171 = arith.constant dense<0.000000e+00> : vector<28x128xf32>
    %190 = tpu.matmul %187, %189, %cst_171 {dimension_numbers = #tpu.dot_dimension_numbers<[1], [0], [0], [1], [0, 0, 1, 1], [], []>} : vector<28x64xbf16>, vector<64x128xbf16>, vector<28x128xf32> -> vector<28x128xf32>
    %191 = arith.addf %185, %190 : vector<28x128xf32>
    %c9 = arith.constant 9 : index
    %c0_172 = arith.constant 0 : index
    %192 = vector.load %arg20[%c9, %c0_172] : memref<56x64xf32, #tpu.memory_space<vmem>>, vector<28x64xf32>
    %193 = arith.truncf %192 : vector<28x64xf32> to vector<28x64xbf16>
    %c2_173 = arith.constant 2 : index
    %c0_174 = arith.constant 0 : index
    %c0_175 = arith.constant 0 : index
    %194 = vector.load %arg8[%c2_173, %c0_174, %c0_175] : memref<9x64x128xbf16, #tpu.memory_space<vmem>>, vector<1x64x128xbf16>
    %195 = vector.shape_cast %194 : vector<1x64x128xbf16> to vector<64x128xbf16>
    %cst_176 = arith.constant dense<0.000000e+00> : vector<28x128xf32>
    %196 = tpu.matmul %193, %195, %cst_176 {dimension_numbers = #tpu.dot_dimension_numbers<[1], [0], [0], [1], [0, 0, 1, 1], [], []>} : vector<28x64xbf16>, vector<64x128xbf16>, vector<28x128xf32> -> vector<28x128xf32>
    %197 = arith.addf %191, %196 : vector<28x128xf32>
    %c15_177 = arith.constant 15 : index
    %c0_178 = arith.constant 0 : index
    %198 = vector.load %arg20[%c15_177, %c0_178] : memref<56x64xf32, #tpu.memory_space<vmem>>, vector<28x64xf32>
    %199 = arith.truncf %198 : vector<28x64xf32> to vector<28x64xbf16>
    %c3_179 = arith.constant 3 : index
    %c0_180 = arith.constant 0 : index
    %c0_181 = arith.constant 0 : index
    %200 = vector.load %arg8[%c3_179, %c0_180, %c0_181] : memref<9x64x128xbf16, #tpu.memory_space<vmem>>, vector<1x64x128xbf16>
    %201 = vector.shape_cast %200 : vector<1x64x128xbf16> to vector<64x128xbf16>
    %cst_182 = arith.constant dense<0.000000e+00> : vector<28x128xf32>
    %202 = tpu.matmul %199, %201, %cst_182 {dimension_numbers = #tpu.dot_dimension_numbers<[1], [0], [0], [1], [0, 0, 1, 1], [], []>} : vector<28x64xbf16>, vector<64x128xbf16>, vector<28x128xf32> -> vector<28x128xf32>
    %203 = arith.addf %197, %202 : vector<28x128xf32>
    %c16_183 = arith.constant 16 : index
    %c0_184 = arith.constant 0 : index
    %204 = vector.load %arg20[%c16_183, %c0_184] : memref<56x64xf32, #tpu.memory_space<vmem>>, vector<28x64xf32>
    %205 = arith.truncf %204 : vector<28x64xf32> to vector<28x64xbf16>
    %c4_185 = arith.constant 4 : index
    %c0_186 = arith.constant 0 : index
    %c0_187 = arith.constant 0 : index
    %206 = vector.load %arg8[%c4_185, %c0_186, %c0_187] : memref<9x64x128xbf16, #tpu.memory_space<vmem>>, vector<1x64x128xbf16>
    %207 = vector.shape_cast %206 : vector<1x64x128xbf16> to vector<64x128xbf16>
    %cst_188 = arith.constant dense<0.000000e+00> : vector<28x128xf32>
    %208 = tpu.matmul %205, %207, %cst_188 {dimension_numbers = #tpu.dot_dimension_numbers<[1], [0], [0], [1], [0, 0, 1, 1], [], []>} : vector<28x64xbf16>, vector<64x128xbf16>, vector<28x128xf32> -> vector<28x128xf32>
    %209 = arith.addf %203, %208 : vector<28x128xf32>
    %c17_189 = arith.constant 17 : index
    %c0_190 = arith.constant 0 : index
    %210 = vector.load %arg20[%c17_189, %c0_190] : memref<56x64xf32, #tpu.memory_space<vmem>>, vector<28x64xf32>
    %211 = arith.truncf %210 : vector<28x64xf32> to vector<28x64xbf16>
    %c5_191 = arith.constant 5 : index
    %c0_192 = arith.constant 0 : index
    %c0_193 = arith.constant 0 : index
    %212 = vector.load %arg8[%c5_191, %c0_192, %c0_193] : memref<9x64x128xbf16, #tpu.memory_space<vmem>>, vector<1x64x128xbf16>
    %213 = vector.shape_cast %212 : vector<1x64x128xbf16> to vector<64x128xbf16>
    %cst_194 = arith.constant dense<0.000000e+00> : vector<28x128xf32>
    %214 = tpu.matmul %211, %213, %cst_194 {dimension_numbers = #tpu.dot_dimension_numbers<[1], [0], [0], [1], [0, 0, 1, 1], [], []>} : vector<28x64xbf16>, vector<64x128xbf16>, vector<28x128xf32> -> vector<28x128xf32>
    %215 = arith.addf %209, %214 : vector<28x128xf32>
    %c23 = arith.constant 23 : index
    %c0_195 = arith.constant 0 : index
    %216 = vector.load %arg20[%c23, %c0_195] : memref<56x64xf32, #tpu.memory_space<vmem>>, vector<28x64xf32>
    %217 = arith.truncf %216 : vector<28x64xf32> to vector<28x64xbf16>
    %c6_196 = arith.constant 6 : index
    %c0_197 = arith.constant 0 : index
    %c0_198 = arith.constant 0 : index
    %218 = vector.load %arg8[%c6_196, %c0_197, %c0_198] : memref<9x64x128xbf16, #tpu.memory_space<vmem>>, vector<1x64x128xbf16>
    %219 = vector.shape_cast %218 : vector<1x64x128xbf16> to vector<64x128xbf16>
    %cst_199 = arith.constant dense<0.000000e+00> : vector<28x128xf32>
    %220 = tpu.matmul %217, %219, %cst_199 {dimension_numbers = #tpu.dot_dimension_numbers<[1], [0], [0], [1], [0, 0, 1, 1], [], []>} : vector<28x64xbf16>, vector<64x128xbf16>, vector<28x128xf32> -> vector<28x128xf32>
    %221 = arith.addf %215, %220 : vector<28x128xf32>
    %c24_200 = arith.constant 24 : index
    %c0_201 = arith.constant 0 : index
    %222 = vector.load %arg20[%c24_200, %c0_201] : memref<56x64xf32, #tpu.memory_space<vmem>>, vector<28x64xf32>
    %223 = arith.truncf %222 : vector<28x64xf32> to vector<28x64xbf16>
    %c7_202 = arith.constant 7 : index
    %c0_203 = arith.constant 0 : index
    %c0_204 = arith.constant 0 : index
    %224 = vector.load %arg8[%c7_202, %c0_203, %c0_204] : memref<9x64x128xbf16, #tpu.memory_space<vmem>>, vector<1x64x128xbf16>
    %225 = vector.shape_cast %224 : vector<1x64x128xbf16> to vector<64x128xbf16>
    %cst_205 = arith.constant dense<0.000000e+00> : vector<28x128xf32>
    %226 = tpu.matmul %223, %225, %cst_205 {dimension_numbers = #tpu.dot_dimension_numbers<[1], [0], [0], [1], [0, 0, 1, 1], [], []>} : vector<28x64xbf16>, vector<64x128xbf16>, vector<28x128xf32> -> vector<28x128xf32>
    %227 = arith.addf %221, %226 : vector<28x128xf32>
    %c25 = arith.constant 25 : index
    %c0_206 = arith.constant 0 : index
    %228 = vector.load %arg20[%c25, %c0_206] : memref<56x64xf32, #tpu.memory_space<vmem>>, vector<28x64xf32>
    %229 = arith.truncf %228 : vector<28x64xf32> to vector<28x64xbf16>
    %c8_207 = arith.constant 8 : index
    %c0_208 = arith.constant 0 : index
    %c0_209 = arith.constant 0 : index
    %230 = vector.load %arg8[%c8_207, %c0_208, %c0_209] : memref<9x64x128xbf16, #tpu.memory_space<vmem>>, vector<1x64x128xbf16>
    %231 = vector.shape_cast %230 : vector<1x64x128xbf16> to vector<64x128xbf16>
    %cst_210 = arith.constant dense<0.000000e+00> : vector<28x128xf32>
    %232 = tpu.matmul %229, %231, %cst_210 {dimension_numbers = #tpu.dot_dimension_numbers<[1], [0], [0], [1], [0, 0, 1, 1], [], []>} : vector<28x64xbf16>, vector<64x128xbf16>, vector<28x128xf32> -> vector<28x128xf32>
    %233 = arith.addf %227, %232 : vector<28x128xf32>
    %c0_211 = arith.constant 0 : index
    %c0_212 = arith.constant 0 : index
    %234 = vector.load %arg9[%c0_211, %c0_212] : memref<1x128xf32, #tpu.memory_space<vmem>>, vector<1x128xf32>
    %235 = vector.broadcast %234 : vector<1x128xf32> to vector<28x128xf32>
    %236 = arith.mulf %233, %235 : vector<28x128xf32>
    %c0_213 = arith.constant 0 : index
    %c0_214 = arith.constant 0 : index
    %237 = vector.load %arg10[%c0_213, %c0_214] : memref<1x128xf32, #tpu.memory_space<vmem>>, vector<1x128xf32>
    %238 = vector.broadcast %237 : vector<1x128xf32> to vector<28x128xf32>
    %239 = arith.addf %236, %238 : vector<28x128xf32>
    %cst_215 = arith.constant 0.000000e+00 : f32
    %240 = vector.broadcast %cst_215 : f32 to vector<28x128xf32>
    %241 = arith.maximumf %239, %240 : vector<28x128xf32>
    %c0_216 = arith.constant 0 : index
    %c0_217 = arith.constant 0 : index
    %242 = vector.load %arg24[%c0_216, %c0_217] : memref<28x128xf32, #tpu.memory_space<vmem>>, vector<28x128xf32>
    tpu.vector_store %arg24[%c0_216, %c0_217], %241 {strides = array<i32>} : memref<28x128xf32, #tpu.memory_space<vmem>>, vector<28x128xf32>,
    %c0_218 = arith.constant 0 : index
    %c0_219 = arith.constant 0 : index
    %243 = tpu.strided_load %arg24[%c0_218, %c0_219] {strides = array<i32: 2, 1>} : memref<28x128xf32, #tpu.memory_space<vmem>>, vector<2x128xf32>
    %c1_220 = arith.constant 1 : index
    %c0_221 = arith.constant 0 : index
    %244 = tpu.strided_load %arg24[%c1_220, %c0_221] {strides = array<i32: 2, 1>} : memref<28x128xf32, #tpu.memory_space<vmem>>, vector<2x128xf32>
    %245 = arith.maximumf %243, %244 : vector<2x128xf32>
    %c8_222 = arith.constant 8 : index
    %c0_223 = arith.constant 0 : index
    %246 = tpu.strided_load %arg24[%c8_222, %c0_223] {strides = array<i32: 2, 1>} : memref<28x128xf32, #tpu.memory_space<vmem>>, vector<2x128xf32>
    %c9_224 = arith.constant 9 : index
    %c0_225 = arith.constant 0 : index
    %247 = tpu.strided_load %arg24[%c9_224, %c0_225] {strides = array<i32: 2, 1>} : memref<28x128xf32, #tpu.memory_space<vmem>>, vector<2x128xf32>
    %248 = arith.maximumf %246, %247 : vector<2x128xf32>
    %249 = arith.maximumf %245, %248 : vector<2x128xf32>
    %c16_226 = arith.constant 16 : index
    %c0_227 = arith.constant 0 : index
    %250 = vector.load %arg21[%c16_226, %c0_227] : memref<40x128xf32, #tpu.memory_space<vmem>>, vector<2x128xf32>
    tpu.vector_store %arg21[%c16_226, %c0_227], %249 {strides = array<i32>} : memref<40x128xf32, #tpu.memory_space<vmem>>, vector<2x128xf32>,
    %c16_228 = arith.constant 16 : index
    %c0_229 = arith.constant 0 : index
    %251 = tpu.strided_load %arg24[%c16_228, %c0_229] {strides = array<i32: 2, 1>} : memref<28x128xf32, #tpu.memory_space<vmem>>, vector<2x128xf32>
    %c17_230 = arith.constant 17 : index
    %c0_231 = arith.constant 0 : index
    %252 = tpu.strided_load %arg24[%c17_230, %c0_231] {strides = array<i32: 2, 1>} : memref<28x128xf32, #tpu.memory_space<vmem>>, vector<2x128xf32>
    %253 = arith.maximumf %251, %252 : vector<2x128xf32>
    %c24_232 = arith.constant 24 : index
    %c0_233 = arith.constant 0 : index
    %254 = tpu.strided_load %arg24[%c24_232, %c0_233] {strides = array<i32: 2, 1>} : memref<28x128xf32, #tpu.memory_space<vmem>>, vector<2x128xf32>
    %c25_234 = arith.constant 25 : index
    %c0_235 = arith.constant 0 : index
    %255 = tpu.strided_load %arg24[%c25_234, %c0_235] {strides = array<i32: 2, 1>} : memref<28x128xf32, #tpu.memory_space<vmem>>, vector<2x128xf32>
    %256 = arith.maximumf %254, %255 : vector<2x128xf32>
    %257 = arith.maximumf %253, %256 : vector<2x128xf32>
    %c24_236 = arith.constant 24 : index
    %c0_237 = arith.constant 0 : index
    %258 = vector.load %arg21[%c24_236, %c0_237] : memref<40x128xf32, #tpu.memory_space<vmem>>, vector<2x128xf32>
    tpu.vector_store %arg21[%c24_236, %c0_237], %257 {strides = array<i32>} : memref<40x128xf32, #tpu.memory_space<vmem>>, vector<2x128xf32>,
    %cst_238 = arith.constant 0.000000e+00 : f32
    %259 = vector.broadcast %cst_238 : f32 to vector<10x256xf32>
    %c7_239 = arith.constant 7 : index
    %c0_240 = arith.constant 0 : index
    %260 = vector.load %arg21[%c7_239, %c0_240] : memref<40x128xf32, #tpu.memory_space<vmem>>, vector<10x128xf32>
    %261 = arith.truncf %260 : vector<10x128xf32> to vector<10x128xbf16>
    %c0_241 = arith.constant 0 : index
    %c0_242 = arith.constant 0 : index
    %c0_243 = arith.constant 0 : index
    %262 = vector.load %arg11[%c0_241, %c0_242, %c0_243] : memref<9x128x256xbf16, #tpu.memory_space<vmem>>, vector<1x128x256xbf16>
    %263 = vector.shape_cast %262 : vector<1x128x256xbf16> to vector<128x256xbf16>
    %cst_244 = arith.constant dense<0.000000e+00> : vector<10x256xf32>
    %264 = tpu.matmul %261, %263, %cst_244 {dimension_numbers = #tpu.dot_dimension_numbers<[1], [0], [0], [1], [0, 0, 1, 1], [], []>} : vector<10x128xbf16>, vector<128x256xbf16>, vector<10x256xf32> -> vector<10x256xf32>
    %265 = arith.addf %259, %264 : vector<10x256xf32>
    %c8_245 = arith.constant 8 : index
    %c0_246 = arith.constant 0 : index
    %266 = vector.load %arg21[%c8_245, %c0_246] : memref<40x128xf32, #tpu.memory_space<vmem>>, vector<10x128xf32>
    %267 = arith.truncf %266 : vector<10x128xf32> to vector<10x128xbf16>
    %c1_247 = arith.constant 1 : index
    %c0_248 = arith.constant 0 : index
    %c0_249 = arith.constant 0 : index
    %268 = vector.load %arg11[%c1_247, %c0_248, %c0_249] : memref<9x128x256xbf16, #tpu.memory_space<vmem>>, vector<1x128x256xbf16>
    %269 = vector.shape_cast %268 : vector<1x128x256xbf16> to vector<128x256xbf16>
    %cst_250 = arith.constant dense<0.000000e+00> : vector<10x256xf32>
    %270 = tpu.matmul %267, %269, %cst_250 {dimension_numbers = #tpu.dot_dimension_numbers<[1], [0], [0], [1], [0, 0, 1, 1], [], []>} : vector<10x128xbf16>, vector<128x256xbf16>, vector<10x256xf32> -> vector<10x256xf32>
    %271 = arith.addf %265, %270 : vector<10x256xf32>
    %c9_251 = arith.constant 9 : index
    %c0_252 = arith.constant 0 : index
    %272 = vector.load %arg21[%c9_251, %c0_252] : memref<40x128xf32, #tpu.memory_space<vmem>>, vector<10x128xf32>
    %273 = arith.truncf %272 : vector<10x128xf32> to vector<10x128xbf16>
    %c2_253 = arith.constant 2 : index
    %c0_254 = arith.constant 0 : index
    %c0_255 = arith.constant 0 : index
    %274 = vector.load %arg11[%c2_253, %c0_254, %c0_255] : memref<9x128x256xbf16, #tpu.memory_space<vmem>>, vector<1x128x256xbf16>
    %275 = vector.shape_cast %274 : vector<1x128x256xbf16> to vector<128x256xbf16>
    %cst_256 = arith.constant dense<0.000000e+00> : vector<10x256xf32>
    %276 = tpu.matmul %273, %275, %cst_256 {dimension_numbers = #tpu.dot_dimension_numbers<[1], [0], [0], [1], [0, 0, 1, 1], [], []>} : vector<10x128xbf16>, vector<128x256xbf16>, vector<10x256xf32> -> vector<10x256xf32>
    %277 = arith.addf %271, %276 : vector<10x256xf32>
    %c15_257 = arith.constant 15 : index
    %c0_258 = arith.constant 0 : index
    %278 = vector.load %arg21[%c15_257, %c0_258] : memref<40x128xf32, #tpu.memory_space<vmem>>, vector<10x128xf32>
    %279 = arith.truncf %278 : vector<10x128xf32> to vector<10x128xbf16>
    %c3_259 = arith.constant 3 : index
    %c0_260 = arith.constant 0 : index
    %c0_261 = arith.constant 0 : index
    %280 = vector.load %arg11[%c3_259, %c0_260, %c0_261] : memref<9x128x256xbf16, #tpu.memory_space<vmem>>, vector<1x128x256xbf16>
    %281 = vector.shape_cast %280 : vector<1x128x256xbf16> to vector<128x256xbf16>
    %cst_262 = arith.constant dense<0.000000e+00> : vector<10x256xf32>
    %282 = tpu.matmul %279, %281, %cst_262 {dimension_numbers = #tpu.dot_dimension_numbers<[1], [0], [0], [1], [0, 0, 1, 1], [], []>} : vector<10x128xbf16>, vector<128x256xbf16>, vector<10x256xf32> -> vector<10x256xf32>
    %283 = arith.addf %277, %282 : vector<10x256xf32>
    %c16_263 = arith.constant 16 : index
    %c0_264 = arith.constant 0 : index
    %284 = vector.load %arg21[%c16_263, %c0_264] : memref<40x128xf32, #tpu.memory_space<vmem>>, vector<10x128xf32>
    %285 = arith.truncf %284 : vector<10x128xf32> to vector<10x128xbf16>
    %c4_265 = arith.constant 4 : index
    %c0_266 = arith.constant 0 : index
    %c0_267 = arith.constant 0 : index
    %286 = vector.load %arg11[%c4_265, %c0_266, %c0_267] : memref<9x128x256xbf16, #tpu.memory_space<vmem>>, vector<1x128x256xbf16>
    %287 = vector.shape_cast %286 : vector<1x128x256xbf16> to vector<128x256xbf16>
    %cst_268 = arith.constant dense<0.000000e+00> : vector<10x256xf32>
    %288 = tpu.matmul %285, %287, %cst_268 {dimension_numbers = #tpu.dot_dimension_numbers<[1], [0], [0], [1], [0, 0, 1, 1], [], []>} : vector<10x128xbf16>, vector<128x256xbf16>, vector<10x256xf32> -> vector<10x256xf32>
    %289 = arith.addf %283, %288 : vector<10x256xf32>
    %c17_269 = arith.constant 17 : index
    %c0_270 = arith.constant 0 : index
    %290 = vector.load %arg21[%c17_269, %c0_270] : memref<40x128xf32, #tpu.memory_space<vmem>>, vector<10x128xf32>
    %291 = arith.truncf %290 : vector<10x128xf32> to vector<10x128xbf16>
    %c5_271 = arith.constant 5 : index
    %c0_272 = arith.constant 0 : index
    %c0_273 = arith.constant 0 : index
    %292 = vector.load %arg11[%c5_271, %c0_272, %c0_273] : memref<9x128x256xbf16, #tpu.memory_space<vmem>>, vector<1x128x256xbf16>
    %293 = vector.shape_cast %292 : vector<1x128x256xbf16> to vector<128x256xbf16>
    %cst_274 = arith.constant dense<0.000000e+00> : vector<10x256xf32>
    %294 = tpu.matmul %291, %293, %cst_274 {dimension_numbers = #tpu.dot_dimension_numbers<[1], [0], [0], [1], [0, 0, 1, 1], [], []>} : vector<10x128xbf16>, vector<128x256xbf16>, vector<10x256xf32> -> vector<10x256xf32>
    %295 = arith.addf %289, %294 : vector<10x256xf32>
    %c23_275 = arith.constant 23 : index
    %c0_276 = arith.constant 0 : index
    %296 = vector.load %arg21[%c23_275, %c0_276] : memref<40x128xf32, #tpu.memory_space<vmem>>, vector<10x128xf32>
    %297 = arith.truncf %296 : vector<10x128xf32> to vector<10x128xbf16>
    %c6_277 = arith.constant 6 : index
    %c0_278 = arith.constant 0 : index
    %c0_279 = arith.constant 0 : index
    %298 = vector.load %arg11[%c6_277, %c0_278, %c0_279] : memref<9x128x256xbf16, #tpu.memory_space<vmem>>, vector<1x128x256xbf16>
    %299 = vector.shape_cast %298 : vector<1x128x256xbf16> to vector<128x256xbf16>
    %cst_280 = arith.constant dense<0.000000e+00> : vector<10x256xf32>
    %300 = tpu.matmul %297, %299, %cst_280 {dimension_numbers = #tpu.dot_dimension_numbers<[1], [0], [0], [1], [0, 0, 1, 1], [], []>} : vector<10x128xbf16>, vector<128x256xbf16>, vector<10x256xf32> -> vector<10x256xf32>
    %301 = arith.addf %295, %300 : vector<10x256xf32>
    %c24_281 = arith.constant 24 : index
    %c0_282 = arith.constant 0 : index
    %302 = vector.load %arg21[%c24_281, %c0_282] : memref<40x128xf32, #tpu.memory_space<vmem>>, vector<10x128xf32>
    %303 = arith.truncf %302 : vector<10x128xf32> to vector<10x128xbf16>
    %c7_283 = arith.constant 7 : index
    %c0_284 = arith.constant 0 : index
    %c0_285 = arith.constant 0 : index
    %304 = vector.load %arg11[%c7_283, %c0_284, %c0_285] : memref<9x128x256xbf16, #tpu.memory_space<vmem>>, vector<1x128x256xbf16>
    %305 = vector.shape_cast %304 : vector<1x128x256xbf16> to vector<128x256xbf16>
    %cst_286 = arith.constant dense<0.000000e+00> : vector<10x256xf32>
    %306 = tpu.matmul %303, %305, %cst_286 {dimension_numbers = #tpu.dot_dimension_numbers<[1], [0], [0], [1], [0, 0, 1, 1], [], []>} : vector<10x128xbf16>, vector<128x256xbf16>, vector<10x256xf32> -> vector<10x256xf32>
    %307 = arith.addf %301, %306 : vector<10x256xf32>
    %c25_287 = arith.constant 25 : index
    %c0_288 = arith.constant 0 : index
    %308 = vector.load %arg21[%c25_287, %c0_288] : memref<40x128xf32, #tpu.memory_space<vmem>>, vector<10x128xf32>
    %309 = arith.truncf %308 : vector<10x128xf32> to vector<10x128xbf16>
    %c8_289 = arith.constant 8 : index
    %c0_290 = arith.constant 0 : index
    %c0_291 = arith.constant 0 : index
    %310 = vector.load %arg11[%c8_289, %c0_290, %c0_291] : memref<9x128x256xbf16, #tpu.memory_space<vmem>>, vector<1x128x256xbf16>
    %311 = vector.shape_cast %310 : vector<1x128x256xbf16> to vector<128x256xbf16>
    %cst_292 = arith.constant dense<0.000000e+00> : vector<10x256xf32>
    %312 = tpu.matmul %309, %311, %cst_292 {dimension_numbers = #tpu.dot_dimension_numbers<[1], [0], [0], [1], [0, 0, 1, 1], [], []>} : vector<10x128xbf16>, vector<128x256xbf16>, vector<10x256xf32> -> vector<10x256xf32>
    %313 = arith.addf %307, %312 : vector<10x256xf32>
    %c0_293 = arith.constant 0 : index
    %c0_294 = arith.constant 0 : index
    %314 = vector.load %arg12[%c0_293, %c0_294] : memref<1x256xf32, #tpu.memory_space<vmem>>, vector<1x256xf32>
    %315 = vector.broadcast %314 : vector<1x256xf32> to vector<10x256xf32>
    %316 = arith.mulf %313, %315 : vector<10x256xf32>
    %c0_295 = arith.constant 0 : index
    %c0_296 = arith.constant 0 : index
    %317 = vector.load %arg13[%c0_295, %c0_296] : memref<1x256xf32, #tpu.memory_space<vmem>>, vector<1x256xf32>
    %318 = vector.broadcast %317 : vector<1x256xf32> to vector<10x256xf32>
    %319 = arith.addf %316, %318 : vector<10x256xf32>
    %cst_297 = arith.constant 0.000000e+00 : f32
    %320 = vector.broadcast %cst_297 : f32 to vector<10x256xf32>
    %321 = arith.maximumf %319, %320 : vector<10x256xf32>
    %c0_298 = arith.constant 0 : index
    %c0_299 = arith.constant 0 : index
    %322 = vector.load %arg25[%c0_298, %c0_299] : memref<10x256xf32, #tpu.memory_space<vmem>>, vector<10x256xf32>
    tpu.vector_store %arg25[%c0_298, %c0_299], %321 {strides = array<i32>} : memref<10x256xf32, #tpu.memory_space<vmem>>, vector<10x256xf32>,
    %cst_300 = arith.constant 0.000000e+00 : f32
    %323 = vector.broadcast %cst_300 : f32 to vector<1x256xf32>
    %c0_301 = arith.constant 0 : index
    %c0_302 = arith.constant 0 : index
    %324 = vector.load %arg25[%c0_301, %c0_302] : memref<10x256xf32, #tpu.memory_space<vmem>>, vector<1x256xf32>
    %325 = arith.addf %323, %324 : vector<1x256xf32>
    %c1_303 = arith.constant 1 : index
    %c0_304 = arith.constant 0 : index
    %326 = vector.load %arg25[%c1_303, %c0_304] : memref<10x256xf32, #tpu.memory_space<vmem>>, vector<1x256xf32>
    %327 = arith.addf %325, %326 : vector<1x256xf32>
    %c8_305 = arith.constant 8 : index
    %c0_306 = arith.constant 0 : index
    %328 = vector.load %arg25[%c8_305, %c0_306] : memref<10x256xf32, #tpu.memory_space<vmem>>, vector<1x256xf32>
    %329 = arith.addf %327, %328 : vector<1x256xf32>
    %c9_307 = arith.constant 9 : index
    %c0_308 = arith.constant 0 : index
    %330 = vector.load %arg25[%c9_307, %c0_308] : memref<10x256xf32, #tpu.memory_space<vmem>>, vector<1x256xf32>
    %331 = arith.addf %329, %330 : vector<1x256xf32>
    %cst_309 = arith.constant 2.500000e-01 : f32
    %332 = vector.broadcast %cst_309 : f32 to vector<1x256xf32>
    %333 = arith.mulf %331, %332 : vector<1x256xf32>
    %334 = arith.truncf %333 : vector<1x256xf32> to vector<1x256xbf16>
    %c0_310 = arith.constant 0 : index
    %c0_311 = arith.constant 0 : index
    %335 = vector.load %arg14[%c0_310, %c0_311] : memref<256x256xbf16, #tpu.memory_space<vmem>>, vector<256x256xbf16>
    %cst_312 = arith.constant dense<0.000000e+00> : vector<1x256xf32>
    %336 = tpu.matmul %334, %335, %cst_312 {dimension_numbers = #tpu.dot_dimension_numbers<[1], [0], [0], [1], [0, 0, 1, 1], [], []>} : vector<1x256xbf16>, vector<256x256xbf16>, vector<1x256xf32> -> vector<1x256xf32>
    %c0_313 = arith.constant 0 : index
    %c0_314 = arith.constant 0 : index
    %337 = vector.load %arg15[%c0_313, %c0_314] : memref<1x256xf32, #tpu.memory_space<vmem>>, vector<1x256xf32>
    %338 = arith.addf %336, %337 : vector<1x256xf32>
    %cst_315 = arith.constant 0.000000e+00 : f32
    %339 = vector.broadcast %cst_315 : f32 to vector<1x256xf32>
    %340 = arith.maximumf %338, %339 : vector<1x256xf32>
    %341 = arith.truncf %340 : vector<1x256xf32> to vector<1x256xbf16>
    %c0_316 = arith.constant 0 : index
    %c0_317 = arith.constant 0 : index
    %342 = vector.load %arg16[%c0_316, %c0_317] : memref<256x128xbf16, #tpu.memory_space<vmem>>, vector<256x128xbf16>
    %cst_318 = arith.constant dense<0.000000e+00> : vector<1x128xf32>
    %343 = tpu.matmul %341, %342, %cst_318 {dimension_numbers = #tpu.dot_dimension_numbers<[1], [0], [0], [1], [0, 0, 1, 1], [], []>} : vector<1x256xbf16>, vector<256x128xbf16>, vector<1x128xf32> -> vector<1x128xf32>
    %c0_319 = arith.constant 0 : index
    %c0_320 = arith.constant 0 : index
    %344 = vector.load %arg17[%c0_319, %c0_320] : memref<1x128xf32, #tpu.memory_space<vmem>>, vector<1x128xf32>
    %345 = arith.addf %343, %344 : vector<1x128xf32>
    %346 = arith.mulf %345, %345 : vector<1x128xf32>
    %cst_321 = arith.constant dense<0.000000e+00> : vector<1xf32>
    %347 = vector.multi_reduction <add>, %346, %cst_321 [1] : vector<1x128xf32> to vector<1xf32>
    %348 = vector.shape_cast %347 : vector<1xf32> to vector<1x1xf32>
    %cst_322 = arith.constant 1.000000e-24 : f32
    %349 = vector.broadcast %cst_322 : f32 to vector<1x1xf32>
    %350 = arith.maximumf %348, %349 : vector<1x1xf32>
    %351 = math.rsqrt %350 : vector<1x1xf32>
    %352 = vector.broadcast %351 : vector<1x1xf32> to vector<1x128xf32>
    %353 = arith.mulf %345, %352 : vector<1x128xf32>
    %c0_323 = arith.constant 0 : index
    %c0_324 = arith.constant 0 : index
    %c0_325 = arith.constant 0 : index
    %354 = vector.load %arg18[%c0_323, %c0_324, %c0_325] : memref<1x1x128xf32, #tpu.memory_space<vmem>>, vector<1x1x128xf32>
    %355 = vector.shape_cast %354 : vector<1x1x128xf32> to vector<1x128xf32>
    %356 = vector.shape_cast %353 : vector<1x128xf32> to vector<1x1x128xf32>
    tpu.vector_store %arg18[%c0_323, %c0_324, %c0_325], %356 {strides = array<i32>} : memref<1x1x128xf32, #tpu.memory_space<vmem>>, vector<1x1x128xf32>,
    return
  }
  func.func @transform_0(%arg0: i32) -> (i32, i32, i32) {
    %c0_i32 = arith.constant 0 : i32
    %c0_i32_0 = arith.constant 0 : i32
    %c0_i32_1 = arith.constant 0 : i32
    return %arg0, %c0_i32, %c0_i32_0 : i32, i32, i32
  }
  func.func @transform_1(%arg0: i32) -> (i32, i32) {
    %c0_i32 = arith.constant 0 : i32
    %c0_i32_0 = arith.constant 0 : i32
    %c0_i32_1 = arith.constant 0 : i32
    return %c0_i32, %c0_i32_0 : i32, i32
  }
  func.func @transform_2(%arg0: i32) -> (i32, i32) {
    %c0_i32 = arith.constant 0 : i32
    %c0_i32_0 = arith.constant 0 : i32
    %c0_i32_1 = arith.constant 0 : i32
    return %c0_i32, %c0_i32_0 : i32, i32
  }
  func.func @transform_3(%arg0: i32) -> (i32, i32) {
    %c0_i32 = arith.constant 0 : i32
    %c0_i32_0 = arith.constant 0 : i32
    %c0_i32_1 = arith.constant 0 : i32
    return %c0_i32, %c0_i32_0 : i32, i32
  }
  func.func @transform_4(%arg0: i32) -> (i32, i32, i32) {
    %c0_i32 = arith.constant 0 : i32
    %c0_i32_0 = arith.constant 0 : i32
    %c0_i32_1 = arith.constant 0 : i32
    %c0_i32_2 = arith.constant 0 : i32
    return %c0_i32, %c0_i32_0, %c0_i32_1 : i32, i32, i32
  }
  func.func @transform_5(%arg0: i32) -> (i32, i32) {
    %c0_i32 = arith.constant 0 : i32
    %c0_i32_0 = arith.constant 0 : i32
    %c0_i32_1 = arith.constant 0 : i32
    return %c0_i32, %c0_i32_0 : i32, i32
  }
  func.func @transform_6(%arg0: i32) -> (i32, i32) {
    %c0_i32 = arith.constant 0 : i32
    %c0_i32_0 = arith.constant 0 : i32
    %c0_i32_1 = arith.constant 0 : i32
    return %c0_i32, %c0_i32_0 : i32, i32
  }
  func.func @transform_7(%arg0: i32) -> (i32, i32, i32) {
    %c0_i32 = arith.constant 0 : i32
    %c0_i32_0 = arith.constant 0 : i32
    %c0_i32_1 = arith.constant 0 : i32
    %c0_i32_2 = arith.constant 0 : i32
    return %c0_i32, %c0_i32_0, %c0_i32_1 : i32, i32, i32
  }
  func.func @transform_8(%arg0: i32) -> (i32, i32) {
    %c0_i32 = arith.constant 0 : i32
    %c0_i32_0 = arith.constant 0 : i32
    %c0_i32_1 = arith.constant 0 : i32
    return %c0_i32, %c0_i32_0 : i32, i32
  }
  func.func @transform_9(%arg0: i32) -> (i32, i32) {
    %c0_i32 = arith.constant 0 : i32
    %c0_i32_0 = arith.constant 0 : i32
    %c0_i32_1 = arith.constant 0 : i32
    return %c0_i32, %c0_i32_0 : i32, i32
  }
  func.func @transform_10(%arg0: i32) -> (i32, i32, i32) {
    %c0_i32 = arith.constant 0 : i32
    %c0_i32_0 = arith.constant 0 : i32
    %c0_i32_1 = arith.constant 0 : i32
    %c0_i32_2 = arith.constant 0 : i32
    return %c0_i32, %c0_i32_0, %c0_i32_1 : i32, i32, i32
  }
  func.func @transform_11(%arg0: i32) -> (i32, i32) {
    %c0_i32 = arith.constant 0 : i32
    %c0_i32_0 = arith.constant 0 : i32
    %c0_i32_1 = arith.constant 0 : i32
    return %c0_i32, %c0_i32_0 : i32, i32
  }
  func.func @transform_12(%arg0: i32) -> (i32, i32) {
    %c0_i32 = arith.constant 0 : i32
    %c0_i32_0 = arith.constant 0 : i32
    %c0_i32_1 = arith.constant 0 : i32
    return %c0_i32, %c0_i32_0 : i32, i32
  }
  func.func @transform_13(%arg0: i32) -> (i32, i32) {
    %c0_i32 = arith.constant 0 : i32
    %c0_i32_0 = arith.constant 0 : i32
    %c0_i32_1 = arith.constant 0 : i32
    return %c0_i32, %c0_i32_0 : i32, i32
  }
  func.func @transform_14(%arg0: i32) -> (i32, i32) {
    %c0_i32 = arith.constant 0 : i32
    %c0_i32_0 = arith.constant 0 : i32
    %c0_i32_1 = arith.constant 0 : i32
    return %c0_i32, %c0_i32_0 : i32, i32
  }
  func.func @transform_15(%arg0: i32) -> (i32, i32) {
    %c0_i32 = arith.constant 0 : i32
    %c0_i32_0 = arith.constant 0 : i32
    %c0_i32_1 = arith.constant 0 : i32
    return %c0_i32, %c0_i32_0 : i32, i32
  }
  func.func @transform_16(%arg0: i32) -> (i32, i32) {
    %c0_i32 = arith.constant 0 : i32
    %c0_i32_0 = arith.constant 0 : i32
    %c0_i32_1 = arith.constant 0 : i32
    return %c0_i32, %c0_i32_0 : i32, i32
  }
  func.func @transform_17(%arg0: i32) -> (i32, i32, i32) {
    %c0_i32 = arith.constant 0 : i32
    %c0_i32_0 = arith.constant 0 : i32
    %c0_i32_1 = arith.constant 0 : i32
    return %arg0, %c0_i32, %c0_i32_0 : i32, i32, i32
  }
}

</mosaic_0001>

<bundles_post_ra>
// kernel: spectrogram_encoder.1
= control target key start
LH: loop header
LB: loop body
LE: loop exit
PB: predicated region body
PF: predicated region fallthrough
CT: control target
= control target key end

     0   :  { %s8355_s0 = inlined_call_operand.vmem [shape: bf16[2,256,9], index: 0, kind: input, shape index: {}]   ;;  %s8356_s1 = inlined_call_operand.vmem [shape: bf16[9,32], index: 1, kind: input, shape index: {}]   ;;  %s8357_s2 = inlined_call_operand.vmem [shape: f32[1,32], index: 2, kind: input, shape index: {}]   ;;  %s8358_s3 = inlined_call_operand.vmem [shape: f32[1,32], index: 3, kind: input, shape index: {}]   ;;  %s8359_s4 = inlined_call_operand.vmem [shape: bf16[9,32,64], index: 4, kind: input, shape index: {}]   ;;  %s8360_s5 = inlined_call_operand.vmem [shape: f32[1,64], index: 5, kind: input, shape index: {}]   ;;  %s8361_s6 = inlined_call_operand.vmem [shape: f32[1,64], index: 6, kind: input, shape index: {}]   ;;  %s8362_s7 = inlined_call_operand.vmem [shape: bf16[9,64,128], index: 7, kind: input, shape index: {}]   ;;  %s8363_s8 = inlined_call_operand.vmem [shape: f32[1,128], index: 8, kind: input, shape index: {}]   ;;  %s8364_s9 = inlined_call_operand.vmem [shape: f32[1,128], index: 9, kind: input, shape index: {}]   ;;  %s8365_s10 = inlined_call_operand.hbm [shape: bf16[9,128,256], index: 10, kind: input, shape index: {}]   ;;  %s8366_s11 = inlined_call_operand.vmem [shape: f32[1,256], index: 11, kind: input, shape index: {}]   ;;  %s8367_s12 = inlined_call_operand.vmem [shape: f32[1,256], index: 12, kind: input, shape index: {}]   ;;  %s8368_s13 = inlined_call_operand.vmem [shape: bf16[256,256], index: 13, kind: input, shape index: {}]   ;;  %s8369_s14 = inlined_call_operand.vmem [shape: f32[1,256], index: 14, kind: input, shape index: {}]   ;;  %s8370_s15 = inlined_call_operand.vmem [shape: bf16[256,128], index: 15, kind: input, shape index: {}]   ;;  %s8371_s16 = inlined_call_operand.vmem [shape: f32[1,128], index: 16, kind: input, shape index: {}]   ;;  %s8372_s17 = inlined_call_operand.hbm [shape: f32[2,1,128], index: 17, kind: output, shape index: {}]  }
   0x1   :  { %8381 = sst [smem:[#allocation20_spill]] %s8355_s0 }
   0x2   :  { %8382 = sst [smem:[#allocation21_spill]] %s8356_s1 }
   0x3   :  { %22 = vsyncpa [#allocation10], 0 }
   0x4   :  { %23 = vsyncpa [#allocation11], 0 }
   0x5   :  { %25 = vsyncpa [#allocation11 + $0x1], 0  ;;  %s7431_s24 = smov 0   ;;  %s7433_s25 = smov 0  }
   0x6   :  { %s7435_s26 = smov 0   ;;  %s7437_s27 = smov 0  }
   0x7 LB: > { %8383 = sst [smem:[#allocation15_spill]] %s7320_s24  ;;  %s7452_s28 = sadd.s32 4294967295, %s7332_s27   ;;  %s7332_s27 = sphi %s7437_s27, %s8401_s27   ;;  %s7328_s26 = sphi %s7435_s26, %s8403_s26   ;;  %s7324_s25 = sphi %s7433_s25, %s8405_s25   ;;  %s7320_s24 = sphi %s7431_s24, %s8404_s24  }
   0x8   : > { %8384 = sst [smem:[#allocation16_spill]] %s7328_s26  ;;  %s5649_s29 = sadd.s32 4294967294, %s7332_s27  }
   0x9   : > { %s7456_s0 = sadd.s32 1, %s7332_s27   ;;  %s400_s30 = sadd.s32 1, %s7328_s26 }
   0xa   : > { %8385 = sst [smem:[#allocation17_spill]] %s7456_s0  ;;  %s397_s18 = ssub.s32 %s7332_s27, %s7456_s0 }
   0xb   : > { %p410_p0 = scmp.ne.s32.totalorder %s7328_s26, %s7324_s25  ;;  %p398_p1 = scmp.eq.s32.totalorder %s397_s18, 0 }
   0xc   : > { %p411_p2 = scmp.eq.s32.totalorder %s7452_s28, 1  ;;  %p416_p3 = scmp.ne.s32.totalorder %s7324_s25, %s7320_s24 }
   0xd   : > { %p417_p4 = scmp.eq.s32.totalorder %s5649_s29, 1  ;;  %p5650_p7 = scmp.ge.s32.totalorder %s7332_s27, 1 }
   0xe   : > { %s7467_s19 = scalar_select %p398_p1, %s7328_s26, %s400_s30  }
   0xf   : > { %p7469_p5 = por %p411_p2, %p410_p0  ;;  %p7473_p6 = por %p417_p4, %p416_p3 }
  0x10   : > { %8386 = sst [smem:[#allocation18_spill]] %s7467_s19  ;;  %p424_p8 = scmp.lt.s32.totalorder %s7332_s27, 3 }
  0x11   : > { %s8387_s1 = scalar_select %p7469_p5, 1, 0 }
  0x12   : > { %s8388_s20 = scalar_select %p7473_p6, 1, 0 }
  0x13   : > { %p8378_p9 = scmp.eq.s32.totalorder %s7452_s28, 0  ;;  %p7480_p10 = pnand %p5650_p7, %p424_p8 }
  0x14   : > { %8389 = sst [smem:[#allocation19_spill]] %s8388_s20  ;;  %s7334_s22 = smov [#allocation9]  }
  0x15   : > { %s8390_s21 = scalar_select %p7480_p10, 1, 0 }
  0x16   : > { %s463_s23 = sshll.u32 %s7334_s22, 4  ;;  %p6835_p11 = pneg %p7480_p10  ;;  %s464_s23 = int_to_ptr.vmem [resolvable:$true] %s463_s23 }
  0x17   : > { %s7238_s19 = scalar_lea.hbm %s8365_s10, 18432 }
  0x18   : > { %p7488_p12 = pnand %p8378_p9, %p6835_p11  ;;  %p7239_p13 = scmp.ne.s32.totalorder %s8365_s10, %s7238_s19 }
  0x19   : > { %p7245_p3 = scmp.lt.u32.totalorder %s7238_s19, %s8365_s10 }
  0x1a   : > { %p7240_p0 = pneg %p7488_p12 }
  0x1c   : > { %p7241_p1 = pnand %p7240_p0, %p7239_p13 }
  0x1e   : > { %p7242_p2 = pneg %p7241_p1 }
  0x20   : > { %p7247_p4 = pnand %p7245_p3, %p7242_p2 }
  0x22   : > { %7250 = shalt.err (!%p7247_p4)
}
  0x23   : > { %s7251_s24 = scalar_lea.vmem %s464_s23, 18432  ;;  %p7259_p9 = scmp.lt.s32.totalorder %s464_s23, %s464_s23 }
  0x24   : > { %p7252_p7 = scmp.ne.s32.totalorder %s464_s23, %s7251_s24  ;;  %p7260_p6 = scmp.lt.s32.totalorder %s7251_s24, %s7251_s24 }
  0x26   : > { %p7254_p8 = pnand %p7252_p7, %p7240_p0  ;;  %p7261_p5 = por %p7260_p6, %p7259_p9 }
  0x28   : > { %p7255_p11 = pneg %p7254_p8 }
  0x2a   : > { %p7262_p10 = pnand %p7261_p5, %p7255_p11 }
  0x2c   : > { %7265 = shalt.err (!%p7262_p10)
}
  0x2d   : > { %s7335_s26 = smov 128   ;;  %s7336_s0 = smov 8  }
  0x2e   : > { %6838 = dma.hbm_to_vmem [thread:$0]  (!%p7488_p12), %s8365_s10, 18432, %s464_s23, [#allocation10], %s7335_s26, %s7335_s26, %s7336_s0  }
  0x2f   : > { %p8392_p13 = scmp.ne.s32.totalorder %s8390_s21, 0 }
  0x30   : > { %p8393_p1 = scmp.eq.s32.totalorder (!%p8392_p13), %s7452_s28, 0 }
  0x31   : > { %505 = sbr.rel (%p8392_p13) target bundleno = 2332 (0x91c), region = 88 }
  0x38   : > { %7311 = dma.done.wait (%p8393_p1), [#allocation10], 18432   ;;  %p8394_p0 = pmov %p8393_p1 }
  0x39   : > { %vm562_vm0 = vcmask 261120   ;;  %vm766_vm1 = vcmask 1043456   ;;  %v7337_v0 = vmov 0.0   ;;  %p556_p5 = scmp.lt.s32.totalorder %s7452_s28, 1  ;;  %vm767_vm2 = vcmask 1044480   ;;  %s8395_s23 = sld [smem:[#allocation20_spill]] }
  0x3a   : > { %7313 = vsyncadd (%p8394_p0), [#allocation10], 4294948864  ;;  %564 = vst.msk [vmem:[#allocation2 + $0x8] sm:$0xff] %vm562_vm0, %v7337_v0  ;;  %v7338_v1 = vmov 65535   ;;  %vm717_vm3 = vcmask 72704   ;;  %s8396_s0 = sld [smem:[#allocation21_spill]] }
  0x3b   : > { %565 = vst.msk [vmem:[#allocation2 + $0x10] sm:$0xff] %vm562_vm0, %v7337_v0  ;;  %566 = vst.msk [vmem:[#allocation2 + $0x18] sm:$0xff] %vm562_vm0, %v7337_v0  ;;  %v768_v2 = vsel %vm766_vm1, 4294967295, %v7338_v1  ;;  %s557_s24 = scalar_select %p556_p5, %s7452_s28, 1  ;;  %v6901_v11 = vld [vmem:[%s8359_s4 + $0x10] sm:$0xff]   ;;  %v6902_v23 = vld [vmem:[%s8359_s4 + $0x18] sm:$0xff]  }
  0x3c   : > { %567 = vst.msk [vmem:[#allocation2 + $0x20] sm:$0xff] %vm562_vm0, %v7337_v0  ;;  %568 = vst.msk [vmem:[#allocation2 + $0x28] sm:$0xff] %vm562_vm0, %v7337_v0  ;;  %v769_v3 = vsel %vm767_vm2, %v768_v2, 0  ;;  %v7588_v27 = vld [vmem:[%s8359_s4] sm:$0xff]   ;;  %vm585_vm4 = vcmask 523264   ;;  %vm2799_vm5 = vcmask 519168  }
  0x3d   : > { %569 = vst.msk [vmem:[#allocation2 + $0x30] sm:$0xff] %vm562_vm0, %v7337_v0  ;;  %570 = vst.msk [vmem:[#allocation2 + $0x38] sm:$0xff] %vm562_vm0, %v7337_v0  ;;  %s6131_s19 = sshll.u32 %s557_s24, 7  ;;  %v7594_v28 = vld [vmem:[%s8357_s2] ss:$0 sm:$0xff]  ;;  %vm5561_vm6 = vcmask 1040384  }
  0x3e   : > { %571 = vst.msk [vmem:[#allocation2 + $0x40] sm:$0xff] %vm562_vm0, %v7337_v0  ;;  %572 = vst.msk [vmem:[#allocation2 + $0x48] sm:$0xff] %vm562_vm0, %v7337_v0  ;;  %v7599_v30 = vld [vmem:[%s8358_s3] ss:$0 sm:$0xff]  ;;  %s554_s20 = sand.u32 1, %s7324_s25   ;;  %s6128_s21 = sshll.u32 %s7452_s28, 4 }
  0x3f   : > { %573 = vst.msk [vmem:[#allocation2 + $0x50] sm:$0xff] %vm562_vm0, %v7337_v0  ;;  %574 = vst.msk [vmem:[#allocation2 + $0x58] sm:$0xff] %vm562_vm0, %v7337_v0  ;;  %s7541_s29 = scalar_lea.vmem %s8395_s23, %s6131_s19  ;;  %s555_s23 = scalar_lea.vmem [#allocation12], %s554_s20 }
  0x40   : > { %575 = vst.msk [vmem:[#allocation2 + $0x60] sm:$0xff] %vm562_vm0, %v7337_v0  ;;  %576 = vst.msk [vmem:[#allocation2 + $0x68] sm:$0xff] %vm562_vm0, %v7337_v0  ;;  %v6884_v4 = vld [vmem:[%s8396_s0] sm:$0x1f]   ;;  %v6886_v7 = vld [vmem:[%s7541_s29 + $0x8] sm:$0xff]   ;;  %s8313_s0 = scalar_lea.hbm %s8372_s17, %s6128_s21  ;;  %s5570_s30 = scalar_lea.sflag [#allocation11], %s554_s20 }
  0x41   : > { %577 = vst.msk [vmem:[#allocation2 + $0x70] sm:$0xff] %vm562_vm0, %v7337_v0  ;;  %578 = vst.msk [vmem:[#allocation2 + $0x78] sm:$0xff] %vm562_vm0, %v7337_v0  ;;  %v6885_v5 = vld [vmem:[%s7541_s29] sm:$0xff]   ;;  %v771_v6 = vand.u32 %v6884_v4, %v769_v3  ;;  %v6887_v8 = vld [vmem:[%s7541_s29 + $0x10] sm:$0xff]   ;;  %p8397_p9 = scmp.ne.s32.totalorder %s8387_s1, 0  ;;  %s7340_s28 = smov [#allocation12]  }
  0x42   : > { %579 = vst.msk [vmem:[#allocation2 + $0x80] sm:$0xff] %vm562_vm0, %v7337_v0  ;;  %580 = vst.msk [vmem:[#allocation2 + $0x88] sm:$0xff] %vm562_vm0, %v7337_v0  ;;  %6317 = vmatprep.mubr.msk.bf16.mxu1 %vm717_vm3, %v6885_v5  ;;  %v6888_v9 = vld [vmem:[%s7541_s29 + $0x18] sm:$0xff]   ;;  %v6889_v10 = vld [vmem:[%s7541_s29 + $0x20] sm:$0xff]   ;;  %s7270_s24 = sshll.u32 %s7340_s28, 4  ;;  %s7271_s24 = int_to_ptr.vmem [resolvable:$false] %s7270_s24 }
  0x43   : > { %581 = vst.msk [vmem:[#allocation2 + $0x90] sm:$0xff] %vm562_vm0, %v7337_v0  ;;  %582 = vst.msk [vmem:[#allocation2 + $0x98] sm:$0xff] %vm562_vm0, %v7337_v0  ;;  %6315 = vmatprep.subr.bf16.mxu1 %v771_v6  ;;  %v6890_v12 = vld [vmem:[%s7541_s29 + $0x28] sm:$0xff]   ;;  %v6891_v13 = vld [vmem:[%s7541_s29 + $0x30] sm:$0xff]   ;;  %s7272_s19 = scalar_lea.vmem %s7271_s24, 32 }
  0x44   : > { %583 = vst.msk [vmem:[#allocation2 + $0xa0] sm:$0xff] %vm562_vm0, %v7337_v0  ;;  %584 = vst.msk [vmem:[#allocation2 + $0xa8] sm:$0xff] %vm562_vm0, %v7337_v0  ;;  %6316 = vmatpush3.bf16.msra.mxu1 %v771_v6  ;;  %v6892_v14 = vld [vmem:[%s7541_s29 + $0x38] sm:$0xff]   ;;  %v6893_v15 = vld [vmem:[%s7541_s29 + $0x40] sm:$0xff]  }
  0x45   : > { %593 = vst [vmem:[#allocation4] sm:$0xff] %v7337_v0  ;;  %594 = vst [vmem:[#allocation4 + $0x8] sm:$0xff] %v7337_v0  ;;  %6349 = vmatprep.subr.bf16.mxu1 %v6901_v11  ;;  %v6894_v16 = vld [vmem:[%s7541_s29 + $0x48] sm:$0xff]   ;;  %v6895_v17 = vld [vmem:[%s7541_s29 + $0x50] sm:$0xff]  }
  0x46   : > { %595 = vst [vmem:[#allocation4 + $0x10] sm:$0xff] %v7337_v0  ;;  %596 = vst [vmem:[#allocation4 + $0x18] sm:$0xff] %v7337_v0  ;;  %v6896_v18 = vld [vmem:[%s7541_s29 + $0x58] sm:$0xff]   ;;  %v6897_v19 = vld [vmem:[%s7541_s29 + $0x60] sm:$0xff]  }
  0x47   : > { %597 = vst [vmem:[#allocation4 + $0x20] sm:$0xff] %v7337_v0  ;;  %6318 = vmatmul.mubr.msk.bf16.vlgmr.msra.gmra.mrb[0].mxu1 %vm717_vm3, %v6886_v7  ;;  %v6898_v20 = vld [vmem:[%s7541_s29 + $0x68] sm:$0xff]   ;;  %v6899_v21 = vld [vmem:[%s7541_s29 + $0x70] sm:$0xff]   ;;  %v6900_v22 = vld [vmem:[%s7541_s29 + $0x78] sm:$0xff]   ;;  %s5582_s29 = sshll.u32 %s555_s23, 4  ;;  %s8315_s29 = int_to_ptr.vmem [resolvable:$true] %s5582_s29 }
  0x48   : > { %6321 = vmatprep.mubr.msk.bf16.mxu1 %vm717_vm3, %v6887_v8  ;;  %6350 = vmatpush3.bf16.msra.mxu1 %v6901_v11  ;;  %v1198_v24 = vld [vmem:[#allocation2 + $0x10] sm:$0xff]  ;;  %v1199_v25 = vld [vmem:[#allocation2 + $0x18] sm:$0xff]  ;;  %s7266_s18 = scalar_lea.vmem %s8315_s29, 16  ;;  %p7273_p2 = scmp.lt.s32.totalorder %s8315_s29, %s7271_s24 }
  0x49   : > { %6351 = vmatprep.subr.bf16.mxu1 %v6902_v23  ;;  %v1213_v26 = vpack.c.bf16 %v1199_v25, %v1198_v24  ;;  %p7267_p6 = scmp.ne.s32.totalorder %s8315_s29, %s7266_s18  ;;  %p7274_p3 = scmp.lt.s32.totalorder %s7272_s19, %s7266_s18 }
  0x4b   : > { %p7268_p10 = pnand %p7267_p6, %p8397_p9  ;;  %p7275_p4 = por %p7274_p3, %p7273_p2 }
  0x4c   : > { %6352 = vmatpush3.bf16.msra.mxu1 %v6902_v23 }
  0x4d   : > { %6369 = vmatprep.subr.bf16.mxu1 %v7588_v27  ;;  %p7269_p12 = pneg %p7268_p10 }
  0x4f   : > { %6322 = vmatmul.mubr.msk.bf16.gmra.mrb[4].mxu1 %vm717_vm3, %v6888_v9  ;;  %p7276_p7 = pnand %p7275_p4, %p7269_p12 }
  0x50   : > { %6325 = vmatprep.mubr.msk.bf16.mxu1 %vm717_vm3, %v6889_v10 }
  0x57   : > { %6326 = vmatmul.mubr.msk.bf16.gmra.mrb[8].mxu1 %vm717_vm3, %v6890_v12 }
  0x58   : > { %6329 = vmatprep.mubr.msk.bf16.mxu1 %vm717_vm3, %v6891_v13 }
  0x5f   : > { %6330 = vmatmul.mubr.msk.bf16.gmra.mrb[12].mxu1 %vm717_vm3, %v6892_v14 }
  0x60   : > { %6333 = vmatprep.mubr.msk.bf16.mxu1 %vm717_vm3, %v6893_v15 }
  0x67   : > { %6334 = vmatmul.mubr.msk.bf16.gmra.mrb[16].mxu1 %vm717_vm3, %v6894_v16 }
  0x68   : > { %6337 = vmatprep.mubr.msk.bf16.mxu1 %vm717_vm3, %v6895_v17 }
  0x6f   : > { %6338 = vmatmul.mubr.msk.bf16.gmra.mrb[20].mxu1 %vm717_vm3, %v6896_v18 }
  0x70   : > { %6341 = vmatprep.mubr.msk.bf16.mxu1 %vm717_vm3, %v6897_v19 }
  0x77   : > { %6342 = vmatmul.mubr.msk.bf16.gmra.mrb[24].mxu1 %vm717_vm3, %v6898_v20 }
  0x78   : > { %6345 = vmatprep.mubr.msk.bf16.mxu1 %vm717_vm3, %v6899_v21 }
  0x7f   : > { %6346 = vmatmul.mubr.msk.bf16.gmra.mrb[28].mxu1 %vm717_vm3, %v6900_v22 }
  0x80   : > { %6353 = vmatprep.mubr.msk.bf16.mxu1 %vm562_vm0, %v1213_v26 }
 0x11a   : > { %v6319_v29 = vpop.f32.mrb[0].mxu1 }
 0x11b   : > { %v943_v31 = vmul.f32 %v6319_v29, %v7594_v28  ;;  %v807_v32 = vpop.f32.mrb[1].mxu1 }
 0x11c   : > { %v941_v33 = vmul.f32 %v7594_v28, %v807_v32  ;;  %v6320_v34 = vpop.f32.mrb[2].mxu1 }
 0x11d   : > { %v982_v35 = vadd.f32 %v7599_v30, %v943_v31  ;;  %v944_v36 = vmul.f32 %v6320_v34, %v7594_v28  ;;  %v810_v37 = vpop.f32.mrb[3].mxu1 }
 0x11e   : > { %v980_v38 = vadd.f32 %v7599_v30, %v941_v33  ;;  %v942_v39 = vmul.f32 %v7594_v28, %v810_v37 }
 0x11f   : > { %v1014_v40 = vmax.f32 %v982_v35, 0.0  ;;  %v983_v41 = vadd.f32 %v7599_v30, %v944_v36 }
 0x120   : > { %v1012_v42 = vmax.f32 %v980_v38, 0.0  ;;  %v981_v43 = vadd.f32 %v7599_v30, %v942_v39  ;;  %v1201_v38 = vld [vmem:[#allocation2 + $0x28] sm:$0xff] }
 0x121   : > { %1046 = vst.msk [vmem:[#allocation5 + $0x10] sm:$0xff] %vm562_vm0, %v1014_v40  ;;  %v1015_v44 = vmax.f32 %v983_v41, 0.0 }
 0x122   : > { %1044 = vst.msk [vmem:[#allocation5] sm:$0xff] %vm562_vm0, %v1012_v42  ;;  %v1013_v45 = vmax.f32 %v981_v43, 0.0  ;;  %v6323_v46 = vpop.f32.mrb[4].mxu1 }
 0x123   : > { %1047 = vst.msk [vmem:[#allocation5 + $0x18] sm:$0xff] %vm562_vm0, %v1015_v44  ;;  %v947_v47 = vmul.f32 %v6323_v46, %v7594_v28  ;;  %v823_v48 = vpop.f32.mrb[5].mxu1 }
 0x124   : > { %1045 = vst.msk [vmem:[#allocation5 + $0x8] sm:$0xff] %vm562_vm0, %v1013_v45  ;;  %v945_v49 = vmul.f32 %v7594_v28, %v823_v48  ;;  %v6324_v50 = vpop.f32.mrb[6].mxu1  ;;  %v6904_v48 = vld [vmem:[%s8359_s4 + $0x8] sm:$0xff]  }
 0x125   : > { %v986_v51 = vadd.f32 %v7599_v30, %v947_v47  ;;  %v948_v52 = vmul.f32 %v6324_v50, %v7594_v28  ;;  %v826_v53 = vpop.f32.mrb[7].mxu1 }
 0x126   : > { %v984_v54 = vadd.f32 %v7599_v30, %v945_v49  ;;  %v946_v55 = vmul.f32 %v7594_v28, %v826_v53 }
 0x127   : > { %v1018_v56 = vmax.f32 %v986_v51, 0.0  ;;  %v987_v57 = vadd.f32 %v7599_v30, %v948_v52 }
 0x128   : > { %v1016_v58 = vmax.f32 %v984_v54, 0.0  ;;  %v985_v59 = vadd.f32 %v7599_v30, %v946_v55 }
 0x129   : > { %1050 = vst.msk [vmem:[#allocation5 + $0x30] sm:$0xff] %vm562_vm0, %v1018_v56  ;;  %v1019_v60 = vmax.f32 %v987_v57, 0.0 }
 0x12a   : > { %v1081_v61 = vld [vmem:[#allocation5 + $0x10] ss:$2 sm:$0xff]  ;;  %v1083_v62 = vld [vmem:[#allocation5 + $0x11] ss:$2 sm:$0xff]  ;;  %1048 = vst.msk [vmem:[#allocation5 + $0x20] sm:$0xff] %vm562_vm0, %v1016_v58  ;;  %v1017_v63 = vmax.f32 %v985_v59, 0.0 }
 0x12b   : > { %v6327_v0 = vpop.f32.mrb[8].mxu1  ;;  %v1084_v1 = vmax.f32 %v1081_v61, %v1083_v62  ;;  %v1076_v2 = vld [vmem:[#allocation5] ss:$2 sm:$0xff]  ;;  %v1078_v3 = vld [vmem:[#allocation5 + $0x1] ss:$2 sm:$0xff]  ;;  %1051 = vst.msk [vmem:[#allocation5 + $0x38] sm:$0xff] %vm562_vm0, %v1019_v60 }
 0x12c   : > { %v951_v4 = vmul.f32 %v6327_v0, %v7594_v28  ;;  %v839_v5 = vpop.f32.mrb[9].mxu1  ;;  %v1079_v6 = vmax.f32 %v1076_v2, %v1078_v3  ;;  %1049 = vst.msk [vmem:[#allocation5 + $0x28] sm:$0xff] %vm562_vm0, %v1017_v63  ;;  %v7664_v62 = vld [vmem:[%s8359_s4 + $0x20] sm:$0xff]   ;;  %v1203_v2 = vld [vmem:[#allocation2 + $0x38] sm:$0xff] }
 0x12d   : > { %v949_v7 = vmul.f32 %v7594_v28, %v839_v5  ;;  %v6328_v8 = vpop.f32.mrb[10].mxu1 }
 0x12e   : > { %v990_v9 = vadd.f32 %v7599_v30, %v951_v4  ;;  %v952_v10 = vmul.f32 %v6328_v8, %v7594_v28  ;;  %v842_v11 = vpop.f32.mrb[11].mxu1  ;;  %v1085_v12 = vmax.f32 %v1079_v6, %v1084_v1 }
 0x12f   : > { %v988_v13 = vadd.f32 %v7599_v30, %v949_v7  ;;  %v950_v14 = vmul.f32 %v7594_v28, %v842_v11 }
 0x130   : > { %v1022_v15 = vmax.f32 %v990_v9, 0.0  ;;  %v991_v16 = vadd.f32 %v7599_v30, %v952_v10  ;;  %1086 = vst.msk [vmem:[#allocation2 + $0x20] sm:$0xff] %vm562_vm0, %v1085_v12 }
 0x131   : > { %v1020_v17 = vmax.f32 %v988_v13, 0.0  ;;  %v989_v18 = vadd.f32 %v7599_v30, %v950_v14 }
 0x132   : > { %1054 = vst.msk [vmem:[#allocation5 + $0x50] sm:$0xff] %vm562_vm0, %v1022_v15  ;;  %v1023_v19 = vmax.f32 %v991_v16, 0.0  ;;  %v1093_v20 = vld [vmem:[#allocation5 + $0x30] ss:$2 sm:$0xff]  ;;  %v1095_v21 = vld [vmem:[#allocation5 + $0x31] ss:$2 sm:$0xff] }
 0x133   : > { %1052 = vst.msk [vmem:[#allocation5 + $0x40] sm:$0xff] %vm562_vm0, %v1020_v17  ;;  %v1021_v22 = vmax.f32 %v989_v18, 0.0  ;;  %v6331_v23 = vpop.f32.mrb[12].mxu1  ;;  %v1096_v24 = vmax.f32 %v1093_v20, %v1095_v21  ;;  %v1088_v25 = vld [vmem:[#allocation5 + $0x20] ss:$2 sm:$0xff] }
 0x134   : > { %v1090_v26 = vld [vmem:[#allocation5 + $0x21] ss:$2 sm:$0xff]  ;;  %1055 = vst.msk [vmem:[#allocation5 + $0x58] sm:$0xff] %vm562_vm0, %v1023_v19  ;;  %v955_v29 = vmul.f32 %v6331_v23, %v7594_v28  ;;  %v855_v31 = vpop.f32.mrb[13].mxu1 }
 0x135   : > { %v1091_v32 = vmax.f32 %v1088_v25, %v1090_v26  ;;  %1053 = vst.msk [vmem:[#allocation5 + $0x48] sm:$0xff] %vm562_vm0, %v1021_v22  ;;  %v953_v33 = vmul.f32 %v7594_v28, %v855_v31  ;;  %v6332_v34 = vpop.f32.mrb[14].mxu1 }
 0x136   : > { %v994_v35 = vadd.f32 %v7599_v30, %v955_v29  ;;  %v956_v36 = vmul.f32 %v6332_v34, %v7594_v28  ;;  %v858_v37 = vpop.f32.mrb[15].mxu1  ;;  %v1205_v29 = vld [vmem:[#allocation2 + $0x48] sm:$0xff] }
 0x137   : > { %v1097_v39 = vmax.f32 %v1091_v32, %v1096_v24  ;;  %v992_v40 = vadd.f32 %v7599_v30, %v953_v33  ;;  %v954_v41 = vmul.f32 %v7594_v28, %v858_v37  ;;  %v1200_v44 = vld [vmem:[#allocation2 + $0x20] sm:$0xff] }
 0x138   : > { %v1026_v42 = vmax.f32 %v994_v35, 0.0  ;;  %v995_v43 = vadd.f32 %v7599_v30, %v956_v36  ;;  %v7647_v47 = vpack.c.bf16 %v1201_v38, %v1200_v44 }
 0x139   : > { %1098 = vst.msk [vmem:[#allocation2 + $0x30] sm:$0xff] %vm562_vm0, %v1097_v39  ;;  %v1024_v45 = vmax.f32 %v992_v40, 0.0  ;;  %v993_v46 = vadd.f32 %v7599_v30, %v954_v41 }
 0x13a   : > { %1058 = vst.msk [vmem:[#allocation5 + $0x70] sm:$0xff] %vm562_vm0, %v1026_v42  ;;  %v1027_v49 = vmax.f32 %v995_v43, 0.0  ;;  %v6335_v53 = vpop.f32.mrb[16].mxu1  ;;  %6354 = vmatmul.mubr.msk.bf16.vlgmr.msra.gmra.mrb[32].mxu1 %vm562_vm0, %v7647_v47 }
 0x13b   : > { %v1105_v50 = vld [vmem:[#allocation5 + $0x50] ss:$2 sm:$0xff]  ;;  %v1107_v51 = vld [vmem:[#allocation5 + $0x51] ss:$2 sm:$0xff]  ;;  %1056 = vst.msk [vmem:[#allocation5 + $0x60] sm:$0xff] %vm562_vm0, %v1024_v45  ;;  %v1025_v52 = vmax.f32 %v993_v46, 0.0  ;;  %v959_v57 = vmul.f32 %v6335_v53, %v7594_v28  ;;  %6370 = vmatpush3.bf16.msra.mxu1 %v7588_v27 }
 0x13c   : > { %v1108_v54 = vmax.f32 %v1105_v50, %v1107_v51  ;;  %v1100_v55 = vld [vmem:[#allocation5 + $0x40] ss:$2 sm:$0xff]  ;;  %v1102_v56 = vld [vmem:[#allocation5 + $0x41] ss:$2 sm:$0xff]  ;;  %1059 = vst.msk [vmem:[#allocation5 + $0x78] sm:$0xff] %vm562_vm0, %v1027_v49  ;;  %v871_v58 = vpop.f32.mrb[17].mxu1  ;;  %6371 = vmatprep.subr.bf16.mxu1 %v6904_v48 }
 0x13d   : > { %v1103_v59 = vmax.f32 %v1100_v55, %v1102_v56  ;;  %1057 = vst.msk [vmem:[#allocation5 + $0x68] sm:$0xff] %vm562_vm0, %v1025_v52  ;;  %v957_v60 = vmul.f32 %v7594_v28, %v871_v58  ;;  %v6336_v61 = vpop.f32.mrb[18].mxu1  ;;  %v998_v63 = vadd.f32 %v7599_v30, %v959_v57  ;;  %v1207_v57 = vld [vmem:[#allocation2 + $0x58] sm:$0xff] }
 0x13e   : > { %v960_v0 = vmul.f32 %v6336_v61, %v7594_v28  ;;  %v874_v1 = vpop.f32.mrb[19].mxu1 }
 0x13f   : > { %v1109_v3 = vmax.f32 %v1103_v59, %v1108_v54  ;;  %v996_v27 = vadd.f32 %v7599_v30, %v957_v60  ;;  %v958_v4 = vmul.f32 %v7594_v28, %v874_v1  ;;  %v1030_v5 = vmax.f32 %v998_v63, 0.0  ;;  %6372 = vmatpush3.bf16.msra.mxu1 %v6904_v48 }
 0x140   : > { %v999_v6 = vadd.f32 %v7599_v30, %v960_v0  ;;  %v1202_v7 = vld [vmem:[#allocation2 + $0x30] sm:$0xff]  ;;  %6389 = vmatprep.subr.bf16.mxu1 %v7664_v62 }
 0x141   : > { %1110 = vst.msk [vmem:[#allocation2 + $0x40] sm:$0xff] %vm562_vm0, %v1109_v3  ;;  %v1028_v8 = vmax.f32 %v996_v27, 0.0  ;;  %v997_v9 = vadd.f32 %v7599_v30, %v958_v4  ;;  %v7673_v10 = vpack.c.bf16 %v1203_v2, %v1202_v7  ;;  %1062 = vst.msk [vmem:[#allocation5 + $0x90] sm:$0xff] %vm562_vm0, %v1030_v5 }
 0x142   : > { %v1031_v11 = vmax.f32 %v999_v6, 0.0  ;;  %v6339_v15 = vpop.f32.mrb[20].mxu1 }
 0x143   : > { %v1117_v12 = vld [vmem:[#allocation5 + $0x70] ss:$2 sm:$0xff]  ;;  %v1119_v13 = vld [vmem:[#allocation5 + $0x71] ss:$2 sm:$0xff]  ;;  %1060 = vst.msk [vmem:[#allocation5 + $0x80] sm:$0xff] %vm562_vm0, %v1028_v8  ;;  %v1029_v14 = vmax.f32 %v997_v9, 0.0  ;;  %6357 = vmatprep.mubr.msk.bf16.mxu1 %vm562_vm0, %v7673_v10  ;;  %v963_v19 = vmul.f32 %v6339_v15, %v7594_v28 }
 0x144   : > { %v1120_v16 = vmax.f32 %v1117_v12, %v1119_v13  ;;  %v1112_v17 = vld [vmem:[#allocation5 + $0x60] ss:$2 sm:$0xff]  ;;  %v1114_v18 = vld [vmem:[#allocation5 + $0x61] ss:$2 sm:$0xff]  ;;  %1063 = vst.msk [vmem:[#allocation5 + $0x98] sm:$0xff] %vm562_vm0, %v1031_v11  ;;  %v887_v20 = vpop.f32.mrb[21].mxu1 }
 0x145   : > { %v1115_v21 = vmax.f32 %v1112_v17, %v1114_v18  ;;  %1061 = vst.msk [vmem:[#allocation5 + $0x88] sm:$0xff] %vm562_vm0, %v1029_v14  ;;  %v961_v22 = vmul.f32 %v7594_v28, %v887_v20  ;;  %v6340_v23 = vpop.f32.mrb[22].mxu1  ;;  %v1002_v24 = vadd.f32 %v7599_v30, %v963_v19  ;;  %v1209_v20 = vld [vmem:[#allocation2 + $0x68] sm:$0xff] }
 0x146   : > { %v964_v25 = vmul.f32 %v6340_v23, %v7594_v28  ;;  %v890_v26 = vpop.f32.mrb[23].mxu1 }
 0x147   : > { %v1121_v31 = vmax.f32 %v1115_v21, %v1120_v16  ;;  %v1000_v32 = vadd.f32 %v7599_v30, %v961_v22  ;;  %v962_v33 = vmul.f32 %v7594_v28, %v890_v26  ;;  %v1034_v34 = vmax.f32 %v1002_v24, 0.0 }
 0x148   : > { %v1003_v35 = vadd.f32 %v7599_v30, %v964_v25  ;;  %v1204_v36 = vld [vmem:[#allocation2 + $0x40] sm:$0xff] }
 0x149   : > { %1122 = vst.msk [vmem:[#allocation2 + $0x50] sm:$0xff] %vm562_vm0, %v1121_v31  ;;  %v1032_v37 = vmax.f32 %v1000_v32, 0.0  ;;  %v1001_v38 = vadd.f32 %v7599_v30, %v962_v33  ;;  %v7691_v39 = vpack.c.bf16 %v1205_v29, %v1204_v36  ;;  %1066 = vst.msk [vmem:[#allocation5 + $0xb0] sm:$0xff] %vm562_vm0, %v1034_v34 }
 0x14a   : > { %v1035_v40 = vmax.f32 %v1003_v35, 0.0  ;;  %v6343_v44 = vpop.f32.mrb[24].mxu1 }
 0x14b   : > { %v1129_v41 = vld [vmem:[#allocation5 + $0x90] ss:$2 sm:$0xff]  ;;  %v1131_v42 = vld [vmem:[#allocation5 + $0x91] ss:$2 sm:$0xff]  ;;  %1064 = vst.msk [vmem:[#allocation5 + $0xa0] sm:$0xff] %vm562_vm0, %v1032_v37  ;;  %v1033_v43 = vmax.f32 %v1001_v38, 0.0  ;;  %6358 = vmatmul.mubr.msk.bf16.gmra.mrb[36].mxu1 %vm562_vm0, %v7691_v39  ;;  %v967_v49 = vmul.f32 %v6343_v44, %v7594_v28 }
 0x14c   : > { %v1132_v45 = vmax.f32 %v1129_v41, %v1131_v42  ;;  %v1124_v46 = vld [vmem:[#allocation5 + $0x80] ss:$2 sm:$0xff]  ;;  %v1126_v48 = vld [vmem:[#allocation5 + $0x81] ss:$2 sm:$0xff]  ;;  %1067 = vst.msk [vmem:[#allocation5 + $0xb8] sm:$0xff] %vm562_vm0, %v1035_v40  ;;  %v903_v50 = vpop.f32.mrb[25].mxu1 }
 0x14d   : > { %v1127_v51 = vmax.f32 %v1124_v46, %v1126_v48  ;;  %1065 = vst.msk [vmem:[#allocation5 + $0xa8] sm:$0xff] %vm562_vm0, %v1033_v43  ;;  %v965_v52 = vmul.f32 %v7594_v28, %v903_v50  ;;  %v6344_v53 = vpop.f32.mrb[26].mxu1  ;;  %v1006_v54 = vadd.f32 %v7599_v30, %v967_v49 }
 0x14e   : > { %v968_v55 = vmul.f32 %v6344_v53, %v7594_v28  ;;  %v906_v56 = vpop.f32.mrb[27].mxu1 }
 0x14f   : > { %v1133_v58 = vmax.f32 %v1127_v51, %v1132_v45  ;;  %v1004_v59 = vadd.f32 %v7599_v30, %v965_v52  ;;  %v966_v60 = vmul.f32 %v7594_v28, %v906_v56  ;;  %v1038_v61 = vmax.f32 %v1006_v54, 0.0  ;;  %v1171_v51 = vld [vmem:[#allocation2 + $0xf] sm:$0xff]  ;;  %v1172_v52 = vld [vmem:[#allocation2 + $0x17] sm:$0xff] }
 0x150   : > { %v1007_v63 = vadd.f32 %v7599_v30, %v968_v55  ;;  %v1206_v0 = vld [vmem:[#allocation2 + $0x50] sm:$0xff]  ;;  %v1186_v55 = vpack.c.bf16 %v1172_v52, %v1171_v51  ;;  %v6912_v52 = vld [vmem:[%s8359_s4 + $0x58] sm:$0xff]  }
 0x151   : > { %1134 = vst.msk [vmem:[#allocation2 + $0x60] sm:$0xff] %vm562_vm0, %v1133_v58  ;;  %v1036_v1 = vmax.f32 %v1004_v59, 0.0  ;;  %v1005_v2 = vadd.f32 %v7599_v30, %v966_v60  ;;  %v7708_v3 = vpack.c.bf16 %v1207_v57, %v1206_v0  ;;  %1070 = vst.msk [vmem:[#allocation5 + $0xd0] sm:$0xff] %vm562_vm0, %v1038_v61  ;;  %v1173_v57 = vld [vmem:[#allocation2 + $0x1f] sm:$0xff]  ;;  %v1174_v58 = vld [vmem:[#allocation2 + $0x27] sm:$0xff] }
 0x152   : > { %v1039_v27 = vmax.f32 %v1007_v63, 0.0  ;;  %v6347_v7 = vpop.f32.mrb[28].mxu1  ;;  %v1175_v59 = vld [vmem:[#allocation2 + $0x2f] sm:$0xff]  ;;  %v1176_v60 = vld [vmem:[#allocation2 + $0x37] sm:$0xff]  ;;  %v7745_v61 = vpack.c.bf16 %v1174_v58, %v1173_v57 }
 0x153   : > { %v1141_v4 = vld [vmem:[#allocation5 + $0xb0] ss:$2 sm:$0xff]  ;;  %v1143_v5 = vld [vmem:[#allocation5 + $0xb1] ss:$2 sm:$0xff]  ;;  %1068 = vst.msk [vmem:[#allocation5 + $0xc0] sm:$0xff] %vm562_vm0, %v1036_v1  ;;  %v1037_v6 = vmax.f32 %v1005_v2, 0.0  ;;  %6361 = vmatprep.mubr.msk.bf16.mxu1 %vm562_vm0, %v7708_v3  ;;  %v971_v12 = vmul.f32 %v6347_v7, %v7594_v28  ;;  %v7750_v0 = vpack.c.bf16 %v1176_v60, %v1175_v59 }
 0x154   : > { %v1144_v8 = vmax.f32 %v1141_v4, %v1143_v5  ;;  %v1136_v9 = vld [vmem:[#allocation5 + $0xa0] ss:$2 sm:$0xff]  ;;  %v1138_v11 = vld [vmem:[#allocation5 + $0xa1] ss:$2 sm:$0xff]  ;;  %1071 = vst.msk [vmem:[#allocation5 + $0xd8] sm:$0xff] %vm562_vm0, %v1039_v27  ;;  %v919_v13 = vpop.f32.mrb[29].mxu1 }
 0x155   : > { %v1139_v14 = vmax.f32 %v1136_v9, %v1138_v11  ;;  %1069 = vst.msk [vmem:[#allocation5 + $0xc8] sm:$0xff] %vm562_vm0, %v1037_v6  ;;  %v969_v15 = vmul.f32 %v7594_v28, %v919_v13  ;;  %v6348_v16 = vpop.f32.mrb[30].mxu1  ;;  %v1010_v17 = vadd.f32 %v7599_v30, %v971_v12  ;;  %v6906_v63 = vld [vmem:[%s8359_s4 + $0x28] sm:$0xff]   ;;  %v6907_v1 = vld [vmem:[%s8359_s4 + $0x30] sm:$0xff]   ;;  %v1177_v2 = vld [vmem:[#allocation2 + $0x3f] sm:$0xff] }
 0x156   : > { %v972_v18 = vmul.f32 %v6348_v16, %v7594_v28  ;;  %v922_v19 = vpop.f32.mrb[31].mxu1  ;;  %v1178_v27 = vld [vmem:[#allocation2 + $0x47] sm:$0xff]  ;;  %v1179_v4 = vld [vmem:[#allocation2 + $0x4f] sm:$0xff]  ;;  %v1180_v5 = vld [vmem:[#allocation2 + $0x57] sm:$0xff] }
 0x157   : > { %v1145_v21 = vmax.f32 %v1139_v14, %v1144_v8  ;;  %v1008_v22 = vadd.f32 %v7599_v30, %v969_v15  ;;  %v970_v23 = vmul.f32 %v7594_v28, %v922_v19  ;;  %v1042_v24 = vmax.f32 %v1010_v17, 0.0  ;;  %v1490_v15 = vld [vmem:[#allocation2 + $0x11] sm:$0xff]  ;;  %v1491_v16 = vld [vmem:[#allocation2 + $0x19] sm:$0xff]  ;;  %v1493_v19 = vld [vmem:[#allocation2 + $0x29] sm:$0xff] }
 0x158   : > { %v1011_v25 = vadd.f32 %v7599_v30, %v972_v18  ;;  %v1208_v26 = vld [vmem:[#allocation2 + $0x60] sm:$0xff]  ;;  %v7760_v6 = vpack.c.bf16 %v1178_v27, %v1177_v2  ;;  %v7762_v7 = vpack.c.bf16 %v1180_v5, %v1179_v4  ;;  %v1505_v18 = vpack.c.bf16 %v1491_v16, %v1490_v15  ;;  %v7859_v58 = vld [vmem:[#allocation4] sm:$0xff]  ;;  %v6915_v59 = vld [vmem:[%s8359_s4 + $0x70] sm:$0xff]  }
 0x159   : > { %1146 = vst.msk [vmem:[#allocation2 + $0x70] sm:$0xff] %vm562_vm0, %v1145_v21  ;;  %v1040_v29 = vmax.f32 %v1008_v22, 0.0  ;;  %v1009_v31 = vadd.f32 %v7599_v30, %v970_v23  ;;  %v7725_v32 = vpack.c.bf16 %v1209_v20, %v1208_v26  ;;  %1074 = vst.msk [vmem:[#allocation5 + $0xf0] sm:$0xff] %vm562_vm0, %v1042_v24  ;;  %v1211_v30 = vld [vmem:[#allocation2 + $0x78] sm:$0xff]  ;;  %v1182_v8 = vld [vmem:[#allocation2 + $0x67] sm:$0xff] }
 0x15a   : > { %v1043_v33 = vmax.f32 %v1011_v25, 0.0  ;;  %v1495_v20 = vld [vmem:[#allocation2 + $0x39] sm:$0xff]  ;;  %v1492_v21 = vld [vmem:[#allocation2 + $0x21] sm:$0xff]  ;;  %v1494_v23 = vld [vmem:[#allocation2 + $0x31] sm:$0xff]  ;;  %586 = vst.msk [vmem:[#allocation3] sm:$0xff] %vm585_vm4, %v7859_v58 }
 0x15b   : > { %v1153_v34 = vld [vmem:[#allocation5 + $0xd0] ss:$2 sm:$0xff]  ;;  %v1155_v35 = vld [vmem:[#allocation5 + $0xd1] ss:$2 sm:$0xff]  ;;  %1072 = vst.msk [vmem:[#allocation5 + $0xe0] sm:$0xff] %vm562_vm0, %v1040_v29  ;;  %v1041_v36 = vmax.f32 %v1009_v31, 0.0  ;;  %6362 = vmatmul.mubr.msk.bf16.gmra.mrb[40].mxu1 %vm562_vm0, %v7725_v32  ;;  %v7778_v22 = vpack.c.bf16 %v1493_v19, %v1492_v21  ;;  %v7783_v25 = vpack.c.bf16 %v1495_v20, %v1494_v23 }
 0x15c   : > { %v1156_v28 = vmax.f32 %v1153_v34, %v1155_v35  ;;  %v1148_v37 = vld [vmem:[#allocation5 + $0xc0] ss:$2 sm:$0xff]  ;;  %v1150_v38 = vld [vmem:[#allocation5 + $0xc1] ss:$2 sm:$0xff]  ;;  %1075 = vst.msk [vmem:[#allocation5 + $0xf8] sm:$0xff] %vm562_vm0, %v1043_v33  ;;  %v6909_v26 = vld [vmem:[%s8359_s4 + $0x40] sm:$0xff]  }
 0x15d   : > { %v1151_v40 = vmax.f32 %v1148_v37, %v1150_v38  ;;  %1073 = vst.msk [vmem:[#allocation5 + $0xe8] sm:$0xff] %vm562_vm0, %v1041_v36  ;;  %v6908_v24 = vld [vmem:[%s8359_s4 + $0x38] sm:$0xff]   ;;  %v1497_v29 = vld [vmem:[#allocation2 + $0x49] sm:$0xff]  ;;  %v1496_v33 = vld [vmem:[#allocation2 + $0x41] sm:$0xff] }
 0x15e   : > { %v1499_v31 = vld [vmem:[#allocation2 + $0x59] sm:$0xff]  ;;  %v7792_v34 = vpack.c.bf16 %v1497_v29, %v1496_v33  ;;  %v1498_v35 = vld [vmem:[#allocation2 + $0x51] sm:$0xff]  ;;  %v1500_v38 = vld [vmem:[#allocation2 + $0x61] sm:$0xff]  ;;  %587 = vst.msk [vmem:[#allocation3 + $0x8] sm:$0xff] %vm585_vm4, %v7859_v58 }
 0x15f   : > { %v1157_v41 = vmax.f32 %v1151_v40, %v1156_v28  ;;  %v7794_v36 = vpack.c.bf16 %v1499_v31, %v1498_v35  ;;  %588 = vst.msk [vmem:[#allocation3 + $0x10] sm:$0xff] %vm585_vm4, %v7859_v58  ;;  %589 = vst.msk [vmem:[#allocation3 + $0x18] sm:$0xff] %vm585_vm4, %v7859_v58  ;;  %v6916_v2 = vld [vmem:[%s8359_s4 + $0x78] sm:$0xff]   ;;  %v6917_v27 = vld [vmem:[%s8359_s4 + $0x80] sm:$0xff]  }
 0x160   : > { %v1210_v42 = vld [vmem:[#allocation2 + $0x70] sm:$0xff]  ;;  %590 = vst.msk [vmem:[#allocation3 + $0x20] sm:$0xff] %vm585_vm4, %v7859_v58  ;;  %591 = vst.msk [vmem:[#allocation3 + $0x28] sm:$0xff] %vm585_vm4, %v7859_v58  ;;  %v2204_v5 = vld [vmem:[#allocation2 + $0x9f] sm:$0xff] }
 0x161   : > { %1158 = vst.msk [vmem:[#allocation2 + $0x80] sm:$0xff] %vm562_vm0, %v1157_v41  ;;  %v7734_v43 = vpack.c.bf16 %v1211_v30, %v1210_v42  ;;  %v1183_v9 = vld [vmem:[#allocation2 + $0x6f] sm:$0xff]  ;;  %v1184_v11 = vld [vmem:[#allocation2 + $0x77] sm:$0xff]  ;;  %v7958_v15 = vld [vmem:[%s8362_s7] sm:$0xff]  }
 0x162   : > { %v7770_v13 = vpack.c.bf16 %v1184_v11, %v1183_v9  ;;  %v1501_v28 = vld [vmem:[#allocation2 + $0x69] sm:$0xff]  ;;  %v1502_v30 = vld [vmem:[#allocation2 + $0x71] sm:$0xff]  ;;  %592 = vst.msk [vmem:[#allocation3 + $0x30] sm:$0xff] %vm585_vm4, %v7859_v58  ;;  %v6919_v11 = vld [vmem:[%s8362_s7 + $0x20] sm:$0xff]  }
 0x163   : > { %v1165_v44 = vld [vmem:[#allocation5 + $0xf0] ss:$2 sm:$0xff]  ;;  %v1167_v45 = vld [vmem:[#allocation5 + $0xf1] ss:$2 sm:$0xff]  ;;  %6365 = vmatprep.mubr.msk.bf16.mxu1 %vm562_vm0, %v7734_v43  ;;  %v7800_v40 = vpack.c.bf16 %v1501_v28, %v1500_v38  ;;  %6529 = vmatprep.subr.bf16.mxu0 %v6919_v11 }
 0x164   : > { %v1168_v46 = vmax.f32 %v1165_v44, %v1167_v45  ;;  %v1160_v48 = vld [vmem:[#allocation5 + $0xe0] ss:$2 sm:$0xff]  ;;  %v1162_v49 = vld [vmem:[#allocation5 + $0xe1] ss:$2 sm:$0xff]  ;;  %v6910_v45 = vld [vmem:[%s8359_s4 + $0x48] sm:$0xff]   ;;  %6530 = vmatpush3.bf16.msra.mxu0 %v6919_v11 }
 0x165   : > { %v1163_v50 = vmax.f32 %v1160_v48, %v1162_v49  ;;  %v5814_v16 = vld [vmem:[%s8360_s5] ss:$0 sm:$0xff] }
 0x167   : > { %v1169_v53 = vmax.f32 %v1163_v50, %v1168_v46  ;;  %v6911_v46 = vld [vmem:[%s8359_s4 + $0x50] sm:$0xff]  }
 0x168   : > { %v7738_v54 = vld [vmem:[#allocation2 + $0x80] sm:$0xff] }
 0x169   : > { %1170 = vst.msk [vmem:[#allocation2 + $0x90] sm:$0xff] %vm562_vm0, %v1169_v53  ;;  %v1220_v56 = vpack.c.bf16 %v7738_v54, %v7738_v54  ;;  %v1185_v14 = vld [vmem:[#allocation2 + $0x7f] sm:$0xff]  ;;  %v1678_v48 = vld [vmem:[#allocation2 + $0x87] sm:$0xff] }
 0x16a   : > { %v1193_v17 = vpack.c.bf16 %v1185_v14, %v1185_v14  ;;  %v1503_v37 = vld [vmem:[#allocation2 + $0x79] sm:$0xff]  ;;  %v1504_v42 = vld [vmem:[#allocation2 + $0x81] sm:$0xff]  ;;  %v7825_v49 = vpack.c.bf16 %v1678_v48, %v1185_v14 }
 0x16b   : > { %6366 = vmatmul.mubr.msk.bf16.gmra.mrb[44].mxu1 %vm562_vm0, %v1220_v56  ;;  %v7802_v41 = vpack.c.bf16 %v1503_v37, %v1502_v30  ;;  %v1512_v44 = vpack.c.bf16 %v1504_v42, %v1504_v42  ;;  %v6913_v53 = vld [vmem:[%s8359_s4 + $0x60] sm:$0xff]   ;;  %v6922_v14 = vld [vmem:[%s8362_s7 + $0x38] sm:$0xff]  }
 0x16c   : > { %6373 = vmatprep.mubr.msk.bf16.mxu1 %vm562_vm0, %v1186_v55 }
 0x170   : > { %v7831_v50 = vld [vmem:[#allocation2 + $0x8f] sm:$0xff] }
 0x171   : > { %v1687_v51 = vpack.c.bf16 %v7831_v50, %v7831_v50  ;;  %v1854_v56 = vld [vmem:[#allocation2 + $0x90] sm:$0xff] }
 0x172   : > { %v1862_v57 = vpack.c.bf16 %v1854_v56, %v1854_v56  ;;  %v2028_v60 = vld [vmem:[#allocation2 + $0x89] sm:$0xff] }
 0x173   : > { %6374 = vmatmul.mubr.msk.bf16.vlgmr.msra.gmra.mrb[32].mxu1 %vm562_vm0, %v7745_v61 }
 0x174   : > { %6390 = vmatpush3.bf16.msra.mxu1 %v7664_v62  ;;  %6377 = vmatprep.mubr.msk.bf16.mxu1 %vm562_vm0, %v7750_v0  ;;  %v1181_v62 = vld [vmem:[#allocation2 + $0x5f] sm:$0xff] }
 0x175   : > { %6391 = vmatprep.subr.bf16.mxu1 %v6906_v63  ;;  %v7768_v12 = vpack.c.bf16 %v1182_v8, %v1181_v62  ;;  %v2379_v8 = vld [vmem:[#allocation2 + $0xa0] sm:$0xff] }
 0x178   : > { %6392 = vmatpush3.bf16.msra.mxu1 %v6906_v63  ;;  %v2029_v63 = vld [vmem:[#allocation2 + $0x91] sm:$0xff] }
 0x179   : > { %6409 = vmatprep.subr.bf16.mxu1 %v6907_v1 }
 0x17b   : > { %6378 = vmatmul.mubr.msk.bf16.gmra.mrb[36].mxu1 %vm562_vm0, %v7760_v6 }
 0x17c   : > { %6381 = vmatprep.mubr.msk.bf16.mxu1 %vm562_vm0, %v7762_v7 }
 0x183   : > { %6382 = vmatmul.mubr.msk.bf16.gmra.mrb[40].mxu1 %vm562_vm0, %v7768_v12 }
 0x184   : > { %6385 = vmatprep.mubr.msk.bf16.mxu1 %vm562_vm0, %v7770_v13 }
 0x18b   : > { %6386 = vmatmul.mubr.msk.bf16.gmra.mrb[44].mxu1 %vm562_vm0, %v1193_v17 }
 0x18c   : > { %6393 = vmatprep.mubr.msk.bf16.mxu1 %vm562_vm0, %v1505_v18  ;;  %v7967_v18 = vld [vmem:[%s8361_s6] ss:$0 sm:$0xff] }
 0x193   : > { %6394 = vmatmul.mubr.msk.bf16.vlgmr.msra.gmra.mrb[32].mxu1 %vm562_vm0, %v7778_v22 }
 0x194   : > { %6410 = vmatpush3.bf16.msra.mxu1 %v6907_v1  ;;  %6397 = vmatprep.mubr.msk.bf16.mxu1 %vm562_vm0, %v7783_v25  ;;  %v2037_v1 = vpack.c.bf16 %v2029_v63, %v2029_v63 }
 0x195   : > { %6411 = vmatprep.subr.bf16.mxu1 %v6908_v24 }
 0x198   : > { %6412 = vmatpush3.bf16.msra.mxu1 %v6908_v24 }
 0x199   : > { %6429 = vmatprep.subr.bf16.mxu1 %v6909_v26 }
 0x19b   : > { %6398 = vmatmul.mubr.msk.bf16.gmra.mrb[36].mxu1 %vm562_vm0, %v7792_v34 }
 0x19c   : > { %6401 = vmatprep.mubr.msk.bf16.mxu1 %vm562_vm0, %v7794_v36 }
 0x1a3   : > { %6402 = vmatmul.mubr.msk.bf16.gmra.mrb[40].mxu1 %vm562_vm0, %v7800_v40 }
 0x1a4   : > { %6405 = vmatprep.mubr.msk.bf16.mxu1 %vm562_vm0, %v7802_v41 }
 0x1ab   : > { %6406 = vmatmul.mubr.msk.bf16.gmra.mrb[44].mxu1 %vm562_vm0, %v1512_v44 }
 0x1ac   : > { %6413 = vmatprep.mubr.msk.bf16.mxu1 %vm562_vm0, %v7745_v61  ;;  %v2036_v61 = vpack.c.bf16 %v2028_v60, %v1504_v42 }
 0x1b3   : > { %6414 = vmatmul.mubr.msk.bf16.vlgmr.msra.gmra.mrb[32].mxu1 %vm562_vm0, %v7750_v0 }
 0x1b4   : > { %6430 = vmatpush3.bf16.msra.mxu1 %v6909_v26  ;;  %6417 = vmatprep.mubr.msk.bf16.mxu1 %vm562_vm0, %v7760_v6 }
 0x1b5   : > { %6431 = vmatprep.subr.bf16.mxu1 %v6910_v45 }
 0x1b8   : > { %6432 = vmatpush3.bf16.msra.mxu1 %v6910_v45 }
 0x1b9   : > { %6449 = vmatprep.subr.bf16.mxu1 %v6911_v46 }
 0x1bb   : > { %6418 = vmatmul.mubr.msk.bf16.gmra.mrb[36].mxu1 %vm562_vm0, %v7762_v7 }
 0x1bc   : > { %6421 = vmatprep.mubr.msk.bf16.mxu1 %vm562_vm0, %v7768_v12 }
 0x1c3   : > { %6422 = vmatmul.mubr.msk.bf16.gmra.mrb[40].mxu1 %vm562_vm0, %v7770_v13 }
 0x1c4   : > { %6425 = vmatprep.mubr.msk.bf16.mxu1 %vm562_vm0, %v7825_v49 }
 0x1cb   : > { %6426 = vmatmul.mubr.msk.bf16.gmra.mrb[44].mxu1 %vm562_vm0, %v1687_v51 }
 0x1cc   : > { %6433 = vmatprep.mubr.msk.bf16.mxu1 %vm562_vm0, %v7647_v47  ;;  %v1853_v47 = vld [vmem:[#allocation2 + $0x88] sm:$0xff] }
 0x1cd   : > { %v1861_v55 = vpack.c.bf16 %v1853_v47, %v7738_v54  ;;  %v6914_v54 = vld [vmem:[%s8359_s4 + $0x68] sm:$0xff]  }
 0x1d3   : > { %6434 = vmatmul.mubr.msk.bf16.vlgmr.msra.gmra.mrb[32].mxu1 %vm562_vm0, %v7673_v10 }
 0x1d4   : > { %6450 = vmatpush3.bf16.msra.mxu1 %v6911_v46  ;;  %6437 = vmatprep.mubr.msk.bf16.mxu1 %vm562_vm0, %v7691_v39 }
 0x1d5   : > { %6451 = vmatprep.subr.bf16.mxu1 %v6912_v52 }
 0x1d8   : > { %6452 = vmatpush3.bf16.msra.mxu1 %v6912_v52 }
 0x1d9   : > { %6469 = vmatprep.subr.bf16.mxu1 %v6913_v53 }
 0x1db   : > { %6438 = vmatmul.mubr.msk.bf16.gmra.mrb[36].mxu1 %vm562_vm0, %v7708_v3 }
 0x1dc   : > { %6441 = vmatprep.mubr.msk.bf16.mxu1 %vm562_vm0, %v7725_v32 }
 0x1e3   : > { %6442 = vmatmul.mubr.msk.bf16.gmra.mrb[40].mxu1 %vm562_vm0, %v7734_v43 }
 0x1e4   : > { %6445 = vmatprep.mubr.msk.bf16.mxu1 %vm562_vm0, %v1861_v55 }
 0x1eb   : > { %6446 = vmatmul.mubr.msk.bf16.gmra.mrb[44].mxu1 %vm562_vm0, %v1862_v57 }
 0x1ec   : > { %6453 = vmatprep.mubr.msk.bf16.mxu1 %vm562_vm0, %v7778_v22 }
 0x1f3   : > { %6454 = vmatmul.mubr.msk.bf16.vlgmr.msra.gmra.mrb[32].mxu1 %vm562_vm0, %v7783_v25 }
 0x1f4   : > { %6470 = vmatpush3.bf16.msra.mxu1 %v6913_v53  ;;  %6457 = vmatprep.mubr.msk.bf16.mxu1 %vm562_vm0, %v7792_v34 }
 0x1f5   : > { %6471 = vmatprep.subr.bf16.mxu1 %v6914_v54 }
 0x1f8   : > { %6472 = vmatpush3.bf16.msra.mxu1 %v6914_v54 }
 0x1f9   : > { %6489 = vmatprep.subr.bf16.mxu1 %v6915_v59 }
 0x1fb   : > { %6458 = vmatmul.mubr.msk.bf16.gmra.mrb[36].mxu1 %vm562_vm0, %v7794_v36 }
 0x1fc   : > { %6461 = vmatprep.mubr.msk.bf16.mxu1 %vm562_vm0, %v7800_v40 }
 0x203   : > { %6462 = vmatmul.mubr.msk.bf16.gmra.mrb[40].mxu1 %vm562_vm0, %v7802_v41 }
 0x204   : > { %6465 = vmatprep.mubr.msk.bf16.mxu1 %vm562_vm0, %v2036_v61 }
 0x20b   : > { %6466 = vmatmul.mubr.msk.bf16.gmra.mrb[44].mxu1 %vm562_vm0, %v2037_v1 }
 0x20c   : > { %6473 = vmatprep.mubr.msk.bf16.mxu1 %vm562_vm0, %v7750_v0  ;;  %v2203_v0 = vld [vmem:[#allocation2 + $0x97] sm:$0xff] }
 0x20d   : > { %v2211_v4 = vpack.c.bf16 %v2203_v0, %v7831_v50 }
 0x213   : > { %6474 = vmatmul.mubr.msk.bf16.vlgmr.msra.gmra.mrb[32].mxu1 %vm562_vm0, %v7760_v6  ;;  %v2212_v6 = vpack.c.bf16 %v2204_v5, %v2204_v5 }
 0x214   : > { %6490 = vmatpush3.bf16.msra.mxu1 %v6915_v59  ;;  %6477 = vmatprep.mubr.msk.bf16.mxu1 %vm562_vm0, %v7762_v7  ;;  %v6918_v7 = vld [vmem:[%s8359_s4 + $0x88] sm:$0xff]  }
 0x215   : > { %6491 = vmatprep.subr.bf16.mxu1 %v6916_v2 }
 0x218   : > { %6492 = vmatpush3.bf16.msra.mxu1 %v6916_v2  ;;  %v2851_v2 = vld [vmem:[#allocation3 + $0x8] sm:$0xff] }
 0x219   : > { %6509 = vmatprep.subr.bf16.mxu1 %v6917_v27 }
 0x21b   : > { %6478 = vmatmul.mubr.msk.bf16.gmra.mrb[36].mxu1 %vm562_vm0, %v7768_v12  ;;  %v6920_v12 = vld [vmem:[%s8362_s7 + $0x28] sm:$0xff]  }
 0x21c   : > { %6481 = vmatprep.mubr.msk.bf16.mxu1 %vm562_vm0, %v7770_v13  ;;  %6531 = vmatprep.subr.bf16.mxu0 %v6920_v12  ;;  %v6921_v13 = vld [vmem:[%s8362_s7 + $0x30] sm:$0xff]  }
 0x21d   : > { %6532 = vmatpush3.bf16.msra.mxu0 %v6920_v12 }
 0x21e   : > { %6533 = vmatprep.subr.bf16.mxu0 %v6921_v13 }
 0x221   : > { %6534 = vmatpush3.bf16.msra.mxu0 %v6921_v13 }
 0x222   : > { %6535 = vmatprep.subr.bf16.mxu0 %v6922_v14 }
 0x223   : > { %6482 = vmatmul.mubr.msk.bf16.gmra.mrb[40].mxu1 %vm562_vm0, %v7825_v49 }
 0x224   : > { %6485 = vmatprep.mubr.msk.bf16.mxu1 %vm562_vm0, %v2211_v4 }
 0x225   : > { %6536 = vmatpush3.bf16.msra.mxu0 %v6922_v14 }
 0x226   : > { %6541 = vmatprep.subr.bf16.mxu0 %v7958_v15 }
 0x22b   : > { %6486 = vmatmul.mubr.msk.bf16.gmra.mrb[44].mxu1 %vm562_vm0, %v2212_v6 }
 0x22c   : > { %6493 = vmatprep.mubr.msk.bf16.mxu1 %vm562_vm0, %v7673_v10  ;;  %v2378_v10 = vld [vmem:[#allocation2 + $0x98] sm:$0xff] }
 0x22d   : > { %v2386_v62 = vpack.c.bf16 %v2378_v10, %v1854_v56 }
 0x233   : > { %6494 = vmatmul.mubr.msk.bf16.vlgmr.msra.gmra.mrb[32].mxu1 %vm562_vm0, %v7691_v39  ;;  %v2387_v39 = vpack.c.bf16 %v2379_v8, %v2379_v8 }
 0x234   : > { %6510 = vmatpush3.bf16.msra.mxu1 %v6917_v27  ;;  %6497 = vmatprep.mubr.msk.bf16.mxu1 %vm562_vm0, %v7708_v3  ;;  %v2553_v3 = vld [vmem:[#allocation2 + $0x99] sm:$0xff] }
 0x235   : > { %6511 = vmatprep.subr.bf16.mxu1 %v6918_v7 }
 0x238   : > { %6512 = vmatpush3.bf16.msra.mxu1 %v6918_v7 }
 0x23b   : > { %6498 = vmatmul.mubr.msk.bf16.gmra.mrb[36].mxu1 %vm562_vm0, %v7725_v32  ;;  %v2561_v32 = vpack.c.bf16 %v2553_v3, %v2029_v63 }
 0x23c   : > { %6501 = vmatprep.mubr.msk.bf16.mxu1 %vm562_vm0, %v7734_v43  ;;  %v2554_v43 = vld [vmem:[#allocation2 + $0xa1] sm:$0xff] }
 0x23d   : > { %v2562_v9 = vpack.c.bf16 %v2554_v43, %v2554_v43 }
 0x243   : > { %6502 = vmatmul.mubr.msk.bf16.gmra.mrb[40].mxu1 %vm562_vm0, %v1861_v55 }
 0x244   : > { %6505 = vmatprep.mubr.msk.bf16.mxu1 %vm562_vm0, %v2386_v62 }
 0x24b   : > { %6506 = vmatmul.mubr.msk.bf16.gmra.mrb[44].mxu1 %vm562_vm0, %v2387_v39 }
 0x24c   : > { %6513 = vmatprep.mubr.msk.bf16.mxu1 %vm562_vm0, %v7783_v25 }
 0x253   : > { %6514 = vmatmul.mubr.msk.bf16.vlgmr.msra.gmra.mrb[32].mxu1 %vm562_vm0, %v7792_v34 }
 0x254   : > { %6517 = vmatprep.mubr.msk.bf16.mxu1 %vm562_vm0, %v7794_v36 }
 0x25b   : > { %6518 = vmatmul.mubr.msk.bf16.gmra.mrb[36].mxu1 %vm562_vm0, %v7800_v40 }
 0x25c   : > { %6521 = vmatprep.mubr.msk.bf16.mxu1 %vm562_vm0, %v7802_v41 }
 0x263   : > { %6522 = vmatmul.mubr.msk.bf16.gmra.mrb[40].mxu1 %vm562_vm0, %v2036_v61 }
 0x264   : > { %6525 = vmatprep.mubr.msk.bf16.mxu1 %vm562_vm0, %v2561_v32 }
 0x26b   : > { %6526 = vmatmul.mubr.msk.bf16.gmra.mrb[44].mxu1 %vm562_vm0, %v2562_v9 }
 0x326   : > { %v6515_v17 = vpop.f32.mrb[32].mxu1 }
 0x327   : > { %v2724_v19 = vmul.f32 %v6515_v17, %v5814_v16  ;;  %v2638_v20 = vpop.f32.mrb[33].mxu1 }
 0x328   : > { %v2722_v21 = vmul.f32 %v5814_v16, %v2638_v20  ;;  %v6516_v22 = vpop.f32.mrb[34].mxu1 }
 0x329   : > { %v2746_v23 = vadd.f32 %v7967_v18, %v2724_v19  ;;  %v2641_v24 = vpop.f32.mrb[35].mxu1 }
 0x32a   : > { %v2744_v25 = vadd.f32 %v7967_v18, %v2722_v21 }
 0x32b   : > { %v2761_v26 = vmax.f32 %v2746_v23, 0.0 }
 0x32c   : > { %v2759_v29 = vmax.f32 %v2744_v25, 0.0 }
 0x32d   : > { %2776 = vst.msk [vmem:[#allocation6 + $0x10] sm:$0xff] %vm585_vm4, %v2761_v26 }
 0x32e   : > { %2774 = vst.msk [vmem:[#allocation6] sm:$0xff] %vm585_vm4, %v2759_v29  ;;  %v6519_v31 = vpop.f32.mrb[36].mxu1  ;;  %v2837_v29 = vld [vmem:[#allocation3 + $0x7] sm:$0xff] }
 0x32f   : > { %v2728_v33 = vmul.f32 %v6519_v31, %v5814_v16  ;;  %v2654_v34 = vpop.f32.mrb[37].mxu1 }
 0x330   : > { %v2726_v35 = vmul.f32 %v5814_v16, %v2654_v34  ;;  %v6520_v36 = vpop.f32.mrb[38].mxu1 }
 0x331   : > { %v2750_v28 = vadd.f32 %v7967_v18, %v2728_v33  ;;  %v2657_v37 = vpop.f32.mrb[39].mxu1  ;;  %v6924_v36 = vld [vmem:[%s8362_s7 + $0x8] sm:$0xff]  }
 0x332   : > { %v2748_v38 = vadd.f32 %v7967_v18, %v2726_v35  ;;  %v6925_v37 = vld [vmem:[%s8362_s7 + $0x10] sm:$0xff]  }
 0x333   : > { %v2765_v40 = vmax.f32 %v2750_v28, 0.0 }
 0x334   : > { %v2794_v30 = vld [vmem:[#allocation6 + $0x10] ss:$2 sm:$0xf]  ;;  %v2796_v41 = vld [vmem:[#allocation6 + $0x11] ss:$2 sm:$0xf] }
 0x335   : > { %v2797_v42 = vmax.f32 %v2794_v30, %v2796_v41  ;;  %v2789_v44 = vld [vmem:[#allocation6] ss:$2 sm:$0xf]  ;;  %v2791_v45 = vld [vmem:[#allocation6 + $0x1] ss:$2 sm:$0xf] }
 0x336   : > { %2780 = vst.msk [vmem:[#allocation6 + $0x30] sm:$0xff] %vm585_vm4, %v2765_v40  ;;  %v2792_v46 = vmax.f32 %v2789_v44, %v2791_v45  ;;  %v2763_v48 = vmax.f32 %v2748_v38, 0.0  ;;  %v6523_v49 = vpop.f32.mrb[40].mxu1  ;;  %v6926_v38 = vld [vmem:[%s8362_s7 + $0x18] sm:$0xff]   ;;  %v6927_v40 = vld [vmem:[%s8362_s7 + $0x40] sm:$0xff]   ;;  %v6928_v45 = vld [vmem:[%s8362_s7 + $0x48] sm:$0xff]  }
 0x337   : > { %v2732_v50 = vmul.f32 %v6523_v49, %v5814_v16  ;;  %v2670_v51 = vpop.f32.mrb[41].mxu1  ;;  %v6930_v49 = vld [vmem:[%s8362_s7 + $0x58] sm:$0xff]  }
 0x338   : > { %2778 = vst.msk [vmem:[#allocation6 + $0x20] sm:$0xff] %vm585_vm4, %v2763_v48  ;;  %v2730_v52 = vmul.f32 %v5814_v16, %v2670_v51  ;;  %v6524_v53 = vpop.f32.mrb[42].mxu1  ;;  %v2798_v47 = vmax.f32 %v2792_v46, %v2797_v42  ;;  %v6929_v48 = vld [vmem:[%s8362_s7 + $0x50] sm:$0xff]  }
 0x339   : > { %v2754_v55 = vadd.f32 %v7967_v18, %v2732_v50  ;;  %v2673_v56 = vpop.f32.mrb[43].mxu1  ;;  %v6931_v50 = vld [vmem:[%s8362_s7 + $0x60] sm:$0xff]  }
 0x33a   : > { %v2752_v57 = vadd.f32 %v7967_v18, %v2730_v52  ;;  %2800 = vst.msk [vmem:[#allocation3 + $0x10] sm:$0xf] %vm2799_vm5, %v2798_v47  ;;  %v6932_v47 = vld [vmem:[%s8362_s7 + $0x68] sm:$0xff]   ;;  %v6933_v56 = vld [vmem:[%s8362_s7 + $0x70] sm:$0xff]  }
 0x33b   : > { %v2769_v54 = vmax.f32 %v2754_v55, 0.0 }
 0x33c   : > { %v2767_v61 = vmax.f32 %v2752_v57, 0.0  ;;  %v6934_v57 = vld [vmem:[%s8362_s7 + $0x78] sm:$0xff]  }
 0x33d   : > { %v2807_v59 = vld [vmem:[#allocation6 + $0x30] ss:$2 sm:$0xf]  ;;  %v2809_v60 = vld [vmem:[#allocation6 + $0x31] ss:$2 sm:$0xf] }
 0x33e   : > { %2784 = vst.msk [vmem:[#allocation6 + $0x50] sm:$0xff] %vm585_vm4, %v2769_v54  ;;  %v2810_v63 = vmax.f32 %v2807_v59, %v2809_v60  ;;  %v6527_v1 = vpop.f32.mrb[44].mxu1  ;;  %2782 = vst.msk [vmem:[#allocation6 + $0x40] sm:$0xff] %vm585_vm4, %v2767_v61  ;;  %v6935_v54 = vld [vmem:[%s8362_s7 + $0x80] sm:$0xff]  }
 0x33f   : > { %v2802_v27 = vld [vmem:[#allocation6 + $0x20] ss:$2 sm:$0xf]  ;;  %v2804_v0 = vld [vmem:[#allocation6 + $0x21] ss:$2 sm:$0xf]  ;;  %v2736_v4 = vmul.f32 %v6527_v1, %v5814_v16 }
 0x340   : > { %v2805_v5 = vmax.f32 %v2802_v27, %v2804_v0  ;;  %v2686_v6 = vpop.f32.mrb[45].mxu1  ;;  %v6938_v27 = vld [vmem:[%s8362_s7 + $0x98] sm:$0xff]   ;;  %v6939_v0 = vld [vmem:[%s8362_s7 + $0xa0] sm:$0xff]  }
 0x341   : > { %v2758_v7 = vadd.f32 %v7967_v18, %v2736_v4  ;;  %v2734_v10 = vmul.f32 %v5814_v16, %v2686_v6  ;;  %v6528_v62 = vpop.f32.mrb[46].mxu1  ;;  %v7983_v8 = vld [vmem:[#allocation3 + $0x10] sm:$0xff] }
 0x342   : > { %v2811_v39 = vmax.f32 %v2805_v5, %v2810_v63  ;;  %v2689_v3 = vpop.f32.mrb[47].mxu1  ;;  %v2855_v32 = vpack.c.bf16 %v7983_v8, %v2851_v2  ;;  %v2838_v31 = vld [vmem:[#allocation3 + $0xf] sm:$0xff]  ;;  %v6936_v63 = vld [vmem:[%s8362_s7 + $0x88] sm:$0xff]   ;;  %v6937_v2 = vld [vmem:[%s8362_s7 + $0x90] sm:$0xff]  }
 0x343   : > { %v2773_v43 = vmax.f32 %v2758_v7, 0.0  ;;  %v2756_v9 = vadd.f32 %v7967_v18, %v2734_v10  ;;  %v2841_v28 = vpack.c.bf16 %v2838_v31, %v2837_v29  ;;  %v3024_v44 = vld [vmem:[#allocation3 + $0x9] sm:$0xff]  ;;  %v6940_v7 = vld [vmem:[%s8362_s7 + $0xa8] sm:$0xff]   ;;  %v6941_v62 = vld [vmem:[%s8362_s7 + $0xb0] sm:$0xff]  }
 0x344   : > { %6537 = vmatprep.mubr.msk.bf16.mxu0 %vm585_vm4, %v2855_v32  ;;  %2812 = vst.msk [vmem:[#allocation3 + $0x18] sm:$0xf] %vm2799_vm5, %v2811_v39  ;;  %v6943_v39 = vld [vmem:[%s8362_s7 + $0xc0] sm:$0xff]   ;;  %v6952_v29 = vld [vmem:[%s8362_s7 + $0x108] sm:$0xff]  }
 0x345   : > { %v2819_v11 = vld [vmem:[#allocation6 + $0x50] ss:$2 sm:$0xf]  ;;  %v2821_v12 = vld [vmem:[#allocation6 + $0x51] ss:$2 sm:$0xf] }
 0x346   : > { %v2822_v13 = vmax.f32 %v2819_v11, %v2821_v12  ;;  %2788 = vst.msk [vmem:[#allocation6 + $0x70] sm:$0xff] %vm585_vm4, %v2773_v43  ;;  %v2771_v14 = vmax.f32 %v2756_v9, 0.0  ;;  %v2814_v16 = vld [vmem:[#allocation6 + $0x40] ss:$2 sm:$0xf]  ;;  %v6944_v9 = vld [vmem:[%s8362_s7 + $0xc8] sm:$0xff]  }
 0x347   : > { %v2816_v17 = vld [vmem:[#allocation6 + $0x41] ss:$2 sm:$0xf] }
 0x348   : > { %v2817_v19 = vmax.f32 %v2814_v16, %v2816_v17  ;;  %2786 = vst.msk [vmem:[#allocation6 + $0x60] sm:$0xff] %vm585_vm4, %v2771_v14  ;;  %v6945_v12 = vld [vmem:[%s8362_s7 + $0xd0] sm:$0xff]   ;;  %v6947_v14 = vld [vmem:[%s8362_s7 + $0xe0] sm:$0xff]  }
 0x349   : > { %v3419_v17 = vld [vmem:[#allocation3 + $0x2f] sm:$0xf] }
 0x34a   : > { %v2823_v20 = vmax.f32 %v2817_v19, %v2822_v13  ;;  %v6946_v13 = vld [vmem:[%s8362_s7 + $0xd8] sm:$0xff]  }
 0x34b   : > { %v7992_v33 = vld [vmem:[#allocation3 + $0x18] sm:$0xff] }
 0x34c   : > { %2824 = vst.msk [vmem:[#allocation3 + $0x20] sm:$0xf] %vm2799_vm5, %v2823_v20  ;;  %v8011_v30 = vld [vmem:[#allocation3 + $0x11] sm:$0xff]  ;;  %v3224_v1 = vpack.c.bf16 %v7992_v33, %v7983_v8  ;;  %v6942_v8 = vld [vmem:[%s8362_s7 + $0xb8] sm:$0xff]  }
 0x34d   : > { %v2831_v21 = vld [vmem:[#allocation6 + $0x70] ss:$2 sm:$0xf]  ;;  %v2833_v18 = vld [vmem:[#allocation6 + $0x71] ss:$2 sm:$0xf]  ;;  %v3028_v46 = vpack.c.bf16 %v8011_v30, %v3024_v44 }
 0x34e   : > { %v2834_v22 = vmax.f32 %v2831_v21, %v2833_v18  ;;  %v8013_v41 = vld [vmem:[#allocation3 + $0x17] sm:$0xff]  ;;  %v6949_v18 = vld [vmem:[%s8362_s7 + $0xf0] sm:$0xff]   ;;  %v6964_v44 = vld [vmem:[#allocation9 + $0xb0] ss:$8 sps:$4 sm:$0xff]  }
 0x34f   : > { %v2826_v23 = vld [vmem:[#allocation6 + $0x60] ss:$2 sm:$0xf]  ;;  %v2828_v24 = vld [vmem:[#allocation6 + $0x61] ss:$2 sm:$0xf]  ;;  %v3126_v55 = vpack.c.bf16 %v8013_v41, %v2838_v31 }
 0x350   : > { %v2829_v25 = vmax.f32 %v2826_v23, %v2828_v24  ;;  %v6948_v20 = vld [vmem:[%s8362_s7 + $0xe8] sm:$0xff]   ;;  %v6951_v23 = vld [vmem:[%s8362_s7 + $0x100] sm:$0xff]  }
 0x352   : > { %v2835_v26 = vmax.f32 %v2829_v25, %v2834_v22  ;;  %v6950_v22 = vld [vmem:[%s8362_s7 + $0xf8] sm:$0xff]   ;;  %v3517_v25 = vld [vmem:[#allocation3 + $0x30] sm:$0xf] }
 0x353   : > { %v2854_v34 = vld [vmem:[#allocation3 + $0x20] sm:$0xf] }
 0x354   : > { %2836 = vst.msk [vmem:[#allocation3 + $0x28] sm:$0xf] %vm2799_vm5, %v2835_v26  ;;  %v2856_v35 = vpack.c.bf16 %v2854_v34, %v7992_v33  ;;  %v8031_v51 = vld [vmem:[#allocation3 + $0x19] sm:$0xff]  ;;  %v3027_v52 = vld [vmem:[#allocation3 + $0x21] sm:$0xf]  ;;  %v6954_v34 = vld [vmem:[%s8362_s7 + $0x118] sm:$0xff]  }
 0x355   : > { %v3029_v53 = vpack.c.bf16 %v3027_v52, %v8031_v51  ;;  %v3124_v60 = vld [vmem:[#allocation3 + $0x1f] sm:$0xff]  ;;  %v3322_v10 = vpack.c.bf16 %v8031_v51, %v8011_v30  ;;  %v6978_v52 = vld [vmem:[#allocation9 + $0xf4] ss:$8 sps:$4 sm:$0xff]  }
 0x356   : > { %6538 = vmatmul.mubr.msk.bf16.vlgmr.msra.gmra.mrb[0].mxu0 %vm585_vm4, %v2856_v35  ;;  %v3222_v5 = vld [vmem:[#allocation3 + $0x20] sm:$0xff]  ;;  %v3420_v11 = vpack.c.bf16 %v3124_v60, %v8013_v41 }
 0x357   : > { %6542 = vmatpush3.bf16.msra.mxu0 %v7958_v15  ;;  %6549 = vmatprep.mubr.msk.bf16.mxu0 %vm585_vm4, %v2841_v28  ;;  %v2840_v15 = vld [vmem:[#allocation3 + $0x1f] sm:$0xf]  ;;  %v3518_v21 = vpack.c.bf16 %v3222_v5, %v7992_v33  ;;  %v3615_v28 = vld [vmem:[#allocation3 + $0x31] sm:$0xf] }
 0x358   : > { %6543 = vmatprep.subr.bf16.mxu0 %v6924_v36  ;;  %v2842_v42 = vpack.c.bf16 %v2840_v15, %v8013_v41  ;;  %v6953_v33 = vld [vmem:[%s8362_s7 + $0x110] sm:$0xff]   ;;  %v6958_v15 = vld [vmem:[#allocation9 + $0x90] ss:$8 sps:$4 sm:$0xff]  }
 0x359   : > { %v6957_v35 = vld [vmem:[#allocation9 + $0x84] ss:$8 sps:$4 sm:$0xff]   ;;  %v6961_v41 = vld [vmem:[#allocation9 + $0xa0] ss:$8 sps:$4 sm:$0xff]  }
 0x35a   : > { %v6963_v30 = vld [vmem:[#allocation9 + $0xa4] ss:$8 sps:$4 sm:$0xff]  }
 0x35b   : > { %6544 = vmatpush3.bf16.msra.mxu0 %v6924_v36  ;;  %v3125_v59 = vld [vmem:[#allocation3 + $0x27] sm:$0xf] }
 0x35c   : > { %6545 = vmatprep.subr.bf16.mxu0 %v6925_v37  ;;  %v3127_v61 = vpack.c.bf16 %v3125_v59, %v3124_v60  ;;  %v3223_v4 = vld [vmem:[#allocation3 + $0x28] sm:$0xf] }
 0x35d   : > { %v3225_v6 = vpack.c.bf16 %v3223_v4, %v3222_v5  ;;  %v3320_v3 = vld [vmem:[#allocation3 + $0x21] sm:$0xff]  ;;  %v3321_v32 = vld [vmem:[#allocation3 + $0x29] sm:$0xf] }
 0x35e   : > { %v3323_v43 = vpack.c.bf16 %v3321_v32, %v3320_v3  ;;  %v3418_v16 = vld [vmem:[#allocation3 + $0x27] sm:$0xff]  ;;  %v3616_v31 = vpack.c.bf16 %v3320_v3, %v8031_v51 }
 0x35f   : > { %6546 = vmatpush3.bf16.msra.mxu0 %v6925_v37  ;;  %v3421_v19 = vpack.c.bf16 %v3419_v17, %v3418_v16  ;;  %v3516_v24 = vld [vmem:[#allocation3 + $0x28] sm:$0xff]  ;;  %v6955_v37 = vld [vmem:[#allocation9 + $0x80] ss:$8 sps:$4 sm:$0xff]   ;;  %v6975_v51 = vld [vmem:[#allocation9 + $0xe4] ss:$8 sps:$4 sm:$0xff]  }
 0x360   : > { %6547 = vmatprep.subr.bf16.mxu0 %v6926_v38  ;;  %v3519_v26 = vpack.c.bf16 %v3517_v25, %v3516_v24  ;;  %v3614_v36 = vld [vmem:[#allocation3 + $0x29] sm:$0xff] }
 0x361   : > { %v6984_v24 = vld [vmem:[#allocation9 + $0x14] ss:$8 sps:$4 sm:$0xff]   ;;  %v6982_v25 = vld [vmem:[#allocation9 + $0x10] ss:$8 sps:$4 sm:$0xff]  }
 0x363   : > { %6548 = vmatpush3.bf16.msra.mxu0 %v6926_v38  ;;  %v3617_v38 = vpack.c.bf16 %v3615_v28, %v3614_v36  ;;  %v6994_v36 = vld [vmem:[#allocation9 + $0x50] ss:$8 sps:$4 sm:$0xff]   ;;  %v6999_v28 = vld [vmem:[#allocation9 + $0x64] ss:$8 sps:$4 sm:$0xff]  }
 0x364   : > { %6553 = vmatprep.subr.bf16.mxu0 %v6927_v40 }
 0x366   : > { %6550 = vmatmul.mubr.msk.bf16.vlgmr.msra.gmra.mrb[0].mxu0 %vm585_vm4, %v2842_v42  ;;  %v6966_v42 = vld [vmem:[#allocation9 + $0xb4] ss:$8 sps:$4 sm:$0xff]  }
 0x367   : > { %6554 = vmatpush3.bf16.msra.mxu0 %v6927_v40  ;;  %6561 = vmatprep.mubr.msk.bf16.mxu0 %vm585_vm4, %v3028_v46  ;;  %v6960_v40 = vld [vmem:[#allocation9 + $0x94] ss:$8 sps:$4 sm:$0xff]   ;;  %v6967_v46 = vld [vmem:[#allocation9 + $0xc0] ss:$8 sps:$4 sm:$0xff]  }
 0x368   : > { %6555 = vmatprep.subr.bf16.mxu0 %v6928_v45 }
 0x36b   : > { %6556 = vmatpush3.bf16.msra.mxu0 %v6928_v45  ;;  %v6969_v45 = vld [vmem:[#allocation9 + $0xc4] ss:$8 sps:$4 sm:$0xff]  }
 0x36c   : > { %6557 = vmatprep.subr.bf16.mxu0 %v6929_v48 }
 0x36f   : > { %6558 = vmatpush3.bf16.msra.mxu0 %v6929_v48  ;;  %v6972_v48 = vld [vmem:[#allocation9 + $0xd4] ss:$8 sps:$4 sm:$0xff]  }
 0x370   : > { %6559 = vmatprep.subr.bf16.mxu0 %v6930_v49 }
 0x373   : > { %6560 = vmatpush3.bf16.msra.mxu0 %v6930_v49  ;;  %v6970_v49 = vld [vmem:[#allocation9 + $0xd0] ss:$8 sps:$4 sm:$0xff]  }
 0x374   : > { %6565 = vmatprep.subr.bf16.mxu0 %v6931_v50 }
 0x376   : > { %6562 = vmatmul.mubr.msk.bf16.vlgmr.msra.gmra.mrb[0].mxu0 %vm585_vm4, %v3029_v53  ;;  %v7339_v53 = vmov 0  }
 0x377   : > { %6566 = vmatpush3.bf16.msra.mxu0 %v6931_v50  ;;  %6573 = vmatprep.mubr.msk.bf16.mxu0 %vm585_vm4, %v3126_v55  ;;  %v6973_v50 = vld [vmem:[#allocation9 + $0xe0] ss:$8 sps:$4 sm:$0xff]   ;;  %v6981_v55 = vld [vmem:[#allocation9 + $0x4] ss:$8 sps:$4 sm:$0xff]  }
 0x378   : > { %6567 = vmatprep.subr.bf16.mxu0 %v6932_v47 }
 0x37b   : > { %6568 = vmatpush3.bf16.msra.mxu0 %v6932_v47  ;;  %v6976_v47 = vld [vmem:[#allocation9 + $0xf0] ss:$8 sps:$4 sm:$0xff]  }
 0x37c   : > { %6569 = vmatprep.subr.bf16.mxu0 %v6933_v56 }
 0x37f   : > { %6570 = vmatpush3.bf16.msra.mxu0 %v6933_v56  ;;  %v5934_v56 = vld [vmem:[%s8363_s8] ss:$0 sm:$0xff] }
 0x380   : > { %6571 = vmatprep.subr.bf16.mxu0 %v6934_v57 }
 0x383   : > { %6572 = vmatpush3.bf16.msra.mxu0 %v6934_v57 }
 0x384   : > { %6577 = vmatprep.subr.bf16.mxu0 %v6935_v54 }
 0x386   : > { %6574 = vmatmul.mubr.msk.bf16.vlgmr.msra.gmra.mrb[0].mxu0 %vm585_vm4, %v3127_v61 }
 0x387   : > { %6578 = vmatpush3.bf16.msra.mxu0 %v6935_v54  ;;  %6585 = vmatprep.mubr.msk.bf16.mxu0 %vm585_vm4, %v3224_v1  ;;  %v5935_v54 = vld [vmem:[%s8364_s9] ss:$0 sm:$0xff] }
 0x388   : > { %6579 = vmatprep.subr.bf16.mxu0 %v6936_v63 }
 0x38b   : > { %6580 = vmatpush3.bf16.msra.mxu0 %v6936_v63 }
 0x38c   : > { %6581 = vmatprep.subr.bf16.mxu0 %v6937_v2 }
 0x38f   : > { %6582 = vmatpush3.bf16.msra.mxu0 %v6937_v2 }
 0x390   : > { %6583 = vmatprep.subr.bf16.mxu0 %v6938_v27 }
 0x393   : > { %6584 = vmatpush3.bf16.msra.mxu0 %v6938_v27 }
 0x394   : > { %6589 = vmatprep.subr.bf16.mxu0 %v6939_v0 }
 0x396   : > { %6586 = vmatmul.mubr.msk.bf16.vlgmr.msra.gmra.mrb[0].mxu0 %vm585_vm4, %v3225_v6 }
 0x397   : > { %6590 = vmatpush3.bf16.msra.mxu0 %v6939_v0  ;;  %6597 = vmatprep.mubr.msk.bf16.mxu0 %vm585_vm4, %v3322_v10 }
 0x398   : > { %6591 = vmatprep.subr.bf16.mxu0 %v6940_v7 }
 0x39b   : > { %6592 = vmatpush3.bf16.msra.mxu0 %v6940_v7 }
 0x39c   : > { %6593 = vmatprep.subr.bf16.mxu0 %v6941_v62 }
 0x39f   : > { %6594 = vmatpush3.bf16.msra.mxu0 %v6941_v62 }
 0x3a0   : > { %6595 = vmatprep.subr.bf16.mxu0 %v6942_v8 }
 0x3a3   : > { %6596 = vmatpush3.bf16.msra.mxu0 %v6942_v8 }
 0x3a4   : > { %6601 = vmatprep.subr.bf16.mxu0 %v6943_v39 }
 0x3a6   : > { %6598 = vmatmul.mubr.msk.bf16.vlgmr.msra.gmra.mrb[0].mxu0 %vm585_vm4, %v3323_v43 }
 0x3a7   : > { %6602 = vmatpush3.bf16.msra.mxu0 %v6943_v39  ;;  %6609 = vmatprep.mubr.msk.bf16.mxu0 %vm585_vm4, %v3420_v11 }
 0x3a8   : > { %6603 = vmatprep.subr.bf16.mxu0 %v6944_v9 }
 0x3ab   : > { %6604 = vmatpush3.bf16.msra.mxu0 %v6944_v9 }
 0x3ac   : > { %6605 = vmatprep.subr.bf16.mxu0 %v6945_v12 }
 0x3af   : > { %6606 = vmatpush3.bf16.msra.mxu0 %v6945_v12 }
 0x3b0   : > { %6607 = vmatprep.subr.bf16.mxu0 %v6946_v13 }
 0x3b3   : > { %6608 = vmatpush3.bf16.msra.mxu0 %v6946_v13 }
 0x3b4   : > { %6613 = vmatprep.subr.bf16.mxu0 %v6947_v14 }
 0x3b6   : > { %6610 = vmatmul.mubr.msk.bf16.vlgmr.msra.gmra.mrb[0].mxu0 %vm585_vm4, %v3421_v19 }
 0x3b7   : > { %6614 = vmatpush3.bf16.msra.mxu0 %v6947_v14  ;;  %6621 = vmatprep.mubr.msk.bf16.mxu0 %vm585_vm4, %v3518_v21 }
 0x3b8   : > { %6615 = vmatprep.subr.bf16.mxu0 %v6948_v20 }
 0x3bb   : > { %6616 = vmatpush3.bf16.msra.mxu0 %v6948_v20 }
 0x3bc   : > { %6617 = vmatprep.subr.bf16.mxu0 %v6949_v18 }
 0x3bf   : > { %6618 = vmatpush3.bf16.msra.mxu0 %v6949_v18  ;;  %v6979_v18 = vld [vmem:[#allocation9] ss:$8 sps:$4 sm:$0xff]  }
 0x3c0   : > { %6619 = vmatprep.subr.bf16.mxu0 %v6950_v22 }
 0x3c3   : > { %6620 = vmatpush3.bf16.msra.mxu0 %v6950_v22 }
 0x3c4   : > { %6625 = vmatprep.subr.bf16.mxu0 %v6951_v23 }
 0x3c6   : > { %6622 = vmatmul.mubr.msk.bf16.vlgmr.msra.gmra.mrb[0].mxu0 %vm585_vm4, %v3519_v26  ;;  %v6987_v26 = vld [vmem:[#allocation9 + $0x24] ss:$8 sps:$4 sm:$0xff]  }
 0x3c7   : > { %6626 = vmatpush3.bf16.msra.mxu0 %v6951_v23  ;;  %6633 = vmatprep.mubr.msk.bf16.mxu0 %vm585_vm4, %v3616_v31  ;;  %v6990_v31 = vld [vmem:[#allocation9 + $0x34] ss:$8 sps:$4 sm:$0xff]  }
 0x3c8   : > { %6627 = vmatprep.subr.bf16.mxu0 %v6952_v29 }
 0x3cb   : > { %6628 = vmatpush3.bf16.msra.mxu0 %v6952_v29  ;;  %v6985_v29 = vld [vmem:[#allocation9 + $0x20] ss:$8 sps:$4 sm:$0xff]  }
 0x3cc   : > { %6629 = vmatprep.subr.bf16.mxu0 %v6953_v33 }
 0x3cf   : > { %6630 = vmatpush3.bf16.msra.mxu0 %v6953_v33  ;;  %v6988_v33 = vld [vmem:[#allocation9 + $0x30] ss:$8 sps:$4 sm:$0xff]  }
 0x3d0   : > { %6631 = vmatprep.subr.bf16.mxu0 %v6954_v34 }
 0x3d3   : > { %6632 = vmatpush3.bf16.msra.mxu0 %v6954_v34  ;;  %v6993_v34 = vld [vmem:[#allocation9 + $0x44] ss:$8 sps:$4 sm:$0xff]  }
 0x3d4   : > { %3882 = vmatprep.subr.bf16.mxu0 %v6957_v35  ;;  %v6991_v35 = vld [vmem:[#allocation9 + $0x40] ss:$8 sps:$4 sm:$0xff]  }
 0x3d6   : > { %6634 = vmatmul.mubr.msk.bf16.vlgmr.msra.gmra.mrb[0].mxu0 %vm585_vm4, %v3617_v38  ;;  %v7002_v38 = vld [vmem:[#allocation9 + $0x74] ss:$8 sps:$4 sm:$0xff]  }
 0x3d7   : > { %3883 = vmatpush1.bf16.msra.mxu0 %v6955_v37  ;;  %3914 = vmatprep.mubr.bf16.mxu0 %v7339_v53  ;;  %v6997_v37 = vld [vmem:[#allocation9 + $0x60] ss:$8 sps:$4 sm:$0xff]  }
 0x3d8   : > { %3884 = vmatprep.subr.bf16.mxu0 %v6960_v40  ;;  %v7000_v40 = vld [vmem:[#allocation9 + $0x70] ss:$8 sps:$4 sm:$0xff]  }
 0x3db   : > { %3885 = vmatpush1.bf16.msra.mxu0 %v6958_v15  ;;  %v7005_v15 = vld [vmem:[#allocation9 + $0x104] ss:$8 sps:$4 sm:$0xff]  }
 0x3dc   : > { %3886 = vmatprep.subr.bf16.mxu0 %v6963_v30  ;;  %v3763_v30 = vld [vmem:[#allocation4 + $0x7] sm:$0xff] }
 0x3df   : > { %3887 = vmatpush1.bf16.msra.mxu0 %v6961_v41 }
 0x3e0   : > { %3888 = vmatprep.subr.bf16.mxu0 %v6966_v42  ;;  %v7003_v42 = vld [vmem:[#allocation9 + $0x100] ss:$8 sps:$4 sm:$0xff]  }
 0x3e3   : > { %3889 = vmatpush1.bf16.msra.mxu0 %v6964_v44 }
 0x3e4   : > { %3890 = vmatprep.subr.bf16.mxu0 %v6969_v45  ;;  %v7008_v45 = vld [vmem:[#allocation9 + $0x114] ss:$8 sps:$4 sm:$0xff]  }
 0x3e7   : > { %3891 = vmatpush1.bf16.msra.mxu0 %v6967_v46  ;;  %v7006_v46 = vld [vmem:[#allocation9 + $0x110] ss:$8 sps:$4 sm:$0xff]  }
 0x3e8   : > { %3892 = vmatprep.subr.bf16.mxu0 %v6972_v48  ;;  %v7011_v48 = vld [vmem:[#allocation9 + $0x124] ss:$8 sps:$4 sm:$0xff]  }
 0x3eb   : > { %3893 = vmatpush1.bf16.msra.mxu0 %v6970_v49  ;;  %v7009_v49 = vld [vmem:[#allocation9 + $0x120] ss:$8 sps:$4 sm:$0xff]  }
 0x3ec   : > { %3894 = vmatprep.subr.bf16.mxu0 %v6975_v51  ;;  %v7012_v51 = vld [vmem:[#allocation9 + $0x130] ss:$8 sps:$4 sm:$0xff]  }
 0x3ef   : > { %3895 = vmatpush1.bf16.msra.mxu0 %v6973_v50  ;;  %v7014_v50 = vld [vmem:[#allocation9 + $0x134] ss:$8 sps:$4 sm:$0xff]  }
 0x3f0   : > { %3896 = vmatprep.subr.bf16.mxu0 %v6978_v52  ;;  %v7017_v52 = vld [vmem:[#allocation9 + $0x144] ss:$8 sps:$4 sm:$0xff]  }
 0x3f3   : > { %3897 = vmatpush1.bf16.msra.mxu0 %v6976_v47  ;;  %v7015_v47 = vld [vmem:[#allocation9 + $0x140] ss:$8 sps:$4 sm:$0xff]  }
 0x3f4   : > { %4005 = vmatprep.subr.bf16.mxu0 %v6981_v55  ;;  %v7020_v55 = vld [vmem:[#allocation9 + $0x154] ss:$8 sps:$4 sm:$0xff]  }
 0x4a9   : > { %v6635_v57 = vpop.f32.mrb[0].mxu0 }
 0x4aa   : > { %v3719_v59 = vmul.f32 %v6635_v57, %v5934_v56  ;;  %v3691_v60 = vpop.f32.mrb[1].mxu0  ;;  %v7023_v57 = vld [vmem:[#allocation9 + $0x164] ss:$8 sps:$4 sm:$0xff]  }
 0x4ab   : > { %v3717_v61 = vmul.f32 %v5934_v56, %v3691_v60  ;;  %v6636_v63 = vpop.f32.mrb[2].mxu0  ;;  %v7024_v60 = vld [vmem:[#allocation9 + $0x170] ss:$8 sps:$4 sm:$0xff]  }
 0x4ac   : > { %v3730_v1 = vadd.f32 %v5935_v54, %v3719_v59  ;;  %v3720_v2 = vmul.f32 %v6636_v63, %v5934_v56  ;;  %v3694_v27 = vpop.f32.mrb[3].mxu0  ;;  %v7026_v59 = vld [vmem:[#allocation9 + $0x174] ss:$8 sps:$4 sm:$0xff]  }
 0x4ad   : > { %v3728_v0 = vadd.f32 %v5935_v54, %v3717_v61  ;;  %v3718_v4 = vmul.f32 %v5934_v56, %v3694_v27  ;;  %v7018_v56 = vld [vmem:[#allocation9 + $0x150] ss:$8 sps:$4 sm:$0xff]   ;;  %v7029_v61 = vld [vmem:[#allocation9 + $0x184] ss:$8 sps:$4 sm:$0xff]  }
 0x4ae   : > { %v3734_v5 = vmax.f32 %v3730_v1, 0.0  ;;  %v3731_v6 = vadd.f32 %v5935_v54, %v3720_v2  ;;  %v7027_v2 = vld [vmem:[#allocation9 + $0x180] ss:$8 sps:$4 sm:$0xff]  }
 0x4af   : > { %v3732_v7 = vmax.f32 %v3728_v0, 0.0  ;;  %v3729_v10 = vadd.f32 %v5935_v54, %v3718_v4  ;;  %v7021_v54 = vld [vmem:[#allocation9 + $0x160] ss:$8 sps:$4 sm:$0xff]   ;;  %v7032_v0 = vld [vmem:[#allocation9 + $0x194] ss:$8 sps:$4 sm:$0xff]  }
 0x4b0   : > { %3738 = vst [vmem:[#allocation7 + $0x10] sm:$0xff] %v3734_v5  ;;  %v3735_v62 = vmax.f32 %v3731_v6, 0.0  ;;  %v7030_v4 = vld [vmem:[#allocation9 + $0x190] ss:$8 sps:$4 sm:$0xff]   ;;  %v7035_v5 = vld [vmem:[#allocation9 + $0x1a4] ss:$8 sps:$4 sm:$0xff]  }
 0x4b1   : > { %3736 = vst [vmem:[#allocation7] sm:$0xff] %v3732_v7  ;;  %v3733_v8 = vmax.f32 %v3729_v10, 0.0  ;;  %v7033_v6 = vld [vmem:[#allocation9 + $0x1a0] ss:$8 sps:$4 sm:$0xff]   ;;  %v7038_v7 = vld [vmem:[#allocation9 + $0x1b4] ss:$8 sps:$4 sm:$0xff]  }
 0x4b2   : > { %3739 = vst [vmem:[#allocation7 + $0x18] sm:$0xf] %v3735_v62  ;;  %v7036_v10 = vld [vmem:[#allocation9 + $0x1b0] ss:$8 sps:$4 sm:$0xff]   ;;  %v7041_v62 = vld [vmem:[#allocation9 + $0x1c4] ss:$8 sps:$4 sm:$0xff]  }
 0x4b3   : > { %3737 = vst [vmem:[#allocation7 + $0x8] sm:$0xff] %v3733_v8  ;;  %v7039_v8 = vld [vmem:[#allocation9 + $0x1c0] ss:$8 sps:$4 sm:$0xff]  }
 0x4b7   : > { %v3752_v39 = vld [vmem:[#allocation7 + $0x10] ss:$2 sm:$0x3]  ;;  %v3754_v3 = vld [vmem:[#allocation7 + $0x11] ss:$2 sm:$0x3] }
 0x4b8   : > { %v3740_v32 = vld [vmem:[#allocation7] ss:$2 sm:$0x3]  ;;  %v3742_v43 = vld [vmem:[#allocation7 + $0x1] ss:$2 sm:$0x3]  ;;  %v3755_v12 = vmax.f32 %v3752_v39, %v3754_v3 }
 0x4b9   : > { %v3757_v9 = vld [vmem:[#allocation7 + $0x18] ss:$2 sm:$0x3]  ;;  %v3759_v11 = vld [vmem:[#allocation7 + $0x19] ss:$2 sm:$0x3]  ;;  %v3743_v17 = vmax.f32 %v3740_v32, %v3742_v43 }
 0x4ba   : > { %v3760_v13 = vmax.f32 %v3757_v9, %v3759_v11  ;;  %v3745_v14 = vld [vmem:[#allocation7 + $0x8] ss:$2 sm:$0x3]  ;;  %v3747_v16 = vld [vmem:[#allocation7 + $0x9] ss:$2 sm:$0x3] }
 0x4bb   : > { %v3748_v19 = vmax.f32 %v3745_v14, %v3747_v16  ;;  %v7044_v39 = vld [vmem:[#allocation9 + $0x1d4] ss:$8 sps:$4 sm:$0xff]   ;;  %v7042_v3 = vld [vmem:[#allocation9 + $0x1d0] ss:$8 sps:$4 sm:$0xff]   ;;  %v7047_v32 = vld [vmem:[#allocation9 + $0x1e4] ss:$8 sps:$4 sm:$0xff]  }
 0x4bc   : > { %v3761_v20 = vmax.f32 %v3755_v12, %v3760_v13  ;;  %v7045_v43 = vld [vmem:[#allocation9 + $0x1e0] ss:$8 sps:$4 sm:$0xff]   ;;  %v7050_v9 = vld [vmem:[#allocation9 + $0x1f4] ss:$8 sps:$4 sm:$0xff]   ;;  %v7048_v11 = vld [vmem:[#allocation9 + $0x1f0] ss:$8 sps:$4 sm:$0xff]  }
 0x4bd   : > { %v3749_v21 = vmax.f32 %v3743_v17, %v3748_v19  ;;  %v7053_v12 = vld [vmem:[#allocation9 + $0x204] ss:$8 sps:$4 sm:$0xff]   ;;  %v7051_v16 = vld [vmem:[#allocation9 + $0x200] ss:$8 sps:$4 sm:$0xff]   ;;  %v7056_v19 = vld [vmem:[#allocation9 + $0x214] ss:$8 sps:$4 sm:$0xff]  }
 0x4be   : > { %3762 = vst [vmem:[#allocation4 + $0x18] sm:$0x3] %v3761_v20  ;;  %v7054_v20 = vld [vmem:[#allocation9 + $0x210] ss:$8 sps:$4 sm:$0xff]  }
 0x4bf   : > { %3750 = vst [vmem:[#allocation4 + $0x10] sm:$0x3] %v3749_v21  ;;  %v7059_v21 = vld [vmem:[#allocation9 + $0x224] ss:$8 sps:$4 sm:$0xff]  }
 0x4c5   : > { %v4196_v14 = vld [vmem:[#allocation4 + $0x17] sm:$0x3] }
 0x4c6   : > { %v3783_v22 = vld [vmem:[#allocation4 + $0x10] sm:$0x3] }
 0x4c7   : > { %v3784_v23 = vpack.c.bf16 %v3783_v22, %v7859_v58  ;;  %v6996_v58 = vld [vmem:[#allocation9 + $0x54] ss:$8 sps:$4 sm:$0xff]   ;;  %v3764_v41 = vld [vmem:[#allocation4 + $0xf] sm:$0x3]  ;;  %v4049_v1 = vld [vmem:[#allocation4 + $0x11] sm:$0x3] }
 0x4c8   : > { %v3765_v44 = vpack.c.bf16 %v3764_v41, %v3763_v30  ;;  %v4048_v63 = vld [vmem:[#allocation4 + $0x9] sm:$0xff]  ;;  %v7062_v22 = vld [vmem:[#allocation9 + $0x234] ss:$8 sps:$4 sm:$0xff]  }
 0x4c9   : > { %3915 = vmatmul.mubr.bf16.vlgmr.msra.gmra.mrb[4].mxu0 %v3784_v23  ;;  %v4050_v27 = vpack.c.bf16 %v4049_v1, %v4048_v63  ;;  %v4195_v13 = vld [vmem:[#allocation4 + $0xf] sm:$0xff]  ;;  %v7173_v30 = vld [vmem:[%s8368_s13 + $0x4] ss:$8 sps:$4 sm:$0xff]  }
 0x4ca   : > { %4006 = vmatpush1.bf16.msra.mxu0 %v6979_v18  ;;  %4037 = vmatprep.mubr.bf16.mxu0 %v7339_v53  ;;  %v4197_v17 = vpack.c.bf16 %v4196_v14, %v4195_v13  ;;  %v7057_v18 = vld [vmem:[#allocation9 + $0x220] ss:$8 sps:$4 sm:$0xff]   ;;  %v7060_v23 = vld [vmem:[#allocation9 + $0x230] ss:$8 sps:$4 sm:$0xff]   ;;  %v7095_v63 = vld [vmem:[#allocation9 + $0x2e4] ss:$8 sps:$4 sm:$0xff]  }
 0x4cb   : > { %4007 = vmatprep.subr.bf16.mxu0 %v6984_v24  ;;  %v7065_v24 = vld [vmem:[#allocation9 + $0x244] ss:$8 sps:$4 sm:$0xff]   ;;  %v7078_v41 = vld [vmem:[#allocation9 + $0x290] ss:$8 sps:$4 sm:$0xff]   ;;  %5346 = vmatprep.subr.bf16.mxu1 %v7173_v30  ;;  %v7105_v13 = vld [vmem:[#allocation9 + $0x320] ss:$8 sps:$4 sm:$0xff]  }
 0x4cc   : > { %v7186_v1 = vld [vmem:[%s8368_s13 + $0x50] ss:$8 sps:$4 sm:$0xff]   ;;  %v7110_v14 = vld [vmem:[#allocation9 + $0x334] ss:$8 sps:$4 sm:$0xff]  }
 0x4cd   : > { %v7138_v30 = vld [vmem:[#allocation9 + $0x3d0] ss:$8 sps:$4 sm:$0xff]  }
 0x4ce   : > { %4008 = vmatpush1.bf16.msra.mxu0 %v6982_v25  ;;  %v7063_v25 = vld [vmem:[#allocation9 + $0x240] ss:$8 sps:$4 sm:$0xff]  }
 0x4cf   : > { %4009 = vmatprep.subr.bf16.mxu0 %v6987_v26  ;;  %v7068_v26 = vld [vmem:[#allocation9 + $0x254] ss:$8 sps:$4 sm:$0xff]  }
 0x4d2   : > { %4010 = vmatpush1.bf16.msra.mxu0 %v6985_v29  ;;  %v7066_v29 = vld [vmem:[#allocation9 + $0x250] ss:$8 sps:$4 sm:$0xff]  }
 0x4d3   : > { %4011 = vmatprep.subr.bf16.mxu0 %v6990_v31  ;;  %v7071_v31 = vld [vmem:[#allocation9 + $0x264] ss:$8 sps:$4 sm:$0xff]  }
 0x4d6   : > { %4012 = vmatpush1.bf16.msra.mxu0 %v6988_v33  ;;  %v7069_v33 = vld [vmem:[#allocation9 + $0x260] ss:$8 sps:$4 sm:$0xff]  }
 0x4d7   : > { %4013 = vmatprep.subr.bf16.mxu0 %v6993_v34  ;;  %v7074_v34 = vld [vmem:[#allocation9 + $0x274] ss:$8 sps:$4 sm:$0xff]  }
 0x4da   : > { %4014 = vmatpush1.bf16.msra.mxu0 %v6991_v35  ;;  %v7072_v35 = vld [vmem:[#allocation9 + $0x270] ss:$8 sps:$4 sm:$0xff]  }
 0x4db   : > { %4015 = vmatprep.subr.bf16.mxu0 %v6996_v58  ;;  %v7077_v58 = vld [vmem:[#allocation9 + $0x284] ss:$8 sps:$4 sm:$0xff]  }
 0x4de   : > { %4016 = vmatpush1.bf16.msra.mxu0 %v6994_v36  ;;  %v4342_v36 = vld [vmem:[#allocation4 + $0x10] sm:$0xff] }
 0x4df   : > { %4017 = vmatprep.subr.bf16.mxu0 %v6999_v28  ;;  %v4343_v28 = vld [vmem:[#allocation4 + $0x18] sm:$0x3] }
 0x4e2   : > { %4018 = vmatpush1.bf16.msra.mxu0 %v6997_v37  ;;  %v7075_v37 = vld [vmem:[#allocation9 + $0x280] ss:$8 sps:$4 sm:$0xff]  }
 0x4e3   : > { %4019 = vmatprep.subr.bf16.mxu0 %v7002_v38  ;;  %v4344_v38 = vpack.c.bf16 %v4343_v28, %v4342_v36  ;;  %v7129_v36 = vld [vmem:[#allocation9 + $0x3a0] ss:$8 sps:$4 sm:$0xff]   ;;  %v7134_v28 = vld [vmem:[#allocation9 + $0x3b4] ss:$8 sps:$4 sm:$0xff]  }
 0x4e6   : > { %4020 = vmatpush1.bf16.msra.mxu0 %v7000_v40  ;;  %v7080_v40 = vld [vmem:[#allocation9 + $0x294] ss:$8 sps:$4 sm:$0xff]  }
 0x4e7   : > { %4148 = vmatprep.subr.bf16.mxu0 %v7005_v15  ;;  %v7171_v15 = vld [vmem:[%s8368_s13] ss:$8 sps:$4 sm:$0xff]  }
 0x4e8   : > { %5347 = vmatpush1.bf16.msra.mxu1 %v7171_v15  ;;  %v7140_v15 = vld [vmem:[#allocation9 + $0x3d4] ss:$8 sps:$4 sm:$0xff]  }
 0x4e9   : > { %4038 = vmatmul.mubr.bf16.vlgmr.msra.gmra.mrb[4].mxu0 %v3765_v44  ;;  %v7083_v44 = vld [vmem:[#allocation9 + $0x2a4] ss:$8 sps:$4 sm:$0xff]  }
 0x4ea   : > { %4149 = vmatpush1.bf16.msra.mxu0 %v7003_v42  ;;  %4180 = vmatprep.mubr.bf16.mxu0 %v7339_v53  ;;  %v7176_v42 = vld [vmem:[%s8368_s13 + $0x14] ss:$8 sps:$4 sm:$0xff]  }
 0x4eb   : > { %4150 = vmatprep.subr.bf16.mxu0 %v7008_v45  ;;  %v7174_v45 = vld [vmem:[%s8368_s13 + $0x10] ss:$8 sps:$4 sm:$0xff]   ;;  %5348 = vmatprep.subr.bf16.mxu1 %v7176_v42 }
 0x4ec   : > { %5349 = vmatpush1.bf16.msra.mxu1 %v7174_v45  ;;  %v7141_v42 = vld [vmem:[#allocation9 + $0x3e0] ss:$8 sps:$4 sm:$0xff]   ;;  %v7144_v45 = vld [vmem:[#allocation9 + $0x3f0] ss:$8 sps:$4 sm:$0xff]  }
 0x4ee   : > { %4151 = vmatpush1.bf16.msra.mxu0 %v7006_v46  ;;  %v7179_v46 = vld [vmem:[%s8368_s13 + $0x24] ss:$8 sps:$4 sm:$0xff]  }
 0x4ef   : > { %4152 = vmatprep.subr.bf16.mxu0 %v7011_v48  ;;  %v7081_v48 = vld [vmem:[#allocation9 + $0x2a0] ss:$8 sps:$4 sm:$0xff]   ;;  %5350 = vmatprep.subr.bf16.mxu1 %v7179_v46  ;;  %v7149_v46 = vld [vmem:[#allocation9 + $0x404] ss:$8 sps:$4 sm:$0xff]  }
 0x4f2   : > { %4153 = vmatpush1.bf16.msra.mxu0 %v7009_v49  ;;  %v7086_v49 = vld [vmem:[#allocation9 + $0x2b4] ss:$8 sps:$4 sm:$0xff]  }
 0x4f3   : > { %4154 = vmatprep.subr.bf16.mxu0 %v7014_v50  ;;  %v7177_v50 = vld [vmem:[%s8368_s13 + $0x20] ss:$8 sps:$4 sm:$0xff]  }
 0x4f4   : > { %5351 = vmatpush1.bf16.msra.mxu1 %v7177_v50  ;;  %v7147_v50 = vld [vmem:[#allocation9 + $0x400] ss:$8 sps:$4 sm:$0xff]  }
 0x4f6   : > { %4155 = vmatpush1.bf16.msra.mxu0 %v7012_v51  ;;  %v7182_v51 = vld [vmem:[%s8368_s13 + $0x34] ss:$8 sps:$4 sm:$0xff]  }
 0x4f7   : > { %4156 = vmatprep.subr.bf16.mxu0 %v7017_v52  ;;  %v7084_v52 = vld [vmem:[#allocation9 + $0x2b0] ss:$8 sps:$4 sm:$0xff]   ;;  %5352 = vmatprep.subr.bf16.mxu1 %v7182_v51 }
 0x4fa   : > { %4157 = vmatpush1.bf16.msra.mxu0 %v7015_v47  ;;  %v7089_v47 = vld [vmem:[#allocation9 + $0x2c4] ss:$8 sps:$4 sm:$0xff]  }
 0x4fb   : > { %4158 = vmatprep.subr.bf16.mxu0 %v7020_v55  ;;  %v7180_v55 = vld [vmem:[%s8368_s13 + $0x30] ss:$8 sps:$4 sm:$0xff]  }
 0x4fc   : > { %5353 = vmatpush1.bf16.msra.mxu1 %v7180_v55  ;;  %v7155_v55 = vld [vmem:[#allocation9 + $0x424] ss:$8 sps:$4 sm:$0xff]  }
 0x4fe   : > { %4159 = vmatpush1.bf16.msra.mxu0 %v7018_v56  ;;  %v7185_v56 = vld [vmem:[%s8368_s13 + $0x44] ss:$8 sps:$4 sm:$0xff]  }
 0x4ff   : > { %4160 = vmatprep.subr.bf16.mxu0 %v7023_v57  ;;  %v7087_v57 = vld [vmem:[#allocation9 + $0x2c0] ss:$8 sps:$4 sm:$0xff]   ;;  %5354 = vmatprep.subr.bf16.mxu1 %v7185_v56 }
 0x500   : > { %v7153_v56 = vld [vmem:[#allocation9 + $0x420] ss:$8 sps:$4 sm:$0xff]  }
 0x502   : > { %4161 = vmatpush1.bf16.msra.mxu0 %v7021_v54  ;;  %v7092_v54 = vld [vmem:[#allocation9 + $0x2d4] ss:$8 sps:$4 sm:$0xff]  }
 0x503   : > { %4162 = vmatprep.subr.bf16.mxu0 %v7026_v59  ;;  %v7183_v59 = vld [vmem:[%s8368_s13 + $0x40] ss:$8 sps:$4 sm:$0xff]  }
 0x504   : > { %5355 = vmatpush1.bf16.msra.mxu1 %v7183_v59  ;;  %v7161_v59 = vld [vmem:[#allocation9 + $0x444] ss:$8 sps:$4 sm:$0xff]  }
 0x506   : > { %4163 = vmatpush1.bf16.msra.mxu0 %v7024_v60  ;;  %v7188_v60 = vld [vmem:[%s8368_s13 + $0x54] ss:$8 sps:$4 sm:$0xff]  }
 0x507   : > { %4295 = vmatprep.subr.bf16.mxu0 %v7029_v61  ;;  %v7090_v61 = vld [vmem:[#allocation9 + $0x2d0] ss:$8 sps:$4 sm:$0xff]   ;;  %5356 = vmatprep.subr.bf16.mxu1 %v7188_v60  ;;  %v7159_v60 = vld [vmem:[#allocation9 + $0x440] ss:$8 sps:$4 sm:$0xff]  }
 0x508   : > { %5357 = vmatpush1.bf16.msra.mxu1 %v7186_v1  ;;  %v7167_v1 = vld [vmem:[#allocation9 + $0x464] ss:$8 sps:$4 sm:$0xff]  }
 0x509   : > { %4181 = vmatmul.mubr.bf16.vlgmr.msra.gmra.mrb[4].mxu0 %v4050_v27  ;;  %v7093_v27 = vld [vmem:[#allocation9 + $0x2e0] ss:$8 sps:$4 sm:$0xff]  }
 0x50a   : > { %4296 = vmatpush1.bf16.msra.mxu0 %v7027_v2  ;;  %4327 = vmatprep.mubr.bf16.mxu0 %v7339_v53  ;;  %v7191_v2 = vld [vmem:[%s8368_s13 + $0x64] ss:$8 sps:$4 sm:$0xff]  }
 0x50b   : > { %4297 = vmatprep.subr.bf16.mxu0 %v7032_v0  ;;  %v7098_v0 = vld [vmem:[#allocation9 + $0x2f4] ss:$8 sps:$4 sm:$0xff]   ;;  %5358 = vmatprep.subr.bf16.mxu1 %v7191_v2 }
 0x50c   : > { %v7170_v2 = vld [vmem:[#allocation9 + $0x474] ss:$8 sps:$4 sm:$0xff]  }
 0x50e   : > { %4298 = vmatpush1.bf16.msra.mxu0 %v7030_v4  ;;  %v7189_v4 = vld [vmem:[%s8368_s13 + $0x60] ss:$8 sps:$4 sm:$0xff]  }
 0x50f   : > { %4299 = vmatprep.subr.bf16.mxu0 %v7035_v5  ;;  %v7194_v5 = vld [vmem:[%s8368_s13 + $0x74] ss:$8 sps:$4 sm:$0xff]   ;;  %5359 = vmatpush1.bf16.msra.mxu1 %v7189_v4  ;;  %v4931_v4 = vld [vmem:[#allocation4 + $0x21] sm:$0x3] }
 0x510   : > { %5360 = vmatprep.subr.bf16.mxu1 %v7194_v5 }
 0x512   : > { %4300 = vmatpush1.bf16.msra.mxu0 %v7033_v6  ;;  %v7096_v6 = vld [vmem:[#allocation9 + $0x2f0] ss:$8 sps:$4 sm:$0xff]  }
 0x513   : > { %4301 = vmatprep.subr.bf16.mxu0 %v7038_v7  ;;  %v7101_v7 = vld [vmem:[#allocation9 + $0x304] ss:$8 sps:$4 sm:$0xff]  }
 0x516   : > { %4302 = vmatpush1.bf16.msra.mxu0 %v7036_v10  ;;  %v4489_v10 = vld [vmem:[#allocation4 + $0x11] sm:$0xff] }
 0x517   : > { %4303 = vmatprep.subr.bf16.mxu0 %v7041_v62  ;;  %v4490_v62 = vld [vmem:[#allocation4 + $0x19] sm:$0x3] }
 0x51a   : > { %4304 = vmatpush1.bf16.msra.mxu0 %v7039_v8  ;;  %v7192_v8 = vld [vmem:[%s8368_s13 + $0x70] ss:$8 sps:$4 sm:$0xff]  }
 0x51b   : > { %4305 = vmatprep.subr.bf16.mxu0 %v7044_v39  ;;  %v7197_v39 = vld [vmem:[%s8368_s13 + $0x84] ss:$8 sps:$4 sm:$0xff]   ;;  %5361 = vmatpush1.bf16.msra.mxu1 %v7192_v8  ;;  %v7204_v8 = vld [vmem:[%s8368_s13 + $0xb0] ss:$8 sps:$4 sm:$0xff]  }
 0x51c   : > { %5362 = vmatprep.subr.bf16.mxu1 %v7197_v39  ;;  %v7206_v39 = vld [vmem:[%s8368_s13 + $0xb4] ss:$8 sps:$4 sm:$0xff]  }
 0x51e   : > { %4306 = vmatpush1.bf16.msra.mxu0 %v7042_v3  ;;  %v7099_v3 = vld [vmem:[#allocation9 + $0x300] ss:$8 sps:$4 sm:$0xff]  }
 0x51f   : > { %4307 = vmatprep.subr.bf16.mxu0 %v7047_v32  ;;  %v4491_v32 = vpack.c.bf16 %v4490_v62, %v4489_v10  ;;  %v7203_v10 = vld [vmem:[%s8368_s13 + $0xa4] ss:$8 sps:$4 sm:$0xff]   ;;  %v7201_v62 = vld [vmem:[%s8368_s13 + $0xa0] ss:$8 sps:$4 sm:$0xff]  }
 0x522   : > { %4308 = vmatpush1.bf16.msra.mxu0 %v7045_v43  ;;  %v7104_v43 = vld [vmem:[#allocation9 + $0x314] ss:$8 sps:$4 sm:$0xff]  }
 0x523   : > { %4309 = vmatprep.subr.bf16.mxu0 %v7050_v9  ;;  %v7195_v9 = vld [vmem:[%s8368_s13 + $0x80] ss:$8 sps:$4 sm:$0xff]  }
 0x524   : > { %5363 = vmatpush1.bf16.msra.mxu1 %v7195_v9  ;;  %v7210_v9 = vld [vmem:[%s8368_s13 + $0xd0] ss:$8 sps:$4 sm:$0xff]  }
 0x526   : > { %4310 = vmatpush1.bf16.msra.mxu0 %v7048_v11  ;;  %v7102_v11 = vld [vmem:[#allocation9 + $0x310] ss:$8 sps:$4 sm:$0xff]  }
 0x527   : > { %4442 = vmatprep.subr.bf16.mxu0 %v7053_v12  ;;  %v7107_v12 = vld [vmem:[#allocation9 + $0x324] ss:$8 sps:$4 sm:$0xff]  }
 0x529   : > { %4328 = vmatmul.mubr.bf16.vlgmr.msra.gmra.mrb[4].mxu0 %v4197_v17  ;;  %v7113_v17 = vld [vmem:[#allocation9 + $0x344] ss:$8 sps:$4 sm:$0xff]  }
 0x52a   : > { %4443 = vmatpush1.bf16.msra.mxu0 %v7051_v16  ;;  %4474 = vmatprep.mubr.bf16.mxu0 %v7339_v53  ;;  %v7108_v16 = vld [vmem:[#allocation9 + $0x330] ss:$8 sps:$4 sm:$0xff]  }
 0x52b   : > { %4444 = vmatprep.subr.bf16.mxu0 %v7056_v19  ;;  %v7111_v19 = vld [vmem:[#allocation9 + $0x340] ss:$8 sps:$4 sm:$0xff]  }
 0x52e   : > { %4445 = vmatpush1.bf16.msra.mxu0 %v7054_v20  ;;  %v7116_v20 = vld [vmem:[#allocation9 + $0x354] ss:$8 sps:$4 sm:$0xff]  }
 0x52f   : > { %4446 = vmatprep.subr.bf16.mxu0 %v7059_v21  ;;  %v7114_v21 = vld [vmem:[#allocation9 + $0x350] ss:$8 sps:$4 sm:$0xff]  }
 0x532   : > { %4447 = vmatpush1.bf16.msra.mxu0 %v7057_v18  ;;  %v7119_v18 = vld [vmem:[#allocation9 + $0x364] ss:$8 sps:$4 sm:$0xff]  }
 0x533   : > { %4448 = vmatprep.subr.bf16.mxu0 %v7062_v22  ;;  %v7117_v22 = vld [vmem:[#allocation9 + $0x360] ss:$8 sps:$4 sm:$0xff]  }
 0x536   : > { %4449 = vmatpush1.bf16.msra.mxu0 %v7060_v23  ;;  %v7122_v23 = vld [vmem:[#allocation9 + $0x374] ss:$8 sps:$4 sm:$0xff]  }
 0x537   : > { %4450 = vmatprep.subr.bf16.mxu0 %v7065_v24  ;;  %v7120_v24 = vld [vmem:[#allocation9 + $0x370] ss:$8 sps:$4 sm:$0xff]  }
 0x53a   : > { %4451 = vmatpush1.bf16.msra.mxu0 %v7063_v25  ;;  %v7125_v25 = vld [vmem:[#allocation9 + $0x384] ss:$8 sps:$4 sm:$0xff]  }
 0x53b   : > { %4452 = vmatprep.subr.bf16.mxu0 %v7068_v26  ;;  %v4636_v26 = vld [vmem:[#allocation4 + $0x17] sm:$0xff] }
 0x53e   : > { %4453 = vmatpush1.bf16.msra.mxu0 %v7066_v29  ;;  %v4637_v29 = vld [vmem:[#allocation4 + $0x1f] sm:$0x3] }
 0x53f   : > { %4454 = vmatprep.subr.bf16.mxu0 %v7071_v31  ;;  %v7123_v31 = vld [vmem:[#allocation9 + $0x380] ss:$8 sps:$4 sm:$0xff]  }
 0x542   : > { %4455 = vmatpush1.bf16.msra.mxu0 %v7069_v33  ;;  %v4638_v33 = vpack.c.bf16 %v4637_v29, %v4636_v26 }
 0x543   : > { %4456 = vmatprep.subr.bf16.mxu0 %v7074_v34  ;;  %v7128_v34 = vld [vmem:[#allocation9 + $0x394] ss:$8 sps:$4 sm:$0xff]  }
 0x546   : > { %4457 = vmatpush1.bf16.msra.mxu0 %v7072_v35  ;;  %v7126_v35 = vld [vmem:[#allocation9 + $0x390] ss:$8 sps:$4 sm:$0xff]  }
 0x547   : > { %4589 = vmatprep.subr.bf16.mxu0 %v7077_v58  ;;  %v7131_v58 = vld [vmem:[#allocation9 + $0x3a4] ss:$8 sps:$4 sm:$0xff]  }
 0x549   : > { %4475 = vmatmul.mubr.bf16.vlgmr.msra.gmra.mrb[4].mxu0 %v4344_v38  ;;  %v7137_v38 = vld [vmem:[#allocation9 + $0x3c4] ss:$8 sps:$4 sm:$0xff]  }
 0x54a   : > { %4590 = vmatpush1.bf16.msra.mxu0 %v7075_v37  ;;  %4621 = vmatprep.mubr.bf16.mxu0 %v7339_v53  ;;  %v7132_v37 = vld [vmem:[#allocation9 + $0x3b0] ss:$8 sps:$4 sm:$0xff]  }
 0x54b   : > { %4591 = vmatprep.subr.bf16.mxu0 %v7080_v40  ;;  %v7135_v40 = vld [vmem:[#allocation9 + $0x3c0] ss:$8 sps:$4 sm:$0xff]  }
 0x54e   : > { %4592 = vmatpush1.bf16.msra.mxu0 %v7078_v41  ;;  %v7143_v41 = vld [vmem:[#allocation9 + $0x3e4] ss:$8 sps:$4 sm:$0xff]  }
 0x54f   : > { %4593 = vmatprep.subr.bf16.mxu0 %v7083_v44  ;;  %v7146_v44 = vld [vmem:[#allocation9 + $0x3f4] ss:$8 sps:$4 sm:$0xff]  }
 0x552   : > { %4594 = vmatpush1.bf16.msra.mxu0 %v7081_v48  ;;  %v4783_v48 = vld [vmem:[#allocation4 + $0x18] sm:$0xff] }
 0x553   : > { %4595 = vmatprep.subr.bf16.mxu0 %v7086_v49  ;;  %v4784_v49 = vld [vmem:[#allocation4 + $0x20] sm:$0x3] }
 0x554   : > { %v4785_v51 = vpack.c.bf16 %v4784_v49, %v4783_v48 }
 0x556   : > { %4596 = vmatpush1.bf16.msra.mxu0 %v7084_v52  ;;  %v7152_v52 = vld [vmem:[#allocation9 + $0x414] ss:$8 sps:$4 sm:$0xff]  }
 0x557   : > { %4597 = vmatprep.subr.bf16.mxu0 %v7089_v47  ;;  %v7150_v47 = vld [vmem:[#allocation9 + $0x410] ss:$8 sps:$4 sm:$0xff]  }
 0x55a   : > { %4598 = vmatpush1.bf16.msra.mxu0 %v7087_v57  ;;  %v7158_v57 = vld [vmem:[#allocation9 + $0x434] ss:$8 sps:$4 sm:$0xff]  }
 0x55b   : > { %4599 = vmatprep.subr.bf16.mxu0 %v7092_v54  ;;  %v7156_v54 = vld [vmem:[#allocation9 + $0x430] ss:$8 sps:$4 sm:$0xff]  }
 0x55e   : > { %4600 = vmatpush1.bf16.msra.mxu0 %v7090_v61  ;;  %v7164_v61 = vld [vmem:[#allocation9 + $0x454] ss:$8 sps:$4 sm:$0xff]  }
 0x55f   : > { %4601 = vmatprep.subr.bf16.mxu0 %v7095_v63  ;;  %v7162_v63 = vld [vmem:[#allocation9 + $0x450] ss:$8 sps:$4 sm:$0xff]  }
 0x562   : > { %4602 = vmatpush1.bf16.msra.mxu0 %v7093_v27  ;;  %v7168_v27 = vld [vmem:[#allocation9 + $0x470] ss:$8 sps:$4 sm:$0xff]  }
 0x563   : > { %4603 = vmatprep.subr.bf16.mxu0 %v7098_v0  ;;  %v4930_v0 = vld [vmem:[#allocation4 + $0x19] sm:$0xff] }
 0x564   : > { %v4932_v5 = vpack.c.bf16 %v4931_v4, %v4930_v0  ;;  %v7228_v0 = vld [vmem:[%s8370_s15 + $0x20] sm:$0xff]   ;;  %v7229_v4 = vld [vmem:[%s8370_s15 + $0x68] sm:$0xff]  }
 0x566   : > { %4604 = vmatpush1.bf16.msra.mxu0 %v7096_v6  ;;  %v7200_v6 = vld [vmem:[%s8368_s13 + $0x94] ss:$8 sps:$4 sm:$0xff]  }
 0x567   : > { %4736 = vmatprep.subr.bf16.mxu0 %v7101_v7  ;;  %v7198_v7 = vld [vmem:[%s8368_s13 + $0x90] ss:$8 sps:$4 sm:$0xff]   ;;  %5364 = vmatprep.subr.bf16.mxu1 %v7200_v6 }
 0x568   : > { %5365 = vmatpush1.bf16.msra.mxu1 %v7198_v7  ;;  %v7231_v6 = vld [vmem:[%s8370_s15 + $0x70] sm:$0xff]  }
 0x569   : > { %4622 = vmatmul.mubr.bf16.vlgmr.msra.gmra.mrb[4].mxu0 %v4491_v32  ;;  %5366 = vmatprep.subr.bf16.mxu1 %v7203_v10  ;;  %v7207_v32 = vld [vmem:[%s8368_s13 + $0xc0] ss:$8 sps:$4 sm:$0xff]   ;;  %v7232_v7 = vld [vmem:[%s8370_s15 + $0x30] sm:$0xff]   ;;  %v7233_v10 = vld [vmem:[%s8370_s15 + $0x78] sm:$0xff]  }
 0x56a   : > { %4737 = vmatpush1.bf16.msra.mxu0 %v7099_v3  ;;  %4768 = vmatprep.mubr.bf16.mxu0 %v7339_v53  ;;  %v7209_v3 = vld [vmem:[%s8368_s13 + $0xc4] ss:$8 sps:$4 sm:$0xff]  }
 0x56b   : > { %4738 = vmatprep.subr.bf16.mxu0 %v7104_v43  ;;  %v7212_v43 = vld [vmem:[%s8368_s13 + $0xd4] ss:$8 sps:$4 sm:$0xff]  }
 0x56c   : > { %5367 = vmatpush1.bf16.msra.mxu1 %v7201_v62  ;;  %v7234_v62 = vld [vmem:[%s8370_s15 + $0x38] sm:$0xff]  }
 0x56d   : > { %5368 = vmatprep.subr.bf16.mxu1 %v7206_v39 }
 0x56e   : > { %4739 = vmatpush1.bf16.msra.mxu0 %v7102_v11  ;;  %v7215_v11 = vld [vmem:[%s8368_s13 + $0xe4] ss:$8 sps:$4 sm:$0xff]  }
 0x56f   : > { %4740 = vmatprep.subr.bf16.mxu0 %v7107_v12  ;;  %v7213_v12 = vld [vmem:[%s8368_s13 + $0xe0] ss:$8 sps:$4 sm:$0xff]  }
 0x570   : > { %5369 = vmatpush1.bf16.msra.mxu1 %v7204_v8  ;;  %v5174_v8 = vld [vmem:[%s8369_s14] sm:$0x3] }
 0x571   : > { %5370 = vmatprep.subr.bf16.mxu1 %v7209_v3 }
 0x572   : > { %4741 = vmatpush1.bf16.msra.mxu0 %v7105_v13  ;;  %v7218_v13 = vld [vmem:[%s8368_s13 + $0xf4] ss:$8 sps:$4 sm:$0xff]  }
 0x573   : > { %4742 = vmatprep.subr.bf16.mxu0 %v7110_v14  ;;  %v7216_v14 = vld [vmem:[%s8368_s13 + $0xf0] ss:$8 sps:$4 sm:$0xff]  }
 0x574   : > { %5371 = vmatpush1.bf16.msra.mxu1 %v7207_v32 }
 0x575   : > { %5372 = vmatprep.subr.bf16.mxu1 %v7212_v43 }
 0x576   : > { %4743 = vmatpush1.bf16.msra.mxu0 %v7108_v16  ;;  %v7219_v16 = vld [vmem:[%s8370_s15 + $0x40] sm:$0xff]  }
 0x577   : > { %4744 = vmatprep.subr.bf16.mxu0 %v7113_v17  ;;  %v5079_v17 = vlaneseq }
 0x578   : > { %5373 = vmatpush1.bf16.msra.mxu1 %v7210_v9 }
 0x579   : > { %5374 = vmatprep.subr.bf16.mxu1 %v7215_v11 }
 0x57a   : > { %4745 = vmatpush1.bf16.msra.mxu0 %v7111_v19  ;;  %v5080_v19 = vshrl.u32 %v5079_v17, 7 }
 0x57b   : > { %4746 = vmatprep.subr.bf16.mxu0 %v7116_v20 }
 0x57c   : > { %5375 = vmatpush1.bf16.msra.mxu1 %v7213_v12  ;;  %v8239_v20 = vsub.s32 0, %v5080_v19 }
 0x57d   : > { %5376 = vmatprep.subr.bf16.mxu1 %v7218_v13 }
 0x57e   : > { %4747 = vmatpush1.bf16.msra.mxu0 %v7114_v21  ;;  %v5077_v21 = vld [vmem:[%s8366_s11] sm:$0x3]  ;;  %v5339_v39 = vrot.slane %v5174_v8, %v8239_v20 }
 0x57f   : > { %4748 = vmatprep.subr.bf16.mxu0 %v7119_v18  ;;  %v8244_v18 = vsub.s32 1, %v5080_v19 }
 0x580   : > { %5377 = vmatpush1.bf16.msra.mxu1 %v7216_v14 }
 0x581   : > { %6293 = vmatprep.subr.bf16.mxu1 %v7219_v16  ;;  %v5343_v3 = vrot.slane %v5174_v8, %v8244_v18 }
 0x582   : > { %4749 = vmatpush1.bf16.msra.mxu0 %v7117_v22  ;;  %v5093_v22 = vld [vmem:[%s8367_s12] sm:$0x3] }
 0x583   : > { %4750 = vmatprep.subr.bf16.mxu0 %v7122_v23  ;;  %v5082_v23 = vrot.slane %v5077_v21, %v8239_v20  ;;  %v5102_v29 = vrot.slane %v5093_v22, %v8244_v18 }
 0x586   : > { %4751 = vmatpush1.bf16.msra.mxu0 %v7120_v24  ;;  %v5086_v24 = vrot.slane %v5077_v21, %v8244_v18 }
 0x587   : > { %4883 = vmatprep.subr.bf16.mxu0 %v7125_v25  ;;  %v5098_v25 = vrot.slane %v5093_v22, %v8239_v20 }
 0x589   : > { %4769 = vmatmul.mubr.bf16.vlgmr.msra.gmra.mrb[4].mxu0 %v4638_v33 }
 0x58a   : > { %4884 = vmatpush1.bf16.msra.mxu0 %v7123_v31  ;;  %4915 = vmatprep.mubr.bf16.mxu0 %v7339_v53 }
 0x58b   : > { %4885 = vmatprep.subr.bf16.mxu0 %v7128_v34 }
 0x58e   : > { %4886 = vmatpush1.bf16.msra.mxu0 %v7126_v35 }
 0x58f   : > { %4887 = vmatprep.subr.bf16.mxu0 %v7131_v58 }
 0x592   : > { %4888 = vmatpush1.bf16.msra.mxu0 %v7129_v36 }
 0x593   : > { %4889 = vmatprep.subr.bf16.mxu0 %v7134_v28 }
 0x596   : > { %4890 = vmatpush1.bf16.msra.mxu0 %v7132_v37 }
 0x597   : > { %4891 = vmatprep.subr.bf16.mxu0 %v7137_v38 }
 0x59a   : > { %4892 = vmatpush1.bf16.msra.mxu0 %v7135_v40 }
 0x59b   : > { %4893 = vmatprep.subr.bf16.mxu0 %v7140_v15 }
 0x59e   : > { %4894 = vmatpush1.bf16.msra.mxu0 %v7138_v30 }
 0x59f   : > { %4895 = vmatprep.subr.bf16.mxu0 %v7143_v41 }
 0x5a2   : > { %4896 = vmatpush1.bf16.msra.mxu0 %v7141_v42 }
 0x5a3   : > { %4897 = vmatprep.subr.bf16.mxu0 %v7146_v44 }
 0x5a6   : > { %4898 = vmatpush1.bf16.msra.mxu0 %v7144_v45 }
 0x5a7   : > { %5030 = vmatprep.subr.bf16.mxu0 %v7149_v46 }
 0x5a9   : > { %4916 = vmatmul.mubr.bf16.vlgmr.msra.gmra.mrb[4].mxu0 %v4785_v51 }
 0x5aa   : > { %5031 = vmatpush1.bf16.msra.mxu0 %v7147_v50  ;;  %5062 = vmatprep.mubr.bf16.mxu0 %v7339_v53  ;;  %v7165_v53 = vld [vmem:[#allocation9 + $0x460] ss:$8 sps:$4 sm:$0xff]  }
 0x5ab   : > { %5032 = vmatprep.subr.bf16.mxu0 %v7152_v52 }
 0x5ae   : > { %5033 = vmatpush1.bf16.msra.mxu0 %v7150_v47 }
 0x5af   : > { %5034 = vmatprep.subr.bf16.mxu0 %v7155_v55 }
 0x5b2   : > { %5035 = vmatpush1.bf16.msra.mxu0 %v7153_v56 }
 0x5b3   : > { %5036 = vmatprep.subr.bf16.mxu0 %v7158_v57 }
 0x5b6   : > { %5037 = vmatpush1.bf16.msra.mxu0 %v7156_v54 }
 0x5b7   : > { %5038 = vmatprep.subr.bf16.mxu0 %v7161_v59  ;;  %v7220_v59 = vld [vmem:[%s8370_s15] sm:$0xff]  }
 0x5ba   : > { %5039 = vmatpush1.bf16.msra.mxu0 %v7159_v60  ;;  %v7221_v60 = vld [vmem:[%s8370_s15 + $0x48] sm:$0xff]  }
 0x5bb   : > { %5040 = vmatprep.subr.bf16.mxu0 %v7164_v61  ;;  %v7222_v61 = vld [vmem:[%s8370_s15 + $0x8] sm:$0xff]  }
 0x5be   : > { %5041 = vmatpush1.bf16.msra.mxu0 %v7162_v63  ;;  %v7223_v63 = vld [vmem:[%s8370_s15 + $0x50] sm:$0xff]  }
 0x5bf   : > { %5042 = vmatprep.subr.bf16.mxu0 %v7167_v1  ;;  %v7224_v1 = vld [vmem:[%s8370_s15 + $0x10] sm:$0xff]  }
 0x5c2   : > { %5043 = vmatpush1.bf16.msra.mxu0 %v7165_v53  ;;  %v7225_v53 = vld [vmem:[%s8370_s15 + $0x58] sm:$0xff]  }
 0x5c3   : > { %5044 = vmatprep.subr.bf16.mxu0 %v7170_v2  ;;  %v7226_v2 = vld [vmem:[%s8370_s15 + $0x18] sm:$0xff]  }
 0x5c6   : > { %5045 = vmatpush1.bf16.msra.mxu0 %v7168_v27  ;;  %v7227_v27 = vld [vmem:[%s8370_s15 + $0x60] sm:$0xff]  }
 0x5c9   : > { %5063 = vmatmul.mubr.bf16.vlgmr.msra.gmra.mrb[4].mxu0 %v4932_v5  ;;  %v7230_v5 = vld [vmem:[%s8370_s15 + $0x28] sm:$0xff]  }
 0x69c   : > { %v5064_v26 = vpop.f32.mrb[4].mxu0 }
 0x69d   : > { %v5089_v31 = vmul.f32 %v5082_v23, %v5064_v26  ;;  %v5066_v33 = vpop.f32.mrb[5].mxu0 }
 0x69e   : > { %v5090_v34 = vmul.f32 %v5086_v24, %v5066_v33  ;;  %v5068_v35 = vpop.f32.mrb[6].mxu0 }
 0x69f   : > { %v5105_v58 = vadd.f32 %v5098_v25, %v5089_v31  ;;  %v5091_v36 = vmul.f32 %v5082_v23, %v5068_v35  ;;  %v5070_v28 = vpop.f32.mrb[7].mxu0 }
 0x6a0   : > { %v5106_v37 = vadd.f32 %v5102_v29, %v5090_v34  ;;  %v5092_v38 = vmul.f32 %v5086_v24, %v5070_v28 }
 0x6a1   : > { %v5109_v40 = vmax.f32 %v5105_v58, 0.0  ;;  %v5107_v15 = vadd.f32 %v5098_v25, %v5091_v36 }
 0x6a2   : > { %v5110_v30 = vmax.f32 %v5106_v37, 0.0  ;;  %v5108_v41 = vadd.f32 %v5102_v29, %v5092_v38 }
 0x6a3   : > { %5113 = vst [vmem:[#allocation8] sm:$0xff] %v5109_v40  ;;  %v5111_v42 = vmax.f32 %v5107_v15, 0.0 }
 0x6a4   : > { %5114 = vst [vmem:[#allocation8 + $0x8] sm:$0xff] %v5110_v30  ;;  %v5112_v44 = vmax.f32 %v5108_v41, 0.0 }
 0x6a5   : > { %5115 = vst [vmem:[#allocation8 + $0x10] sm:$0x3] %v5111_v42 }
 0x6a6   : > { %5116 = vst [vmem:[#allocation8 + $0x18] sm:$0x3] %v5112_v44 }
 0x6ab   : > { %v5117_v45 = vld [vmem:[#allocation8] ss:$8 sm:$0x3]  ;;  %v5120_v46 = vld [vmem:[#allocation8 + $0x1] ss:$8 sm:$0x3] }
 0x6ac   : > { %v5121_v48 = vadd.f32 %v5120_v46, %v5117_v45 }
 0x6ad   : > { %v5123_v49 = vld [vmem:[#allocation8 + $0x10] ss:$8 sm:$0x3]  ;;  %v5126_v51 = vld [vmem:[#allocation8 + $0x11] ss:$8 sm:$0x3] }
 0x6ae   : > { %v5124_v50 = vadd.f32 %v5123_v49, %v5121_v48 }
 0x6b0   : > { %v5127_v52 = vadd.f32 %v5126_v51, %v5124_v50 }
 0x6b2   : > { %v5128_v47 = vmul.f32 0.25, %v5127_v52 }
 0x6b4   : > { %v5133_v55 = vrot.slane %v5128_v47, %v8239_v20  ;;  %v5137_v56 = vrot.slane %v5128_v47, %v8244_v18  ;;  %v5423_v20 = vld [vmem:[%s8371_s16] sm:$0x1] }
 0x6b6   : > { %v5140_v57 = vpack.c.bf16 %v5133_v55, %v5133_v55  ;;  %v5141_v54 = vpack.c.bf16 %v5137_v56, %v5137_v56 }
 0x6b8   : > { %5378 = vmatprep.mubr.bf16.mxu1 %v5141_v54 }
 0x6b9   : > { %5379 = vmatmul.mubr.bf16.vlgmr.msra.gmra.mrb[48].mxu1 %v5140_v57 }
 0x6ba   : > { %6294 = vmatpush3.bf16.msra.mxu1 %v7220_v59 }
 0x6bb   : > { %6295 = vmatprep.subr.bf16.mxu1 %v7221_v60 }
 0x6be   : > { %6296 = vmatpush3.bf16.msra.mxu1 %v7222_v61 }
 0x6bf   : > { %6297 = vmatprep.subr.bf16.mxu1 %v7223_v63 }
 0x6c2   : > { %6298 = vmatpush3.bf16.msra.mxu1 %v7224_v1 }
 0x6c3   : > { %6299 = vmatprep.subr.bf16.mxu1 %v7225_v53 }
 0x6c6   : > { %6300 = vmatpush3.bf16.msra.mxu1 %v7226_v2 }
 0x6c7   : > { %6301 = vmatprep.subr.bf16.mxu1 %v7227_v27 }
 0x6ca   : > { %6302 = vmatpush3.bf16.msra.mxu1 %v7228_v0 }
 0x6cb   : > { %6303 = vmatprep.subr.bf16.mxu1 %v7229_v4 }
 0x6ce   : > { %6304 = vmatpush3.bf16.msra.mxu1 %v7230_v5 }
 0x6cf   : > { %6305 = vmatprep.subr.bf16.mxu1 %v7231_v6 }
 0x6d2   : > { %6306 = vmatpush3.bf16.msra.mxu1 %v7232_v7 }
 0x6d3   : > { %6307 = vmatprep.subr.bf16.mxu1 %v7233_v10 }
 0x6d6   : > { %6308 = vmatpush3.bf16.msra.mxu1 %v7234_v62 }
 0x78c   : > { %v5380_v32 = vpop.f32.mrb[48].mxu1 }
 0x78d   : > { %v5381_v43 = vadd.f32 %v5380_v32, %v5339_v39  ;;  %v5382_v9 = vpop.f32.mrb[49].mxu1 }
 0x78e   : > { %v5383_v11 = vadd.f32 %v5382_v9, %v5343_v3  ;;  %v5384_v12 = vpop.f32.mrb[50].mxu1 }
 0x78f   : > { %v5387_v13 = vmax.f32 %v5381_v43, 0.0  ;;  %v5385_v14 = vpop.f32.mrb[51].mxu1 }
 0x790   : > { %v5388_v16 = vmax.f32 %v5383_v11, 0.0 }
 0x791   : > { %v5389_v19 = vpack.c.bf16 %v5387_v13, %v5387_v13 }
 0x792   : > { %v5390_v17 = vpack.c.bf16 %v5388_v16, %v5388_v16 }
 0x794   : > { %5552 = vmatprep.mubr.bf16.mxu1 %v5390_v17 }
 0x795   : > { %5553 = vmatmul.mubr.bf16.vlgmr.msra.gmra.mrb[52].mxu1 %v5389_v19 }
 0x868   : > { %v6309_v21 = vpop.f32.mrb[52].mxu1 }
 0x869   : > { %v6310_v18 = vpop.f32.mrb[53].mxu1 }
 0x86a   : > { %v6311_v22 = vadd.f32 %v6310_v18, %v6309_v21  ;;  %v6312_v23 = vpop.f32.mrb[54].mxu1 }
 0x86b   : > { %v6313_v24 = vpop.f32.mrb[55].mxu1 }
 0x86c   : > { %v5555_v25 = vadd.f32 %v6311_v22, %v5423_v20 }
 0x86e   : > { %v5560_v26 = vmul.f32 %v5555_v25, %v5555_v25 }
 0x870   : > { %v5562_v29 = vsel %vm5561_vm6, %v5560_v26, 0.0 }
 0x871   : > { %5563 = vadd.xlane.f32.xlu0 %v5562_v29 }
 0x8fe   : > { %v5564_v31 = vpop.xlane.xlu0 %5563 }
 0x8ff   : > { %v5565_v33 = vmax.f32 %v5564_v31, 1e-24 }
 0x901   : > { %7235 = vrsqrt.f32 %v5565_v33 }
 0x90b   : > { %v7236_v34 = vpop.eup %7235 }
 0x90c   : > { %v5567_v35 = vmul.f32 %v7236_v34, %v5555_v25 }
 0x90e   : > { %5568 = vst [vmem:[%s555_s23] sm:$0x1] %v5567_v35 }
 0x90f   : > { %7279 = shalt.err (!%p7276_p7)
}
 0x910   : > { %s7280_s20 = scalar_lea.hbm %s8313_s0, 16  ;;  %s7284_s22 = scalar_lea.hbm %s8372_s17, 32 }
 0x911   : > { %p7281_p8 = scmp.ne.s32.totalorder %s8313_s0, %s7280_s20  ;;  %p7285_p1 = scmp.lt.u32.totalorder %s8313_s0, %s8372_s17 }
 0x912   : > { %p7286_p0 = scmp.lt.u32.totalorder %s7284_s22, %s7280_s20  ;;  %p7288_p6 = scmp.lt.u32.totalorder %s7280_s20, %s8313_s0 }
 0x913   : > { %p7282_p11 = pnand %p7281_p8, %p8397_p9 }
 0x914   : > { %p7287_p5 = por %p7286_p0, %p7285_p1 }
 0x915   : > { %p7283_p13 = pneg %p7282_p11 }
 0x916   : > { %p7289_p10 = por %p7288_p6, %p7287_p5 }
 0x918   : > { %p7290_p12 = pnand %p7289_p10, %p7283_p13 }
 0x91a   : > { %7293 = shalt.err (!%p7290_p12)
}
 0x91b   : > { %6833 = dma.vmem_to_hbm [thread:$0]  (%p8397_p9), %s8315_s29, 16, %s8313_s0, %s5570_s30  }
 0x91c PF: > { %s8398_s18 = sld [smem:[#allocation15_spill]]  ;;  %s8399_s24 = sld [smem:[#allocation19_spill]] }
 0x91d   : > { %p6845_p2 = scmp.ge.s32.totalorder %s7332_s27, 2 }
 0x922   : > { %s5594_s19 = sand.u32 1, %s8398_s18   ;;  %p8400_p3 = scmp.ne.s32.totalorder %s8399_s24, 0 }
 0x923   : > { %s5595_s21 = scalar_lea.sflag [#allocation11], %s5594_s19 }
 0x924   : > { %p6840_p4 = pnand %p6845_p2, %p8400_p3 }
 0x926   : > { %7315 = dma.done.wait (!%p6840_p4), %s5595_s21, 16  }
 0x927   : > { %7317 = vsyncadd (!%p6840_p4), %s5595_s21, 4294967280  ;;  %s8401_s27 = sld [smem:[#allocation17_spill]]  ;;  %s8402_s20 = sld [smem:[#allocation16_spill]] }
 0x928   : > { %s8403_s26 = sld [smem:[#allocation18_spill]]  ;;  %s8404_s24 = smov %s7324_s25 }
 0x92d   : > { %p28_p7 = scmp.ge.s32.totalorder %s8401_s27, 4   ;;  %s8405_s25 = smov %s8402_s20 }
 0x92f   :  { %30 = sbr.rel (!%p28_p7) target bundleno = 7 (0x7), region = 208 }
 0x936   :  { %5599 = vsyncpa [#allocation10], 1 }
 0x937   :  { %5601 = vsyncpa [#allocation10 + $0x1], 1 }
 0x938   :  { %5602 = vsyncpa [#allocation11], 1 }
 0x939   :  { %5604 = vsyncpa [#allocation11 + $0x1], 1 }

</bundles_post_ra>
